<compile_context>
chip_gen: v7x
topology: tpu7x:2x2x1
jax: 0.10.0
libtpu: 0.0.40
codegen_flags: <defaults>
</compile_context>

<pallas_src>
import functools

import jax
import jax.numpy as jnp
from jax.experimental import pallas as pl
from jax.experimental.pallas import tpu as pltpu

LANES = 128


def _round_up(x, m):
    return ((x + m - 1) // m) * m


# --------------------------------------------------------------------------
# Kernels
# --------------------------------------------------------------------------
def conv_pool_relu_kernel(p_ref, w_ref, b_ref, o_ref):
    """Fused conv (im2col matmul) + 2x2 max-pool + bias + ReLU for one M-tile.

    p_ref: (4, TM, KKC) bf16  pool-grouped im2col patches (g = pool position).
    w_ref: (KKC, 128)  bf16   conv weight, (kh,kw,c)-flat, transposed, padded.
    b_ref: (1, 128)    f32    zero-padded bias.
    o_ref: (TM, 128)   bf16   pooled + relu'd output (lane-dense).
    """
    g, tm, kkc = p_ref.shape
    y = jnp.dot(p_ref[...].reshape(g * tm, kkc), w_ref[...],
                preferred_element_type=jnp.float32)
    y = y.reshape(g, tm, LANES)
    pooled = jnp.max(y, axis=0)                      # max over pool positions
    # max(conv)+bias == max(conv+bias): bias is a per-channel constant.
    o_ref[...] = jnp.maximum(pooled + b_ref[...], 0.0).astype(o_ref.dtype)


def conv2_mlp_kernel(p_ref, w2_ref, b2_ref, wf1_ref, bf1_ref, wf2_ref, bf2_ref,
                     o_ref, *, num_classes):
    """conv2 + pool + ReLU + flatten + fc1 + ReLU + fc2 + log_softmax (1 batch tile).

    p_ref:   (4, P, TB, KKC) bf16 pool-grouped conv2 patches.
    w2_ref:  (KKC, 128) bf16, b2_ref: (1, 128) f32   conv2 weight / bias.
    wf1_ref: (P, 128, 128) bf16  fc1 weight as [spatial, channel_pad, hidden_pad].
    bf1_ref: (1, 128) f32, wf2_ref: (128, 128) bf16, bf2_ref: (1, 128) f32.
    o_ref:   (TB, 128) f32  log-softmax output; first num_classes lanes valid.
    """
    g, P, tb, kkc = p_ref.shape

    # conv2 as one matmul over all (pool-pos, spatial, batch) rows.
    y = jnp.dot(p_ref[...].reshape(g * P * tb, kkc), w2_ref[...],
                preferred_element_type=jnp.float32)
    y = y.reshape(g, P, tb, LANES)
    pooled = jnp.max(y, axis=0)                              # (P, TB, 128)
    h = jnp.maximum(pooled + b2_ref[...], 0.0).astype(jnp.bfloat16)

    # flatten (NCHW order) + fc1 as ONE batched dot_general over the spatial
    # axis (P matmuls pipelined on the MXU), then a single reduction.
    acc = jax.lax.dot_general(h, wf1_ref[...],
                              dimension_numbers=(((2,), (1,)), ((0,), (0,))),
                              preferred_element_type=jnp.float32)  # (P, TB, 128)
    h1 = jnp.maximum(jnp.sum(acc, axis=0) + bf1_ref[...], 0.0)     # (TB, 128)

    # TODO(synk): F.dropout(training=True) random masking not implemented;
    # this reproduces eval-mode (identity) semantics.

    z = jnp.dot(h1.astype(jnp.bfloat16), wf2_ref[...],
                preferred_element_type=jnp.float32) + bf2_ref[...]

    # log_softmax over the first num_classes lanes (exp on the MASKED logits,
    # padded output lanes forced to 0 before the store).
    col = jax.lax.broadcasted_iota(jnp.int32, z.shape, 1)
    valid = col < num_classes
    zm = jnp.where(valid, z, jnp.float32(-1e30))
    m = jnp.max(zm, axis=1, keepdims=True)
    lse = jnp.log(jnp.sum(jnp.exp(zm - m), axis=1, keepdims=True))
    o_ref[...] = jnp.where(valid, z - m - lse, 0.0)


# --------------------------------------------------------------------------
# One-time parameter repacking (outside the per-step jit)
# --------------------------------------------------------------------------
def _pad_conv_weight(w):
    """[OC, C, K, K] -> [K*K*C, 128] ((kh,kw,c)-flattened, transposed, padded)."""
    OC, C, K, _ = w.shape
    wt = w.transpose(0, 2, 3, 1).reshape(OC, K * K * C).T
    return jnp.pad(wt, ((0, 0), (0, LANES - OC)))


def _pad_bias(b):
    return jnp.pad(b, (0, LANES - b.shape[0])).reshape(1, LANES).astype(jnp.float32)


def prepare_params(params):
    """Pad / transpose / cast all weights once; returns (prepared, static cfg)."""
    conv1_w, conv1_b = params["conv1_w"], params["conv1_b"]
    conv2_w, conv2_b = params["conv2_w"], params["conv2_b"]
    fc1_w, fc1_b = params["fc1_w"], params["fc1_b"]
    fc2_w, fc2_b = params["fc2_w"], params["fc2_b"]

    OC2 = conv2_w.shape[0]
    nh = fc1_w.shape[0]
    ncls = fc2_w.shape[0]
    P2 = fc1_w.shape[1] // OC2   # pooled conv2 spatial size (h2*w2)

    # fc1 weight: torch flattens NCHW as (c, h, w); re-lay as [p, c_pad, n_pad].
    wf1 = fc1_w.reshape(nh, OC2, P2).transpose(2, 1, 0)            # (P2, OC2, nh)
    wf1 = jnp.pad(wf1, ((0, 0), (0, LANES - OC2), (0, LANES - nh)))
    wf2 = jnp.pad(fc2_w.T, ((0, LANES - nh), (0, LANES - ncls)))

    prepared = {
        "w1": _pad_conv_weight(conv1_w).astype(jnp.bfloat16),
        "b1": _pad_bias(conv1_b),
        "w2": _pad_conv_weight(conv2_w).astype(jnp.bfloat16),
        "b2": _pad_bias(conv2_b),
        "wf1": wf1.astype(jnp.bfloat16),
        "bf1": _pad_bias(fc1_b),
        "wf2": wf2.astype(jnp.bfloat16),
        "bf2": _pad_bias(fc2_b),
    }
    cfg = {
        "K1": int(conv1_w.shape[2]),
        "K2": int(conv2_w.shape[2]),
        "C2": int(conv2_w.shape[1]),
        "ncls": int(ncls),
    }
    return prepared, cfg


# --------------------------------------------------------------------------
# Wrapper glue (im2col) — plain JAX/XLA on tiny bf16 tensors.
# --------------------------------------------------------------------------
def _pool_grouped_patches_nhwc(x, K, C, p_major):
    """x: [B,H,W,Cfull] -> pool-grouped im2col patches (feature order kh,kw,c).

    p_major=False -> (4, B, PH*PW, K*K*C)   (rows (g, b, p))
    p_major=True  -> (4, PH*PW, B, K*K*C)   (rows (g, p, b))
    """
    B, H, W, _ = x.shape
    OH, OW = H - K + 1, W - K + 1
    PH, PW = OH // 2, OW // 2                       # MaxPool2d(2) floors
    cols = [x[:, kh:kh + OH, kw:kw + OW, :C] for kh in range(K) for kw in range(K)]
    p = jnp.concatenate(cols, axis=-1)[:, :PH * 2, :PW * 2]        # (B,2PH,2PW,KKC)
    groups = [p[:, 0::2, 0::2], p[:, 0::2, 1::2],
              p[:, 1::2, 0::2], p[:, 1::2, 1::2]]
    groups = [g.reshape(B, PH * PW, K * K * C) for g in groups]
    if p_major:
        groups = [g.transpose(1, 0, 2) for g in groups]
    return jnp.stack(groups, axis=0), PH, PW


_COMPILER_PARAMS = pltpu.CompilerParams(
    dimension_semantics=("parallel",),
    vmem_limit_bytes=32 * 1024 * 1024,
)


def conv1_stage(x_nchw, w1, b1, cfg):
    """relu(maxpool2(conv1(x))) -> channels-last [B, PH, PW, 128] bf16."""
    B = x_nchw.shape[0]
    K = cfg["K1"]
    x_nhwc = x_nchw.transpose(0, 2, 3, 1).astype(jnp.bfloat16)
    patches, PH, PW = _pool_grouped_patches_nhwc(x_nhwc, K, x_nhwc.shape[-1],
                                                 p_major=False)    # (4,B,P,KKC)
    P = PH * PW
    KKC = patches.shape[-1]
    M = B * P
    patches = patches.reshape(4, M, KKC)

    TM = min(512, _round_up(M, 16))                 # multiple of 16 (bf16 sublanes)
    Mp = _round_up(M, TM)
    if Mp != M:
        patches = jnp.pad(patches, ((0, 0), (0, Mp - M), (0, 0)))

    cost = pl.CostEstimate(
        flops=int(2 * 4 * Mp * KKC * LANES),
        transcendentals=0,
        bytes_accessed=int(4 * Mp * KKC * 2 + KKC * LANES * 2
                           + LANES * 4 + Mp * LANES * 2),
    )
    out = pl.pallas_call(
        conv_pool_relu_kernel,
        out_shape=jax.ShapeDtypeStruct((Mp, LANES), jnp.bfloat16),
        grid=(Mp // TM,),
        in_specs=[
            pl.BlockSpec((4, TM, KKC), lambda i: (0, i, 0)),
            pl.BlockSpec((KKC, LANES), lambda i: (0, 0)),
            pl.BlockSpec((1, LANES), lambda i: (0, 0)),
        ],
        out_specs=pl.BlockSpec((TM, LANES), lambda i: (i, 0)),
        compiler_params=_COMPILER_PARAMS,
        cost_estimate=cost,
    )(patches, w1, b1)
    return out[:M].reshape(B, PH, PW, LANES)


def conv2_mlp_stage(h_nhwc, prepared, cfg):
    """Fused conv2+pool+relu -> flatten -> fc1 -> relu -> fc2 -> log_softmax."""
    B = h_nhwc.shape[0]
    K, C2, ncls = cfg["K2"], cfg["C2"], cfg["ncls"]
    patches, PH, PW = _pool_grouped_patches_nhwc(h_nhwc, K, C2,
                                                 p_major=True)     # (4,P,B,KKC)
    P = PH * PW
    KKC = patches.shape[-1]

    # Batch tile (multiple of 16 so every bf16 block is sublane-tile aligned).
    TB = min(64, _round_up(B, 16))
    Bp = _round_up(B, TB)
    if Bp != B:
        patches = jnp.pad(patches, ((0, 0), (0, 0), (0, Bp - B), (0, 0)))

    cost = pl.CostEstimate(
        flops=int(2 * 4 * P * Bp * KKC * LANES
                  + 2 * P * Bp * LANES * LANES
                  + 2 * Bp * LANES * LANES),
        transcendentals=int(Bp * (LANES + 1)),
        bytes_accessed=int(4 * P * Bp * KKC * 2 + KKC * LANES * 2
                           + P * LANES * LANES * 2 + LANES * LANES * 2
                           + 3 * LANES * 4 + Bp * LANES * 4),
    )
    out = pl.pallas_call(
        functools.partial(conv2_mlp_kernel, num_classes=ncls),
        out_shape=jax.ShapeDtypeStruct((Bp, LANES), jnp.float32),
        grid=(Bp // TB,),
        in_specs=[
            pl.BlockSpec((4, P, TB, KKC), lambda i: (0, 0, i, 0)),
            pl.BlockSpec((KKC, LANES), lambda i: (0, 0)),
            pl.BlockSpec((1, LANES), lambda i: (0, 0)),
            pl.BlockSpec((P, LANES, LANES), lambda i: (0, 0, 0)),
            pl.BlockSpec((1, LANES), lambda i: (0, 0)),
            pl.BlockSpec((LANES, LANES), lambda i: (0, 0)),
            pl.BlockSpec((1, LANES), lambda i: (0, 0)),
        ],
        out_specs=pl.BlockSpec((TB, LANES), lambda i: (i, 0)),
        compiler_params=_COMPILER_PARAMS,
        cost_estimate=cost,
    )(patches, prepared["w2"], prepared["b2"], prepared["wf1"],
      prepared["bf1"], prepared["wf2"], prepared["bf2"])
    return out[:B, :ncls]


def make_forward(cfg):
    """Build a jitted forward; cfg (kernel sizes etc.) is closed over statically."""
    def forward(x, prepared):
        h = conv1_stage(x, prepared["w1"], prepared["b1"], cfg)
        return conv2_mlp_stage(h, prepared, cfg)
    return jax.jit(forward)


# --------------------------------------------------------------------------
# Main
# --------------------------------------------------------------------------
if __name__ == "__main__":
    B, C, H, W = 2, 1, 28, 28  # CHANNELS=1, MNIST 28x28
    key = jax.random.PRNGKey(0)
    kx, kp = jax.random.split(key)
    x = jax.random.normal(kx, (B, C, H, W), jnp.float32)

    # linearSize exactly as Net.getLinearSize() would compute it.
    h1, w1 = (H - 4) // 2, (W - 4) // 2
    h2, w2 = (h1 - 4) // 2, (w1 - 4) // 2
    linear_size = 20 * h2 * w2  # 320 for 28x28

    ks = jax.random.split(kp, 8)
    params = {
        "conv1_w": 0.1 * jax.random.normal(ks[0], (10, 1, 5, 5), jnp.float32),
        "conv1_b": 0.1 * jax.random.normal(ks[1], (10,), jnp.float32),
        "conv2_w": 0.1 * jax.random.normal(ks[2], (20, 10, 5, 5), jnp.float32),
        "conv2_b": 0.1 * jax.random.normal(ks[3], (20,), jnp.float32),
        "fc1_w": 0.1 * jax.random.normal(ks[4], (50, linear_size), jnp.float32),
        "fc1_b": 0.1 * jax.random.normal(ks[5], (50,), jnp.float32),
        "fc2_w": 0.1 * jax.random.normal(ks[6], (10, 50), jnp.float32),
        "fc2_b": 0.1 * jax.random.normal(ks[7], (10,), jnp.float32),
    }

    prepared, cfg = prepare_params(params)   # one-time repacking, outside jit
    forward = make_forward(cfg)

    out = forward(x, prepared)
    out = jax.block_until_ready(out)
    assert out.shape == (B, 10) and out.dtype == jnp.float32
    assert bool(jnp.all(jnp.isfinite(out)))
    print("KERNEL_OK")
</pallas_src>

<mosaic_0001>
module attributes {stable_mosaic.version = 11 : i64} {
  func.func @conv_pool_relu_kernel(%arg0: i32, %arg1: memref<4x288x25xbf16, #tpu.memory_space<vmem>>, %arg2: memref<25x128xbf16, #tpu.memory_space<vmem>>, %arg3: memref<1x128xf32, #tpu.memory_space<vmem>>, %arg4: memref<288x128xbf16, #tpu.memory_space<vmem>>) attributes {dimension_semantics = [#tpu.dimension_semantics<parallel>], iteration_bounds = array<i64: 1>, scalar_prefetch = 0 : i64, scratch_operands = 0 : i64, tpu.core_type = #tpu.core_type<tc>, window_params = [{transform_indices = @transform_0, window_bounds = array<i64: 4, 288, 25>}, {pipeline_mode = #tpu.pipeline_mode<synchronous>, transform_indices = @transform_1, window_bounds = array<i64: 25, 128>}, {pipeline_mode = #tpu.pipeline_mode<synchronous>, transform_indices = @transform_2, window_bounds = array<i64: 1, 128>}, {transform_indices = @transform_3, window_bounds = array<i64: 288, 128>}]} {
    %c0 = arith.constant 0 : index
    %c0_0 = arith.constant 0 : index
    %c0_1 = arith.constant 0 : index
    %0 = vector.load %arg1[%c0, %c0_0, %c0_1] : memref<4x288x25xbf16, #tpu.memory_space<vmem>>, vector<4x288x25xbf16>
    %1 = vector.shape_cast %0 : vector<4x288x25xbf16> to vector<1152x25xbf16>
    %c0_2 = arith.constant 0 : index
    %c0_3 = arith.constant 0 : index
    %2 = vector.load %arg2[%c0_2, %c0_3] : memref<25x128xbf16, #tpu.memory_space<vmem>>, vector<25x128xbf16>
    %cst = arith.constant dense<0.000000e+00> : vector<1152x128xf32>
    %3 = tpu.matmul %1, %2, %cst {dimension_numbers = #tpu.dot_dimension_numbers<[1], [0], [0], [1], [0, 0, 1, 1], [], []>} : vector<1152x25xbf16>, vector<25x128xbf16>, vector<1152x128xf32> -> vector<1152x128xf32>
    %4 = vector.shape_cast %3 : vector<1152x128xf32> to vector<4x288x128xf32>
    %cst_4 = arith.constant dense<0xFF800000> : vector<288x128xf32>
    %5 = vector.multi_reduction <maximumf>, %4, %cst_4 [0] : vector<4x288x128xf32> to vector<288x128xf32>
    %c0_5 = arith.constant 0 : index
    %c0_6 = arith.constant 0 : index
    %6 = vector.load %arg3[%c0_5, %c0_6] : memref<1x128xf32, #tpu.memory_space<vmem>>, vector<1x128xf32>
    %7 = vector.broadcast %6 : vector<1x128xf32> to vector<288x128xf32>
    %8 = arith.addf %5, %7 : vector<288x128xf32>
    %cst_7 = arith.constant 0.000000e+00 : f32
    %9 = vector.broadcast %cst_7 : f32 to vector<288x128xf32>
    %10 = arith.maximumf %8, %9 : vector<288x128xf32>
    %11 = arith.truncf %10 : vector<288x128xf32> to vector<288x128xbf16>
    %c0_8 = arith.constant 0 : index
    %c0_9 = arith.constant 0 : index
    %12 = vector.load %arg4[%c0_8, %c0_9] : memref<288x128xbf16, #tpu.memory_space<vmem>>, vector<288x128xbf16>
    tpu.vector_store %arg4[%c0_8, %c0_9], %11 {strides = array<i32>} : memref<288x128xbf16, #tpu.memory_space<vmem>>, vector<288x128xbf16>,
    return
  }
  func.func @transform_0(%arg0: i32) -> (i32, i32, i32) {
    %c0_i32 = arith.constant 0 : i32
    %c0_i32_0 = arith.constant 0 : i32
    %c0_i32_1 = arith.constant 0 : i32
    return %c0_i32, %arg0, %c0_i32_0 : i32, i32, i32
  }
  func.func @transform_1(%arg0: i32) -> (i32, i32) {
    %c0_i32 = arith.constant 0 : i32
    %c0_i32_0 = arith.constant 0 : i32
    %c0_i32_1 = arith.constant 0 : i32
    return %c0_i32, %c0_i32_0 : i32, i32
  }
  func.func @transform_2(%arg0: i32) -> (i32, i32) {
    %c0_i32 = arith.constant 0 : i32
    %c0_i32_0 = arith.constant 0 : i32
    %c0_i32_1 = arith.constant 0 : i32
    return %c0_i32, %c0_i32_0 : i32, i32
  }
  func.func @transform_3(%arg0: i32) -> (i32, i32) {
    %c0_i32 = arith.constant 0 : i32
    %c0_i32_0 = arith.constant 0 : i32
    return %arg0, %c0_i32 : i32, i32
  }
}

module attributes {stable_mosaic.version = 11 : i64} {
  func.func @conv2_mlp_kernel(%arg0: i32, %arg1: memref<4x16x16x250xbf16, #tpu.memory_space<vmem>>, %arg2: memref<250x128xbf16, #tpu.memory_space<vmem>>, %arg3: memref<1x128xf32, #tpu.memory_space<vmem>>, %arg4: memref<16x128x128xbf16, #tpu.memory_space<vmem>>, %arg5: memref<1x128xf32, #tpu.memory_space<vmem>>, %arg6: memref<128x128xbf16, #tpu.memory_space<vmem>>, %arg7: memref<1x128xf32, #tpu.memory_space<vmem>>, %arg8: memref<16x128xf32, #tpu.memory_space<vmem>>) attributes {dimension_semantics = [#tpu.dimension_semantics<parallel>], iteration_bounds = array<i64: 1>, scalar_prefetch = 0 : i64, scratch_operands = 0 : i64, tpu.core_type = #tpu.core_type<tc>, window_params = [{transform_indices = @transform_0, window_bounds = array<i64: 4, 16, 16, 250>}, {pipeline_mode = #tpu.pipeline_mode<synchronous>, transform_indices = @transform_1, window_bounds = array<i64: 250, 128>}, {pipeline_mode = #tpu.pipeline_mode<synchronous>, transform_indices = @transform_2, window_bounds = array<i64: 1, 128>}, {pipeline_mode = #tpu.pipeline_mode<synchronous>, transform_indices = @transform_3, window_bounds = array<i64: 16, 128, 128>}, {pipeline_mode = #tpu.pipeline_mode<synchronous>, transform_indices = @transform_4, window_bounds = array<i64: 1, 128>}, {pipeline_mode = #tpu.pipeline_mode<synchronous>, transform_indices = @transform_5, window_bounds = array<i64: 128, 128>}, {pipeline_mode = #tpu.pipeline_mode<synchronous>, transform_indices = @transform_6, window_bounds = array<i64: 1, 128>}, {transform_indices = @transform_7, window_bounds = array<i64: 16, 128>}]} {
    %c0 = arith.constant 0 : index
    %c0_0 = arith.constant 0 : index
    %c0_1 = arith.constant 0 : index
    %c0_2 = arith.constant 0 : index
    %0 = vector.load %arg1[%c0, %c0_0, %c0_1, %c0_2] : memref<4x16x16x250xbf16, #tpu.memory_space<vmem>>, vector<4x16x16x250xbf16>
    %1 = vector.shape_cast %0 : vector<4x16x16x250xbf16> to vector<1024x250xbf16>
    %c0_3 = arith.constant 0 : index
    %c0_4 = arith.constant 0 : index
    %2 = vector.load %arg2[%c0_3, %c0_4] : memref<250x128xbf16, #tpu.memory_space<vmem>>, vector<250x128xbf16>
    %cst = arith.constant dense<0.000000e+00> : vector<1024x128xf32>
    %3 = tpu.matmul %1, %2, %cst {dimension_numbers = #tpu.dot_dimension_numbers<[1], [0], [0], [1], [0, 0, 1, 1], [], []>} : vector<1024x250xbf16>, vector<250x128xbf16>, vector<1024x128xf32> -> vector<1024x128xf32>
    %4 = vector.shape_cast %3 : vector<1024x128xf32> to vector<4x16x16x128xf32>
    %cst_5 = arith.constant dense<0xFF800000> : vector<16x16x128xf32>
    %5 = vector.multi_reduction <maximumf>, %4, %cst_5 [0] : vector<4x16x16x128xf32> to vector<16x16x128xf32>
    %c0_6 = arith.constant 0 : index
    %c0_7 = arith.constant 0 : index
    %6 = vector.load %arg3[%c0_6, %c0_7] : memref<1x128xf32, #tpu.memory_space<vmem>>, vector<1x128xf32>
    %7 = vector.shape_cast %6 : vector<1x128xf32> to vector<1x1x128xf32>
    %8 = vector.broadcast %7 : vector<1x1x128xf32> to vector<16x16x128xf32>
    %9 = arith.addf %5, %8 : vector<16x16x128xf32>
    %cst_8 = arith.constant 0.000000e+00 : f32
    %10 = vector.broadcast %cst_8 : f32 to vector<16x16x128xf32>
    %11 = arith.maximumf %9, %10 : vector<16x16x128xf32>
    %12 = arith.truncf %11 : vector<16x16x128xf32> to vector<16x16x128xbf16>
    %c0_9 = arith.constant 0 : index
    %c0_10 = arith.constant 0 : index
    %c0_11 = arith.constant 0 : index
    %13 = vector.load %arg4[%c0_9, %c0_10, %c0_11] : memref<16x128x128xbf16, #tpu.memory_space<vmem>>, vector<16x128x128xbf16>
    %cst_12 = arith.constant dense<0.000000e+00> : vector<16x16x128xf32>
    %14 = tpu.matmul %12, %13, %cst_12 {dimension_numbers = #tpu.dot_dimension_numbers<[2], [1], [1], [2], [0, 0, 0, 1, 1, 2], [0], [0]>} : vector<16x16x128xbf16>, vector<16x128x128xbf16>, vector<16x16x128xf32> -> vector<16x16x128xf32>
    %cst_13 = arith.constant dense<0.000000e+00> : vector<16x128xf32>
    %15 = vector.multi_reduction <add>, %14, %cst_13 [0] : vector<16x16x128xf32> to vector<16x128xf32>
    %c0_14 = arith.constant 0 : index
    %c0_15 = arith.constant 0 : index
    %16 = vector.load %arg5[%c0_14, %c0_15] : memref<1x128xf32, #tpu.memory_space<vmem>>, vector<1x128xf32>
    %17 = vector.broadcast %16 : vector<1x128xf32> to vector<16x128xf32>
    %18 = arith.addf %15, %17 : vector<16x128xf32>
    %cst_16 = arith.constant 0.000000e+00 : f32
    %19 = vector.broadcast %cst_16 : f32 to vector<16x128xf32>
    %20 = arith.maximumf %18, %19 : vector<16x128xf32>
    %21 = arith.truncf %20 : vector<16x128xf32> to vector<16x128xbf16>
    %c0_17 = arith.constant 0 : index
    %c0_18 = arith.constant 0 : index
    %22 = vector.load %arg6[%c0_17, %c0_18] : memref<128x128xbf16, #tpu.memory_space<vmem>>, vector<128x128xbf16>
    %cst_19 = arith.constant dense<0.000000e+00> : vector<16x128xf32>
    %23 = tpu.matmul %21, %22, %cst_19 {dimension_numbers = #tpu.dot_dimension_numbers<[1], [0], [0], [1], [0, 0, 1, 1], [], []>} : vector<16x128xbf16>, vector<128x128xbf16>, vector<16x128xf32> -> vector<16x128xf32>
    %c0_20 = arith.constant 0 : index
    %c0_21 = arith.constant 0 : index
    %24 = vector.load %arg7[%c0_20, %c0_21] : memref<1x128xf32, #tpu.memory_space<vmem>>, vector<1x128xf32>
    %25 = vector.broadcast %24 : vector<1x128xf32> to vector<16x128xf32>
    %26 = arith.addf %23, %25 : vector<16x128xf32>
    %27 = tpu.iota {dimensions = array<i32: 1>} : vector<16x128xi32>
    %c10_i32 = arith.constant 10 : i32
    %28 = vector.broadcast %c10_i32 : i32 to vector<16x128xi32>
    %29 = arith.cmpi slt, %27, %28 : vector<16x128xi32>
    %cst_22 = arith.constant -1.000000e+30 : f32
    %30 = vector.broadcast %cst_22 : f32 to vector<16x128xf32>
    %31 = arith.select %29, %26, %30 : vector<16x128xi1>, vector<16x128xf32>
    %cst_23 = arith.constant dense<0xFF800000> : vector<16xf32>
    %32 = vector.multi_reduction <maximumf>, %31, %cst_23 [1] : vector<16x128xf32> to vector<16xf32>
    %33 = vector.shape_cast %32 : vector<16xf32> to vector<16x1xf32>
    %34 = vector.broadcast %33 : vector<16x1xf32> to vector<16x128xf32>
    %35 = arith.subf %31, %34 : vector<16x128xf32>
    %36 = math.exp %35 : vector<16x128xf32>
    %cst_24 = arith.constant dense<0.000000e+00> : vector<16xf32>
    %37 = vector.multi_reduction <add>, %36, %cst_24 [1] : vector<16x128xf32> to vector<16xf32>
    %38 = vector.shape_cast %37 : vector<16xf32> to vector<16x1xf32>
    %39 = math.log %38 : vector<16x1xf32>
    %40 = vector.broadcast %33 : vector<16x1xf32> to vector<16x128xf32>
    %41 = arith.subf %26, %40 : vector<16x128xf32>
    %42 = vector.broadcast %39 : vector<16x1xf32> to vector<16x128xf32>
    %43 = arith.subf %41, %42 : vector<16x128xf32>
    %cst_25 = arith.constant 0.000000e+00 : f32
    %44 = vector.broadcast %cst_25 : f32 to vector<16x128xf32>
    %45 = arith.select %29, %43, %44 : vector<16x128xi1>, vector<16x128xf32>
    %c0_26 = arith.constant 0 : index
    %c0_27 = arith.constant 0 : index
    %46 = vector.load %arg8[%c0_26, %c0_27] : memref<16x128xf32, #tpu.memory_space<vmem>>, vector<16x128xf32>
    tpu.vector_store %arg8[%c0_26, %c0_27], %45 {strides = array<i32>} : memref<16x128xf32, #tpu.memory_space<vmem>>, vector<16x128xf32>,
    return
  }
  func.func @transform_0(%arg0: i32) -> (i32, i32, i32, i32) {
    %c0_i32 = arith.constant 0 : i32
    %c0_i32_0 = arith.constant 0 : i32
    %c0_i32_1 = arith.constant 0 : i32
    %c0_i32_2 = arith.constant 0 : i32
    return %c0_i32, %c0_i32_0, %arg0, %c0_i32_1 : i32, i32, i32, i32
  }
  func.func @transform_1(%arg0: i32) -> (i32, i32) {
    %c0_i32 = arith.constant 0 : i32
    %c0_i32_0 = arith.constant 0 : i32
    %c0_i32_1 = arith.constant 0 : i32
    return %c0_i32, %c0_i32_0 : i32, i32
  }
  func.func @transform_2(%arg0: i32) -> (i32, i32) {
    %c0_i32 = arith.constant 0 : i32
    %c0_i32_0 = arith.constant 0 : i32
    %c0_i32_1 = arith.constant 0 : i32
    return %c0_i32, %c0_i32_0 : i32, i32
  }
  func.func @transform_3(%arg0: i32) -> (i32, i32, i32) {
    %c0_i32 = arith.constant 0 : i32
    %c0_i32_0 = arith.constant 0 : i32
    %c0_i32_1 = arith.constant 0 : i32
    %c0_i32_2 = arith.constant 0 : i32
    return %c0_i32, %c0_i32_0, %c0_i32_1 : i32, i32, i32
  }
  func.func @transform_4(%arg0: i32) -> (i32, i32) {
    %c0_i32 = arith.constant 0 : i32
    %c0_i32_0 = arith.constant 0 : i32
    %c0_i32_1 = arith.constant 0 : i32
    return %c0_i32, %c0_i32_0 : i32, i32
  }
  func.func @transform_5(%arg0: i32) -> (i32, i32) {
    %c0_i32 = arith.constant 0 : i32
    %c0_i32_0 = arith.constant 0 : i32
    %c0_i32_1 = arith.constant 0 : i32
    return %c0_i32, %c0_i32_0 : i32, i32
  }
  func.func @transform_6(%arg0: i32) -> (i32, i32) {
    %c0_i32 = arith.constant 0 : i32
    %c0_i32_0 = arith.constant 0 : i32
    %c0_i32_1 = arith.constant 0 : i32
    return %c0_i32, %c0_i32_0 : i32, i32
  }
  func.func @transform_7(%arg0: i32) -> (i32, i32) {
    %c0_i32 = arith.constant 0 : i32
    %c0_i32_0 = arith.constant 0 : i32
    return %arg0, %c0_i32 : i32, i32
  }
}

</mosaic_0001>

<bundles_post_ra>
// kernel: forward.2
= control target key start
LH: loop header
LB: loop body
LE: loop exit
PB: predicated region body
PF: predicated region fallthrough
CT: control target
= control target key end

     0   :  { %vm751_vm0 = vcmask 1043456   ;;  %vm752_vm1 = vcmask 1044480   ;;  %vm534_vm2 = vcmask 203776   ;;  %v2365_v1 = vmov 65535   ;;  %s2991_s1 = inlined_call_operand.vmem [shape: bf16[25,128], index: 1, kind: input, shape index: {}]   ;;  %s2992_s0 = inlined_call_operand.vmem [shape: bf16[4,288,25], index: 0, kind: input, shape index: {}]   ;;  %s2993_s2 = inlined_call_operand.vmem [shape: f32[1,128], index: 2, kind: input, shape index: {}]   ;;  %s2994_s3 = inlined_call_operand.vmem [shape: bf16[288,128], index: 3, kind: output, shape index: {}]  }
   0x1   :  { %v2291_v0 = vld [vmem:[%s2991_s1] sm:$0xff]   ;;  %v753_v2 = vsel %vm751_vm0, 4294967295, %v2365_v1  ;;  %v2292_v3 = vld [vmem:[%s2991_s1 + $0x8] sm:$0x1f]   ;;  %v2297_v10 = vld [vmem:[%s2992_s0 + $0x10] sm:$0xff]  }
   0x2   :  { %2138 = vmatprep.subr.bf16.mxu0 %v2291_v0  ;;  %2286 = vmatprep.subr.bf16.mxu1 %v2291_v0  ;;  %v754_v4 = vsel %vm752_vm1, %v753_v2, 0  ;;  %v2293_v5 = vld [vmem:[%s2992_s0] sm:$0xff]   ;;  %v2294_v8 = vld [vmem:[%s2992_s0 + $0x8] sm:$0xff]   ;;  %v2299_v11 = vld [vmem:[%s2992_s0 + $0x130] sm:$0xff]  }
   0x3   :  { %2139 = vmatpush3.bf16.msra.mxu0 %v2291_v0  ;;  %2288 = vmatpush3.bf16.msra.mxu1 %v2291_v0  ;;  %v756_v6 = vand.u32 %v2292_v3, %v754_v4  ;;  %v2295_v7 = vld [vmem:[%s2992_s0 + $0x120] sm:$0xff]   ;;  %v2296_v9 = vld [vmem:[%s2992_s0 + $0x128] sm:$0xff]   ;;  %v2298_v12 = vld [vmem:[%s2992_s0 + $0x18] sm:$0xff]  }
   0x4   :  { %2142 = vmatprep.mubr.msk.bf16.mxu0 %vm534_vm2, %v2293_v5  ;;  %2214 = vmatprep.mubr.msk.bf16.mxu1 %vm534_vm2, %v2295_v7  ;;  %v2300_v13 = vld [vmem:[%s2992_s0 + $0x138] sm:$0xff]   ;;  %v2301_v14 = vld [vmem:[%s2992_s0 + $0x20] sm:$0xff]   ;;  %v2302_v16 = vld [vmem:[%s2992_s0 + $0x28] sm:$0xff]  }
   0x5   :  { %2140 = vmatprep.subr.bf16.mxu0 %v756_v6  ;;  %2287 = vmatprep.subr.bf16.mxu1 %v756_v6  ;;  %v2303_v15 = vld [vmem:[%s2992_s0 + $0x140] sm:$0xff]   ;;  %v2304_v17 = vld [vmem:[%s2992_s0 + $0x148] sm:$0xff]   ;;  %v2305_v18 = vld [vmem:[%s2992_s0 + $0x30] sm:$0xff]  }
   0x6   :  { %v2307_v19 = vld [vmem:[%s2992_s0 + $0x150] sm:$0xff]   ;;  %v2306_v20 = vld [vmem:[%s2992_s0 + $0x38] sm:$0xff]   ;;  %v2309_v22 = vld [vmem:[%s2992_s0 + $0x40] sm:$0xff]  }
   0x7   :  { %2141 = vmatpush3.bf16.msra.mxu0 %v756_v6  ;;  %2289 = vmatpush3.bf16.msra.mxu1 %v756_v6  ;;  %v2308_v21 = vld [vmem:[%s2992_s0 + $0x158] sm:$0xff]   ;;  %v2311_v23 = vld [vmem:[%s2992_s0 + $0x160] sm:$0xff]   ;;  %v2310_v24 = vld [vmem:[%s2992_s0 + $0x48] sm:$0xff]  }
   0x8   :  { %v2312_v25 = vld [vmem:[%s2992_s0 + $0x168] sm:$0xff]   ;;  %v2313_v26 = vld [vmem:[%s2992_s0 + $0x50] sm:$0xff]   ;;  %v2314_v28 = vld [vmem:[%s2992_s0 + $0x58] sm:$0xff]  }
   0x9   :  { %v2315_v27 = vld [vmem:[%s2992_s0 + $0x170] sm:$0xff]   ;;  %v2316_v29 = vld [vmem:[%s2992_s0 + $0x178] sm:$0xff]   ;;  %v2317_v30 = vld [vmem:[%s2992_s0 + $0x60] sm:$0xff]  }
   0xa   :  { %2143 = vmatmul.mubr.msk.bf16.vlgmr.msra.gmra.mrb[0].mxu0 %vm534_vm2, %v2294_v8  ;;  %2215 = vmatmul.mubr.msk.bf16.vlgmr.msra.gmra.mrb[0].mxu1 %vm534_vm2, %v2296_v9  ;;  %v2319_v31 = vld [vmem:[%s2992_s0 + $0x180] sm:$0xff]   ;;  %v2318_v32 = vld [vmem:[%s2992_s0 + $0x68] sm:$0xff]   ;;  %v2321_v34 = vld [vmem:[%s2992_s0 + $0x70] sm:$0xff]  }
   0xb   :  { %2146 = vmatprep.mubr.msk.bf16.mxu0 %vm534_vm2, %v2297_v10  ;;  %2218 = vmatprep.mubr.msk.bf16.mxu1 %vm534_vm2, %v2299_v11  ;;  %v2320_v33 = vld [vmem:[%s2992_s0 + $0x188] sm:$0xff]   ;;  %v2323_v35 = vld [vmem:[%s2992_s0 + $0x190] sm:$0xff]   ;;  %v2322_v36 = vld [vmem:[%s2992_s0 + $0x78] sm:$0xff]  }
   0xc   :  { %v2324_v37 = vld [vmem:[%s2992_s0 + $0x198] sm:$0xff]   ;;  %v2325_v38 = vld [vmem:[%s2992_s0 + $0x80] sm:$0xff]   ;;  %v2326_v40 = vld [vmem:[%s2992_s0 + $0x88] sm:$0xff]  }
   0xd   :  { %v2327_v39 = vld [vmem:[%s2992_s0 + $0x1a0] sm:$0xff]   ;;  %v2328_v41 = vld [vmem:[%s2992_s0 + $0x1a8] sm:$0xff]   ;;  %v2329_v42 = vld [vmem:[%s2992_s0 + $0x90] sm:$0xff]  }
   0xe   :  { %v2331_v43 = vld [vmem:[%s2992_s0 + $0x1b0] sm:$0xff]   ;;  %v2330_v44 = vld [vmem:[%s2992_s0 + $0x98] sm:$0xff]   ;;  %v2333_v46 = vld [vmem:[%s2992_s0 + $0xa0] sm:$0xff]  }
   0xf   :  { %v2332_v45 = vld [vmem:[%s2992_s0 + $0x1b8] sm:$0xff]   ;;  %v2335_v47 = vld [vmem:[%s2992_s0 + $0x1c0] sm:$0xff]   ;;  %v2334_v48 = vld [vmem:[%s2992_s0 + $0xa8] sm:$0xff]  }
  0x10   :  { %v2336_v49 = vld [vmem:[%s2992_s0 + $0x1c8] sm:$0xff]   ;;  %v2337_v50 = vld [vmem:[%s2992_s0 + $0xb0] sm:$0xff]   ;;  %v2338_v52 = vld [vmem:[%s2992_s0 + $0xb8] sm:$0xff]  }
  0x11   :  { %v2339_v51 = vld [vmem:[%s2992_s0 + $0x1d0] sm:$0xff]   ;;  %v2340_v53 = vld [vmem:[%s2992_s0 + $0x1d8] sm:$0xff]   ;;  %v2341_v54 = vld [vmem:[%s2992_s0 + $0xc0] sm:$0xff]  }
  0x12   :  { %2147 = vmatmul.mubr.msk.bf16.gmra.mrb[4].mxu0 %vm534_vm2, %v2298_v12  ;;  %2219 = vmatmul.mubr.msk.bf16.gmra.mrb[4].mxu1 %vm534_vm2, %v2300_v13  ;;  %v2343_v55 = vld [vmem:[%s2992_s0 + $0x1e0] sm:$0xff]   ;;  %v2342_v56 = vld [vmem:[%s2992_s0 + $0xc8] sm:$0xff]   ;;  %v2345_v58 = vld [vmem:[%s2992_s0 + $0xd0] sm:$0xff]  }
  0x13   :  { %2150 = vmatprep.mubr.msk.bf16.mxu0 %vm534_vm2, %v2301_v14  ;;  %2222 = vmatprep.mubr.msk.bf16.mxu1 %vm534_vm2, %v2303_v15  ;;  %v2344_v57 = vld [vmem:[%s2992_s0 + $0x1e8] sm:$0xff]   ;;  %v2347_v59 = vld [vmem:[%s2992_s0 + $0x1f0] sm:$0xff]   ;;  %v2346_v60 = vld [vmem:[%s2992_s0 + $0xd8] sm:$0xff]  }
  0x14   :  { %v2348_v61 = vld [vmem:[%s2992_s0 + $0x1f8] sm:$0xff]   ;;  %v2349_v62 = vld [vmem:[%s2992_s0 + $0xe0] sm:$0xff]   ;;  %v2350_v0 = vld [vmem:[%s2992_s0 + $0xe8] sm:$0xff]  }
  0x15   :  { %v2351_v63 = vld [vmem:[%s2992_s0 + $0x200] sm:$0xff]   ;;  %v2352_v1 = vld [vmem:[%s2992_s0 + $0x208] sm:$0xff]   ;;  %v2353_v2 = vld [vmem:[%s2992_s0 + $0xf0] sm:$0xff]  }
  0x16   :  { %v2355_v3 = vld [vmem:[%s2992_s0 + $0x210] sm:$0xff]   ;;  %v2354_v4 = vld [vmem:[%s2992_s0 + $0xf8] sm:$0xff]   ;;  %v2357_v6 = vld [vmem:[%s2992_s0 + $0x100] sm:$0xff]  }
  0x17   :  { %v2356_v5 = vld [vmem:[%s2992_s0 + $0x218] sm:$0xff]   ;;  %v2359_v7 = vld [vmem:[%s2992_s0 + $0x220] sm:$0xff]   ;;  %v2358_v8 = vld [vmem:[%s2992_s0 + $0x108] sm:$0xff]  }
  0x18   :  { %v2360_v9 = vld [vmem:[%s2992_s0 + $0x228] sm:$0xff]   ;;  %v2361_v10 = vld [vmem:[%s2992_s0 + $0x110] sm:$0xff]   ;;  %v2362_v12 = vld [vmem:[%s2992_s0 + $0x118] sm:$0xff]  }
  0x19   :  { %v2363_v11 = vld [vmem:[%s2992_s0 + $0x230] sm:$0xff]   ;;  %v2364_v13 = vld [vmem:[%s2992_s0 + $0x238] sm:$0xff]  }
  0x1a   :  { %2151 = vmatmul.mubr.msk.bf16.gmra.mrb[8].mxu0 %vm534_vm2, %v2302_v16  ;;  %2223 = vmatmul.mubr.msk.bf16.gmra.mrb[8].mxu1 %vm534_vm2, %v2304_v17 }
  0x1b   :  { %2154 = vmatprep.mubr.msk.bf16.mxu0 %vm534_vm2, %v2305_v18  ;;  %2226 = vmatprep.mubr.msk.bf16.mxu1 %vm534_vm2, %v2307_v19 }
  0x22   :  { %2155 = vmatmul.mubr.msk.bf16.gmra.mrb[12].mxu0 %vm534_vm2, %v2306_v20  ;;  %2227 = vmatmul.mubr.msk.bf16.gmra.mrb[12].mxu1 %vm534_vm2, %v2308_v21 }
  0x23   :  { %2158 = vmatprep.mubr.msk.bf16.mxu0 %vm534_vm2, %v2309_v22  ;;  %2230 = vmatprep.mubr.msk.bf16.mxu1 %vm534_vm2, %v2311_v23 }
  0x2a   :  { %2159 = vmatmul.mubr.msk.bf16.gmra.mrb[16].mxu0 %vm534_vm2, %v2310_v24  ;;  %2231 = vmatmul.mubr.msk.bf16.gmra.mrb[16].mxu1 %vm534_vm2, %v2312_v25 }
  0x2b   :  { %2162 = vmatprep.mubr.msk.bf16.mxu0 %vm534_vm2, %v2313_v26  ;;  %2234 = vmatprep.mubr.msk.bf16.mxu1 %vm534_vm2, %v2315_v27 }
  0x32   :  { %2163 = vmatmul.mubr.msk.bf16.gmra.mrb[20].mxu0 %vm534_vm2, %v2314_v28  ;;  %2235 = vmatmul.mubr.msk.bf16.gmra.mrb[20].mxu1 %vm534_vm2, %v2316_v29 }
  0x33   :  { %2166 = vmatprep.mubr.msk.bf16.mxu0 %vm534_vm2, %v2317_v30  ;;  %2238 = vmatprep.mubr.msk.bf16.mxu1 %vm534_vm2, %v2319_v31 }
  0x3a   :  { %2167 = vmatmul.mubr.msk.bf16.gmra.mrb[24].mxu0 %vm534_vm2, %v2318_v32  ;;  %2239 = vmatmul.mubr.msk.bf16.gmra.mrb[24].mxu1 %vm534_vm2, %v2320_v33 }
  0x3b   :  { %2170 = vmatprep.mubr.msk.bf16.mxu0 %vm534_vm2, %v2321_v34  ;;  %2242 = vmatprep.mubr.msk.bf16.mxu1 %vm534_vm2, %v2323_v35 }
  0x42   :  { %2171 = vmatmul.mubr.msk.bf16.gmra.mrb[28].mxu0 %vm534_vm2, %v2322_v36  ;;  %2243 = vmatmul.mubr.msk.bf16.gmra.mrb[28].mxu1 %vm534_vm2, %v2324_v37 }
  0x43   :  { %2174 = vmatprep.mubr.msk.bf16.mxu0 %vm534_vm2, %v2325_v38  ;;  %2246 = vmatprep.mubr.msk.bf16.mxu1 %vm534_vm2, %v2327_v39 }
  0x4a   :  { %2175 = vmatmul.mubr.msk.bf16.gmra.mrb[32].mxu0 %vm534_vm2, %v2326_v40  ;;  %2247 = vmatmul.mubr.msk.bf16.gmra.mrb[32].mxu1 %vm534_vm2, %v2328_v41 }
  0x4b   :  { %2178 = vmatprep.mubr.msk.bf16.mxu0 %vm534_vm2, %v2329_v42  ;;  %2250 = vmatprep.mubr.msk.bf16.mxu1 %vm534_vm2, %v2331_v43 }
  0x52   :  { %2179 = vmatmul.mubr.msk.bf16.gmra.mrb[36].mxu0 %vm534_vm2, %v2330_v44  ;;  %2251 = vmatmul.mubr.msk.bf16.gmra.mrb[36].mxu1 %vm534_vm2, %v2332_v45 }
  0x53   :  { %2182 = vmatprep.mubr.msk.bf16.mxu0 %vm534_vm2, %v2333_v46  ;;  %2254 = vmatprep.mubr.msk.bf16.mxu1 %vm534_vm2, %v2335_v47 }
  0x5a   :  { %2183 = vmatmul.mubr.msk.bf16.gmra.mrb[40].mxu0 %vm534_vm2, %v2334_v48  ;;  %2255 = vmatmul.mubr.msk.bf16.gmra.mrb[40].mxu1 %vm534_vm2, %v2336_v49 }
  0x5b   :  { %2186 = vmatprep.mubr.msk.bf16.mxu0 %vm534_vm2, %v2337_v50  ;;  %2258 = vmatprep.mubr.msk.bf16.mxu1 %vm534_vm2, %v2339_v51 }
  0x62   :  { %2187 = vmatmul.mubr.msk.bf16.gmra.mrb[44].mxu0 %vm534_vm2, %v2338_v52  ;;  %2259 = vmatmul.mubr.msk.bf16.gmra.mrb[44].mxu1 %vm534_vm2, %v2340_v53 }
  0x63   :  { %2190 = vmatprep.mubr.msk.bf16.mxu0 %vm534_vm2, %v2341_v54  ;;  %2262 = vmatprep.mubr.msk.bf16.mxu1 %vm534_vm2, %v2343_v55 }
  0x6a   :  { %2191 = vmatmul.mubr.msk.bf16.gmra.mrb[48].mxu0 %vm534_vm2, %v2342_v56  ;;  %2263 = vmatmul.mubr.msk.bf16.gmra.mrb[48].mxu1 %vm534_vm2, %v2344_v57 }
  0x6b   :  { %2194 = vmatprep.mubr.msk.bf16.mxu0 %vm534_vm2, %v2345_v58  ;;  %2266 = vmatprep.mubr.msk.bf16.mxu1 %vm534_vm2, %v2347_v59 }
  0x72   :  { %2195 = vmatmul.mubr.msk.bf16.gmra.mrb[52].mxu0 %vm534_vm2, %v2346_v60  ;;  %2267 = vmatmul.mubr.msk.bf16.gmra.mrb[52].mxu1 %vm534_vm2, %v2348_v61 }
  0x73   :  { %2198 = vmatprep.mubr.msk.bf16.mxu0 %vm534_vm2, %v2349_v62  ;;  %2270 = vmatprep.mubr.msk.bf16.mxu1 %vm534_vm2, %v2351_v63 }
  0x7a   :  { %2199 = vmatmul.mubr.msk.bf16.gmra.mrb[56].mxu0 %vm534_vm2, %v2350_v0  ;;  %2271 = vmatmul.mubr.msk.bf16.gmra.mrb[56].mxu1 %vm534_vm2, %v2352_v1 }
  0x7b   :  { %2202 = vmatprep.mubr.msk.bf16.mxu0 %vm534_vm2, %v2353_v2  ;;  %2274 = vmatprep.mubr.msk.bf16.mxu1 %vm534_vm2, %v2355_v3 }
  0x82   :  { %2203 = vmatmul.mubr.msk.bf16.gmra.mrb[60].mxu0 %vm534_vm2, %v2354_v4  ;;  %2275 = vmatmul.mubr.msk.bf16.gmra.mrb[60].mxu1 %vm534_vm2, %v2356_v5 }
  0x83   :  { %2206 = vmatprep.mubr.msk.bf16.mxu0 %vm534_vm2, %v2357_v6  ;;  %2278 = vmatprep.mubr.msk.bf16.mxu1 %vm534_vm2, %v2359_v7 }
  0x8a   :  { %2207 = vmatmul.mubr.msk.bf16.gmra.mrb[64].mxu0 %vm534_vm2, %v2358_v8  ;;  %2279 = vmatmul.mubr.msk.bf16.gmra.mrb[64].mxu1 %vm534_vm2, %v2360_v9 }
  0x8b   :  { %2210 = vmatprep.mubr.msk.bf16.mxu0 %vm534_vm2, %v2361_v10  ;;  %2282 = vmatprep.mubr.msk.bf16.mxu1 %vm534_vm2, %v2363_v11 }
  0x92   :  { %2211 = vmatmul.mubr.msk.bf16.gmra.mrb[68].mxu0 %vm534_vm2, %v2362_v12  ;;  %2283 = vmatmul.mubr.msk.bf16.gmra.mrb[68].mxu1 %vm534_vm2, %v2364_v13 }
  0xdd   :  { %v2680_v14 = vpop.f32.mrb[0].mxu0  ;;  %v2682_v15 = vpop.f32.mrb[0].mxu1 }
  0xde   :  { %v2684_v16 = vpop.f32.mrb[1].mxu0  ;;  %v2686_v17 = vpop.f32.mrb[1].mxu1 }
  0xdf   :  { %v2688_v18 = vpop.f32.mrb[2].mxu0  ;;  %v2690_v19 = vpop.f32.mrb[2].mxu1 }
  0xe0   :  { %v2692_v20 = vpop.f32.mrb[3].mxu0  ;;  %v2694_v21 = vpop.f32.mrb[3].mxu1 }
  0xe5   :  { %v2696_v22 = vpop.f32.mrb[4].mxu0  ;;  %v2698_v23 = vpop.f32.mrb[4].mxu1 }
  0xe6   :  { %v2700_v24 = vpop.f32.mrb[5].mxu0  ;;  %v2702_v25 = vpop.f32.mrb[5].mxu1 }
  0xe7   :  { %v2704_v26 = vpop.f32.mrb[6].mxu0  ;;  %v2706_v27 = vpop.f32.mrb[6].mxu1 }
  0xe8   :  { %v2708_v28 = vpop.f32.mrb[7].mxu0  ;;  %v2710_v29 = vpop.f32.mrb[7].mxu1 }
  0xed   :  { %v2712_v30 = vpop.f32.mrb[8].mxu0  ;;  %v2714_v31 = vpop.f32.mrb[8].mxu1 }
  0xee   :  { %v2716_v32 = vpop.f32.mrb[9].mxu0  ;;  %v2718_v33 = vpop.f32.mrb[9].mxu1 }
  0xef   :  { %v2720_v34 = vpop.f32.mrb[10].mxu0  ;;  %v2722_v35 = vpop.f32.mrb[10].mxu1 }
  0xf0   :  { %v2724_v36 = vpop.f32.mrb[11].mxu0  ;;  %v2726_v37 = vpop.f32.mrb[11].mxu1 }
  0xf5   :  { %v2728_v38 = vpop.f32.mrb[12].mxu0  ;;  %v2730_v39 = vpop.f32.mrb[12].mxu1 }
  0xf6   :  { %v2732_v40 = vpop.f32.mrb[13].mxu0  ;;  %v2734_v41 = vpop.f32.mrb[13].mxu1 }
  0xf7   :  { %v2736_v42 = vpop.f32.mrb[14].mxu0  ;;  %v2738_v43 = vpop.f32.mrb[14].mxu1 }
  0xf8   :  { %v2740_v44 = vpop.f32.mrb[15].mxu0  ;;  %v2742_v45 = vpop.f32.mrb[15].mxu1 }
  0xfd   :  { %v2744_v46 = vpop.f32.mrb[16].mxu0  ;;  %v2746_v47 = vpop.f32.mrb[16].mxu1 }
  0xfe   :  { %v2748_v48 = vpop.f32.mrb[17].mxu0  ;;  %v2750_v49 = vpop.f32.mrb[17].mxu1 }
  0xff   :  { %v2752_v50 = vpop.f32.mrb[18].mxu0  ;;  %v2754_v51 = vpop.f32.mrb[18].mxu1 }
 0x100   :  { %v2756_v52 = vpop.f32.mrb[19].mxu0  ;;  %v2758_v53 = vpop.f32.mrb[19].mxu1 }
 0x105   :  { %v2760_v54 = vpop.f32.mrb[20].mxu0  ;;  %v2762_v55 = vpop.f32.mrb[20].mxu1 }
 0x106   :  { %v2764_v56 = vpop.f32.mrb[21].mxu0  ;;  %v2766_v57 = vpop.f32.mrb[21].mxu1 }
 0x107   :  { %v2768_v58 = vpop.f32.mrb[22].mxu0  ;;  %v2770_v59 = vpop.f32.mrb[22].mxu1 }
 0x108   :  { %2995 = vst [vmem:[#allocation2_spill] sm:$0xff] %v2770_v59  ;;  %v2772_v60 = vpop.f32.mrb[23].mxu0  ;;  %v2774_v61 = vpop.f32.mrb[23].mxu1 }
 0x109   :  { %2996 = vst [vmem:[#allocation3_spill] sm:$0xff] %v2774_v61 }
 0x10d   :  { %v2776_v62 = vpop.f32.mrb[24].mxu0  ;;  %v2778_v63 = vpop.f32.mrb[24].mxu1 }
 0x10e   :  { %2997 = vst [vmem:[#allocation4_spill] sm:$0xff] %v2776_v62  ;;  %2998 = vst [vmem:[#allocation5_spill] sm:$0xff] %v2778_v63  ;;  %v2780_v0 = vpop.f32.mrb[25].mxu0  ;;  %v2782_v1 = vpop.f32.mrb[25].mxu1 }
 0x10f   :  { %2999 = vst [vmem:[#allocation6_spill] sm:$0xff] %v2780_v0  ;;  %3000 = vst [vmem:[#allocation7_spill] sm:$0xff] %v2782_v1  ;;  %v2784_v2 = vpop.f32.mrb[26].mxu0  ;;  %v2786_v3 = vpop.f32.mrb[26].mxu1 }
 0x110   :  { %3001 = vst [vmem:[#allocation8_spill] sm:$0xff] %v2784_v2  ;;  %3002 = vst [vmem:[#allocation9_spill] sm:$0xff] %v2786_v3  ;;  %v2788_v4 = vpop.f32.mrb[27].mxu0  ;;  %v2790_v5 = vpop.f32.mrb[27].mxu1 }
 0x111   :  { %3003 = vst [vmem:[#allocation10_spill] sm:$0xff] %v2788_v4  ;;  %3004 = vst [vmem:[#allocation11_spill] sm:$0xff] %v2790_v5 }
 0x115   :  { %v2792_v6 = vpop.f32.mrb[28].mxu0  ;;  %v2794_v7 = vpop.f32.mrb[28].mxu1 }
 0x116   :  { %3005 = vst [vmem:[#allocation12_spill] sm:$0xff] %v2792_v6  ;;  %3006 = vst [vmem:[#allocation13_spill] sm:$0xff] %v2794_v7  ;;  %v2796_v8 = vpop.f32.mrb[29].mxu0  ;;  %v2798_v9 = vpop.f32.mrb[29].mxu1 }
 0x117   :  { %3007 = vst [vmem:[#allocation14_spill] sm:$0xff] %v2796_v8  ;;  %3008 = vst [vmem:[#allocation15_spill] sm:$0xff] %v2798_v9  ;;  %v2800_v10 = vpop.f32.mrb[30].mxu0  ;;  %v2802_v11 = vpop.f32.mrb[30].mxu1 }
 0x118   :  { %3009 = vst [vmem:[#allocation16_spill] sm:$0xff] %v2800_v10  ;;  %3010 = vst [vmem:[#allocation17_spill] sm:$0xff] %v2802_v11  ;;  %v2804_v12 = vpop.f32.mrb[31].mxu0  ;;  %v2806_v13 = vpop.f32.mrb[31].mxu1 }
 0x119   :  { %3011 = vst [vmem:[#allocation18_spill] sm:$0xff] %v2804_v12  ;;  %3012 = vst [vmem:[#allocation19_spill] sm:$0xff] %v2806_v13 }
 0x11d   :  { %v2808_v3 = vpop.f32.mrb[32].mxu0  ;;  %v2810_v4 = vpop.f32.mrb[32].mxu1 }
 0x11e   :  { %3013 = vst [vmem:[#allocation20_spill] sm:$0xff] %v2808_v3  ;;  %3014 = vst [vmem:[#allocation21_spill] sm:$0xff] %v2810_v4  ;;  %v2812_v5 = vpop.f32.mrb[33].mxu0  ;;  %v2814_v6 = vpop.f32.mrb[33].mxu1 }
 0x11f   :  { %3015 = vst [vmem:[#allocation22_spill] sm:$0xff] %v2812_v5  ;;  %3016 = vst [vmem:[#allocation23_spill] sm:$0xff] %v2814_v6  ;;  %v2816_v7 = vpop.f32.mrb[34].mxu0  ;;  %v2818_v8 = vpop.f32.mrb[34].mxu1 }
 0x120   :  { %3017 = vst [vmem:[#allocation24_spill] sm:$0xff] %v2816_v7  ;;  %3018 = vst [vmem:[#allocation25_spill] sm:$0xff] %v2818_v8  ;;  %v2820_v9 = vpop.f32.mrb[35].mxu0  ;;  %v2822_v10 = vpop.f32.mrb[35].mxu1 }
 0x121   :  { %3019 = vst [vmem:[#allocation26_spill] sm:$0xff] %v2820_v9  ;;  %3020 = vst [vmem:[#allocation27_spill] sm:$0xff] %v2822_v10  ;;  %v2831_v10 = vld [vmem:[%s2993_s2] ss:$0 sm:$0xff] }
 0x125   :  { %v2180_v11 = vpop.f32.mrb[36].mxu0  ;;  %v2252_v12 = vpop.f32.mrb[36].mxu1 }
 0x126   :  { %v1373_v13 = vmax.f32 %v2680_v14, %v2180_v11  ;;  %v936_v1 = vpop.f32.mrb[37].mxu0  ;;  %v1224_v3 = vpop.f32.mrb[37].mxu1 }
 0x127   :  { %v1367_v4 = vmax.f32 %v2684_v16, %v936_v1  ;;  %v2181_v2 = vpop.f32.mrb[38].mxu0  ;;  %v2253_v5 = vpop.f32.mrb[38].mxu1 }
 0x128   :  { %v1374_v6 = vmax.f32 %v1373_v13, %v2682_v15  ;;  %v1376_v7 = vmax.f32 %v2688_v18, %v2181_v2  ;;  %v939_v63 = vpop.f32.mrb[39].mxu0  ;;  %v1227_v8 = vpop.f32.mrb[39].mxu1 }
 0x129   :  { %v1368_v9 = vmax.f32 %v1367_v4, %v2686_v17  ;;  %v1370_v14 = vmax.f32 %v2692_v20, %v939_v63 }
 0x12a   :  { %v1375_v11 = vmax.f32 %v1374_v6, %v2252_v12  ;;  %v1377_v16 = vmax.f32 %v1376_v7, %v2690_v19 }
 0x12b   :  { %v1369_v1 = vmax.f32 %v1368_v9, %v1224_v3  ;;  %v1371_v0 = vmax.f32 %v1370_v14, %v2694_v21 }
 0x12c   :  { %v1484_v15 = vadd.f32 %v2831_v10, %v1375_v11  ;;  %v1378_v18 = vmax.f32 %v1377_v16, %v2253_v5 }
 0x12d   :  { %v1482_v2 = vadd.f32 %v2831_v10, %v1369_v1  ;;  %v1372_v13 = vmax.f32 %v1371_v0, %v1227_v8  ;;  %v2184_v62 = vpop.f32.mrb[40].mxu0  ;;  %v2256_v61 = vpop.f32.mrb[40].mxu1 }
 0x12e   :  { %v1485_v59 = vadd.f32 %v2831_v10, %v1378_v18  ;;  %v1385_v17 = vmax.f32 %v2696_v22, %v2184_v62  ;;  %v952_v4 = vpop.f32.mrb[41].mxu0  ;;  %v1240_v20 = vpop.f32.mrb[41].mxu1  ;;  %v1520_v6 = vmax.f32 %v1484_v15, 0.0 }
 0x12f   :  { %v1483_v63 = vadd.f32 %v2831_v10, %v1372_v13  ;;  %v1379_v19 = vmax.f32 %v2700_v24, %v952_v4  ;;  %v2185_v3 = vpop.f32.mrb[42].mxu0  ;;  %v2257_v21 = vpop.f32.mrb[42].mxu1  ;;  %v1518_v12 = vmax.f32 %v1482_v2, 0.0 }
 0x130   :  { %v1521_v7 = vmax.f32 %v1485_v59, 0.0  ;;  %v1386_v5 = vmax.f32 %v1385_v17, %v2698_v23  ;;  %v1388_v0 = vmax.f32 %v2704_v26, %v2185_v3  ;;  %v955_v8 = vpop.f32.mrb[43].mxu0  ;;  %v1243_v9 = vpop.f32.mrb[43].mxu1 }
 0x131   :  { %v1519_v14 = vmax.f32 %v1483_v63, 0.0  ;;  %v1380_v22 = vmax.f32 %v1379_v19, %v2702_v25  ;;  %v1382_v62 = vmax.f32 %v2708_v28, %v955_v8 }
 0x132   :  { %v1965_v11 = vpack.c.bf16 %v1521_v7, %v1520_v6  ;;  %v1387_v16 = vmax.f32 %v1386_v5, %v2256_v61  ;;  %v1389_v24 = vmax.f32 %v1388_v0, %v2706_v27 }
 0x133   :  { %v1960_v1 = vpack.c.bf16 %v1519_v14, %v1518_v12  ;;  %v1381_v18 = vmax.f32 %v1380_v22, %v1240_v20  ;;  %v1383_v59 = vmax.f32 %v1382_v62, %v2710_v29 }
 0x134   :  { %2047 = vst [vmem:[%s2994_s3 + $0x8] sm:$0xff] %v1965_v11   ;;  %v1488_v23 = vadd.f32 %v2831_v10, %v1387_v16  ;;  %v1390_v26 = vmax.f32 %v1389_v24, %v2257_v21 }
 0x135   :  { %1961 = vst [vmem:[%s2994_s3] sm:$0xff] %v1960_v1   ;;  %v1486_v25 = vadd.f32 %v2831_v10, %v1381_v18  ;;  %v1384_v28 = vmax.f32 %v1383_v59, %v1243_v9  ;;  %v2188_v61 = vpop.f32.mrb[44].mxu0  ;;  %v2260_v27 = vpop.f32.mrb[44].mxu1 }
 0x136   :  { %v1489_v15 = vadd.f32 %v2831_v10, %v1390_v26  ;;  %v1397_v29 = vmax.f32 %v2712_v30, %v2188_v61  ;;  %v968_v2 = vpop.f32.mrb[45].mxu0  ;;  %v1256_v13 = vpop.f32.mrb[45].mxu1  ;;  %v1524_v19 = vmax.f32 %v1488_v23, 0.0 }
 0x137   :  { %v1487_v17 = vadd.f32 %v2831_v10, %v1384_v28  ;;  %v1391_v4 = vmax.f32 %v2716_v32, %v968_v2  ;;  %v2189_v20 = vpop.f32.mrb[46].mxu0  ;;  %v2261_v63 = vpop.f32.mrb[46].mxu1  ;;  %v1522_v0 = vmax.f32 %v1486_v25, 0.0 }
 0x138   :  { %v1525_v3 = vmax.f32 %v1489_v15, 0.0  ;;  %v1398_v21 = vmax.f32 %v1397_v29, %v2714_v31  ;;  %v1400_v6 = vmax.f32 %v2720_v34, %v2189_v20  ;;  %v971_v7 = vpop.f32.mrb[47].mxu0  ;;  %v1259_v5 = vpop.f32.mrb[47].mxu1 }
 0x139   :  { %v1523_v8 = vmax.f32 %v1487_v17, 0.0  ;;  %v1392_v30 = vmax.f32 %v1391_v4, %v2718_v33  ;;  %v1394_v9 = vmax.f32 %v2724_v36, %v971_v7 }
 0x13a   :  { %v1975_v12 = vpack.c.bf16 %v1525_v3, %v1524_v19  ;;  %v1399_v14 = vmax.f32 %v1398_v21, %v2260_v27  ;;  %v1401_v32 = vmax.f32 %v1400_v6, %v2722_v35 }
 0x13b   :  { %v1970_v22 = vpack.c.bf16 %v1523_v8, %v1522_v0  ;;  %v1393_v62 = vmax.f32 %v1392_v30, %v1256_v13  ;;  %v1395_v11 = vmax.f32 %v1394_v9, %v2726_v37 }
 0x13c   :  { %2049 = vst [vmem:[%s2994_s3 + $0x18] sm:$0xff] %v1975_v12   ;;  %v1492_v31 = vadd.f32 %v2831_v10, %v1399_v14  ;;  %v1402_v34 = vmax.f32 %v1401_v32, %v2261_v63 }
 0x13d   :  { %2048 = vst [vmem:[%s2994_s3 + $0x10] sm:$0xff] %v1970_v22   ;;  %v1490_v33 = vadd.f32 %v2831_v10, %v1393_v62  ;;  %v1396_v36 = vmax.f32 %v1395_v11, %v1259_v5  ;;  %v2192_v16 = vpop.f32.mrb[48].mxu0  ;;  %v2264_v35 = vpop.f32.mrb[48].mxu1 }
 0x13e   :  { %v1493_v24 = vadd.f32 %v2831_v10, %v1402_v34  ;;  %v1409_v37 = vmax.f32 %v2728_v38, %v2192_v16  ;;  %v984_v1 = vpop.f32.mrb[49].mxu0  ;;  %v1272_v18 = vpop.f32.mrb[49].mxu1  ;;  %v1528_v28 = vmax.f32 %v1492_v31, 0.0 }
 0x13f   :  { %v1491_v59 = vadd.f32 %v2831_v10, %v1396_v36  ;;  %v1403_v23 = vmax.f32 %v2732_v40, %v984_v1  ;;  %v2193_v26 = vpop.f32.mrb[50].mxu0  ;;  %v2265_v25 = vpop.f32.mrb[50].mxu1  ;;  %v1526_v13 = vmax.f32 %v1490_v33, 0.0 }
 0x140   :  { %v1529_v61 = vmax.f32 %v1493_v24, 0.0  ;;  %v1410_v27 = vmax.f32 %v1409_v37, %v2730_v39  ;;  %v1412_v15 = vmax.f32 %v2736_v42, %v2193_v26  ;;  %v987_v29 = vpop.f32.mrb[51].mxu0  ;;  %v1275_v2 = vpop.f32.mrb[51].mxu1 }
 0x141   :  { %v1527_v17 = vmax.f32 %v1491_v59, 0.0  ;;  %v1404_v38 = vmax.f32 %v1403_v23, %v2734_v41  ;;  %v1406_v4 = vmax.f32 %v2740_v44, %v987_v29 }
 0x142   :  { %v1985_v20 = vpack.c.bf16 %v1529_v61, %v1528_v28  ;;  %v1411_v63 = vmax.f32 %v1410_v27, %v2264_v35  ;;  %v1413_v40 = vmax.f32 %v1412_v15, %v2738_v43 }
 0x143   :  { %v1980_v19 = vpack.c.bf16 %v1527_v17, %v1526_v13  ;;  %v1405_v3 = vmax.f32 %v1404_v38, %v1272_v18  ;;  %v1407_v21 = vmax.f32 %v1406_v4, %v2742_v45 }
 0x144   :  { %2051 = vst [vmem:[%s2994_s3 + $0x28] sm:$0xff] %v1985_v20   ;;  %v1496_v39 = vadd.f32 %v2831_v10, %v1411_v63  ;;  %v1414_v42 = vmax.f32 %v1413_v40, %v2265_v25 }
 0x145   :  { %2050 = vst [vmem:[%s2994_s3 + $0x20] sm:$0xff] %v1980_v19   ;;  %v1494_v41 = vadd.f32 %v2831_v10, %v1405_v3  ;;  %v1408_v44 = vmax.f32 %v1407_v21, %v1275_v2  ;;  %v2196_v6 = vpop.f32.mrb[52].mxu0  ;;  %v2268_v43 = vpop.f32.mrb[52].mxu1  ;;  %v3021_v3 = vld [vmem:[#allocation2_spill] sm:$0xff] }
 0x146   :  { %v1497_v7 = vadd.f32 %v2831_v10, %v1414_v42  ;;  %v1421_v45 = vmax.f32 %v2744_v46, %v2196_v6  ;;  %v1000_v5 = vpop.f32.mrb[53].mxu0  ;;  %v1288_v0 = vpop.f32.mrb[53].mxu1  ;;  %v1532_v14 = vmax.f32 %v1496_v39, 0.0  ;;  %v3022_v42 = vld [vmem:[#allocation3_spill] sm:$0xff] }
 0x147   :  { %v1495_v8 = vadd.f32 %v2831_v10, %v1408_v44  ;;  %v1415_v30 = vmax.f32 %v2748_v48, %v1000_v5  ;;  %v2197_v9 = vpop.f32.mrb[54].mxu0  ;;  %v2269_v12 = vpop.f32.mrb[54].mxu1  ;;  %v1530_v34 = vmax.f32 %v1494_v41, 0.0 }
 0x148   :  { %v1533_v32 = vmax.f32 %v1497_v7, 0.0  ;;  %v1422_v22 = vmax.f32 %v1421_v45, %v2746_v47  ;;  %v1424_v62 = vmax.f32 %v2752_v50, %v2197_v9  ;;  %v1003_v11 = vpop.f32.mrb[55].mxu0  ;;  %v1291_v31 = vpop.f32.mrb[55].mxu1  ;;  %v3023_v7 = vld [vmem:[#allocation4_spill] sm:$0xff] }
 0x149   :  { %v1531_v33 = vmax.f32 %v1495_v8, 0.0  ;;  %v1416_v46 = vmax.f32 %v1415_v30, %v2750_v49  ;;  %v1418_v36 = vmax.f32 %v2756_v52, %v1003_v11  ;;  %v3024_v30 = vld [vmem:[#allocation6_spill] sm:$0xff] }
 0x14a   :  { %v1995_v16 = vpack.c.bf16 %v1533_v32, %v1532_v14  ;;  %v1423_v35 = vmax.f32 %v1422_v22, %v2268_v43  ;;  %v1425_v48 = vmax.f32 %v1424_v62, %v2754_v51  ;;  %v3025_v62 = vld [vmem:[#allocation5_spill] sm:$0xff] }
 0x14b   :  { %v1990_v24 = vpack.c.bf16 %v1531_v33, %v1530_v34  ;;  %v1417_v37 = vmax.f32 %v1416_v46, %v1288_v0  ;;  %v1419_v1 = vmax.f32 %v1418_v36, %v2758_v53 }
 0x14c   :  { %2053 = vst [vmem:[%s2994_s3 + $0x38] sm:$0xff] %v1995_v16   ;;  %v1500_v47 = vadd.f32 %v2831_v10, %v1423_v35  ;;  %v1426_v50 = vmax.f32 %v1425_v48, %v2269_v12  ;;  %v3027_v35 = vld [vmem:[#allocation7_spill] sm:$0xff] }
 0x14d   :  { %2052 = vst [vmem:[%s2994_s3 + $0x30] sm:$0xff] %v1990_v24   ;;  %v1498_v49 = vadd.f32 %v2831_v10, %v1417_v37  ;;  %v1420_v52 = vmax.f32 %v1419_v1, %v1291_v31  ;;  %v2200_v18 = vpop.f32.mrb[56].mxu0  ;;  %v2272_v51 = vpop.f32.mrb[56].mxu1  ;;  %v3026_v31 = vld [vmem:[#allocation8_spill] sm:$0xff]  ;;  %v3028_v24 = vld [vmem:[#allocation10_spill] sm:$0xff] }
 0x14e   :  { %v1501_v59 = vadd.f32 %v2831_v10, %v1426_v50  ;;  %v1433_v53 = vmax.f32 %v2760_v54, %v2200_v18  ;;  %v1016_v23 = vpop.f32.mrb[57].mxu0  ;;  %v1304_v26 = vpop.f32.mrb[57].mxu1  ;;  %v1536_v15 = vmax.f32 %v1500_v47, 0.0  ;;  %v3029_v50 = vld [vmem:[#allocation9_spill] sm:$0xff] }
 0x14f   :  { %v1499_v25 = vadd.f32 %v2831_v10, %v1420_v52  ;;  %v1427_v28 = vmax.f32 %v2764_v56, %v1016_v23  ;;  %v2201_v61 = vpop.f32.mrb[58].mxu0  ;;  %v2273_v27 = vpop.f32.mrb[58].mxu1  ;;  %v1534_v4 = vmax.f32 %v1498_v49, 0.0 }
 0x150   :  { %v1537_v29 = vmax.f32 %v1501_v59, 0.0  ;;  %v1434_v2 = vmax.f32 %v1433_v53, %v2762_v55  ;;  %v1436_v13 = vmax.f32 %v2768_v58, %v2201_v61  ;;  %v1019_v17 = vpop.f32.mrb[59].mxu0  ;;  %v1307_v38 = vpop.f32.mrb[59].mxu1 }
 0x151   :  { %v1535_v20 = vmax.f32 %v1499_v25, 0.0  ;;  %v1428_v54 = vmax.f32 %v1427_v28, %v2766_v57  ;;  %v1430_v63 = vmax.f32 %v2772_v60, %v1019_v17 }
 0x152   :  { %v2005_v40 = vpack.c.bf16 %v1537_v29, %v1536_v15  ;;  %v1435_v19 = vmax.f32 %v1434_v2, %v2272_v51  ;;  %v1437_v56 = vmax.f32 %v1436_v13, %v3021_v3  ;;  %v3030_v51 = vld [vmem:[#allocation11_spill] sm:$0xff]  ;;  %v3031_v15 = vld [vmem:[#allocation12_spill] sm:$0xff] }
 0x153   :  { %v2000_v21 = vpack.c.bf16 %v1535_v20, %v1534_v4  ;;  %v1429_v39 = vmax.f32 %v1428_v54, %v1304_v26  ;;  %v1431_v41 = vmax.f32 %v1430_v63, %v3022_v42 }
 0x154   :  { %2055 = vst [vmem:[%s2994_s3 + $0x48] sm:$0xff] %v2005_v40   ;;  %v1504_v55 = vadd.f32 %v2831_v10, %v1435_v19  ;;  %v1438_v58 = vmax.f32 %v1437_v56, %v2273_v27  ;;  %v3033_v19 = vld [vmem:[#allocation13_spill] sm:$0xff]  ;;  %v3034_v56 = vld [vmem:[#allocation16_spill] sm:$0xff] }
 0x155   :  { %2054 = vst [vmem:[%s2994_s3 + $0x40] sm:$0xff] %v2000_v21   ;;  %v1502_v57 = vadd.f32 %v2831_v10, %v1429_v39  ;;  %v1432_v60 = vmax.f32 %v1431_v41, %v1307_v38  ;;  %v2204_v44 = vpop.f32.mrb[60].mxu0  ;;  %v2276_v6 = vpop.f32.mrb[60].mxu1  ;;  %v3032_v38 = vld [vmem:[#allocation14_spill] sm:$0xff] }
 0x156   :  { %v1505_v43 = vadd.f32 %v2831_v10, %v1438_v58  ;;  %v1445_v45 = vmax.f32 %v3023_v7, %v2204_v44  ;;  %v1032_v5 = vpop.f32.mrb[61].mxu0  ;;  %v1320_v0 = vpop.f32.mrb[61].mxu1  ;;  %v1540_v32 = vmax.f32 %v1504_v55, 0.0  ;;  %v3035_v58 = vld [vmem:[#allocation15_spill] sm:$0xff]  ;;  %v3037_v7 = vld [vmem:[#allocation17_spill] sm:$0xff] }
 0x157   :  { %v1503_v8 = vadd.f32 %v2831_v10, %v1432_v60  ;;  %v1439_v9 = vmax.f32 %v3024_v30, %v1032_v5  ;;  %v2205_v12 = vpop.f32.mrb[62].mxu0  ;;  %v2277_v14 = vpop.f32.mrb[62].mxu1  ;;  %v1538_v36 = vmax.f32 %v1502_v57, 0.0  ;;  %v3036_v60 = vld [vmem:[#allocation18_spill] sm:$0xff] }
 0x158   :  { %v1541_v22 = vmax.f32 %v1505_v43, 0.0  ;;  %v1446_v11 = vmax.f32 %v1445_v45, %v3025_v62  ;;  %v1448_v34 = vmax.f32 %v3026_v31, %v2205_v12  ;;  %v1035_v33 = vpop.f32.mrb[63].mxu0  ;;  %v1323_v46 = vpop.f32.mrb[63].mxu1  ;;  %v3039_v31 = vld [vmem:[#allocation20_spill] sm:$0xff] }
 0x159   :  { %v1539_v16 = vmax.f32 %v1503_v8, 0.0  ;;  %v1440_v48 = vmax.f32 %v1439_v9, %v3027_v35  ;;  %v1442_v37 = vmax.f32 %v3028_v24, %v1035_v33  ;;  %v3038_v8 = vld [vmem:[#allocation19_spill] sm:$0xff] }
 0x15a   :  { %v2015_v1 = vpack.c.bf16 %v1541_v22, %v1540_v32  ;;  %v1447_v47 = vmax.f32 %v1446_v11, %v2276_v6  ;;  %v1449_v49 = vmax.f32 %v1448_v34, %v3029_v50 }
 0x15b   :  { %v2010_v52 = vpack.c.bf16 %v1539_v16, %v1538_v36  ;;  %v1441_v18 = vmax.f32 %v1440_v48, %v1320_v0  ;;  %v1443_v59 = vmax.f32 %v1442_v37, %v3030_v51  ;;  %v3040_v16 = vld [vmem:[#allocation22_spill] sm:$0xff] }
 0x15c   :  { %2057 = vst [vmem:[%s2994_s3 + $0x58] sm:$0xff] %v2015_v1   ;;  %v1508_v53 = vadd.f32 %v2831_v10, %v1447_v47  ;;  %v1450_v23 = vmax.f32 %v1449_v49, %v2277_v14  ;;  %v3041_v47 = vld [vmem:[#allocation21_spill] sm:$0xff]  ;;  %v3042_v49 = vld [vmem:[#allocation24_spill] sm:$0xff] }
 0x15d   :  { %2056 = vst [vmem:[%s2994_s3 + $0x50] sm:$0xff] %v2010_v52   ;;  %v1506_v26 = vadd.f32 %v2831_v10, %v1441_v18  ;;  %v1444_v25 = vmax.f32 %v1443_v59, %v1323_v46  ;;  %v2208_v28 = vpop.f32.mrb[64].mxu0  ;;  %v2280_v61 = vpop.f32.mrb[64].mxu1 }
 0x15e   :  { %v1509_v27 = vadd.f32 %v2831_v10, %v1450_v23  ;;  %v1457_v29 = vmax.f32 %v3031_v15, %v2208_v28  ;;  %v1048_v2 = vpop.f32.mrb[65].mxu0  ;;  %v1336_v13 = vpop.f32.mrb[65].mxu1  ;;  %v1544_v63 = vmax.f32 %v1508_v53, 0.0  ;;  %v3043_v23 = vld [vmem:[#allocation23_spill] sm:$0xff]  ;;  %v3045_v15 = vld [vmem:[#allocation25_spill] sm:$0xff] }
 0x15f   :  { %v1507_v17 = vadd.f32 %v2831_v10, %v1444_v25  ;;  %v1451_v4 = vmax.f32 %v3032_v38, %v1048_v2  ;;  %v2209_v20 = vpop.f32.mrb[66].mxu0  ;;  %v2281_v54 = vpop.f32.mrb[66].mxu1  ;;  %v1542_v41 = vmax.f32 %v1506_v26, 0.0  ;;  %v3044_v25 = vld [vmem:[#allocation26_spill] sm:$0xff] }
 0x160   :  { %v1545_v40 = vmax.f32 %v1509_v27, 0.0  ;;  %v1458_v3 = vmax.f32 %v1457_v29, %v3033_v19  ;;  %v1460_v21 = vmax.f32 %v3034_v56, %v2209_v20  ;;  %v1051_v39 = vpop.f32.mrb[67].mxu0  ;;  %v1339_v42 = vpop.f32.mrb[67].mxu1 }
 0x161   :  { %v1543_v55 = vmax.f32 %v1507_v17, 0.0  ;;  %v1452_v57 = vmax.f32 %v1451_v4, %v3035_v58  ;;  %v1454_v44 = vmax.f32 %v3036_v60, %v1051_v39  ;;  %v3046_v17 = vld [vmem:[#allocation27_spill] sm:$0xff] }
 0x162   :  { %v2025_v6 = vpack.c.bf16 %v1545_v40, %v1544_v63  ;;  %v1459_v43 = vmax.f32 %v1458_v3, %v2280_v61  ;;  %v1461_v45 = vmax.f32 %v1460_v21, %v3037_v7 }
 0x163   :  { %v2020_v5 = vpack.c.bf16 %v1543_v55, %v1542_v41  ;;  %v1453_v0 = vmax.f32 %v1452_v57, %v1336_v13  ;;  %v1455_v30 = vmax.f32 %v1454_v44, %v3038_v8 }
 0x164   :  { %2059 = vst [vmem:[%s2994_s3 + $0x68] sm:$0xff] %v2025_v6   ;;  %v1512_v9 = vadd.f32 %v2831_v10, %v1459_v43  ;;  %v1462_v12 = vmax.f32 %v1461_v45, %v2281_v54 }
 0x165   :  { %2058 = vst [vmem:[%s2994_s3 + $0x60] sm:$0xff] %v2020_v5   ;;  %v1510_v14 = vadd.f32 %v2831_v10, %v1453_v0  ;;  %v1456_v32 = vmax.f32 %v1455_v30, %v1339_v42  ;;  %v2212_v22 = vpop.f32.mrb[68].mxu0  ;;  %v2284_v62 = vpop.f32.mrb[68].mxu1 }
 0x166   :  { %v1513_v11 = vadd.f32 %v2831_v10, %v1462_v12  ;;  %v1469_v34 = vmax.f32 %v3039_v31, %v2212_v22  ;;  %v1064_v33 = vpop.f32.mrb[69].mxu0  ;;  %v1352_v46 = vpop.f32.mrb[69].mxu1  ;;  %v1548_v37 = vmax.f32 %v1512_v9, 0.0 }
 0x167   :  { %v1511_v36 = vadd.f32 %v2831_v10, %v1456_v32  ;;  %v1463_v35 = vmax.f32 %v3040_v16, %v1064_v33  ;;  %v2213_v48 = vpop.f32.mrb[70].mxu0  ;;  %v2285_v24 = vpop.f32.mrb[70].mxu1  ;;  %v1546_v59 = vmax.f32 %v1510_v14, 0.0 }
 0x168   :  { %v1549_v1 = vmax.f32 %v1513_v11, 0.0  ;;  %v1470_v50 = vmax.f32 %v1469_v34, %v3041_v47  ;;  %v1472_v52 = vmax.f32 %v3042_v49, %v2213_v48  ;;  %v1067_v18 = vpop.f32.mrb[71].mxu0  ;;  %v1355_v51 = vpop.f32.mrb[71].mxu1 }
 0x169   :  { %v1547_v53 = vmax.f32 %v1511_v36, 0.0  ;;  %v1464_v26 = vmax.f32 %v1463_v35, %v3043_v23  ;;  %v1466_v28 = vmax.f32 %v3044_v25, %v1067_v18 }
 0x16a   :  { %v2035_v61 = vpack.c.bf16 %v1549_v1, %v1548_v37  ;;  %v1471_v27 = vmax.f32 %v1470_v50, %v2284_v62  ;;  %v1473_v29 = vmax.f32 %v1472_v52, %v3045_v15 }
 0x16b   :  { %v2030_v2 = vpack.c.bf16 %v1547_v53, %v1546_v59  ;;  %v1465_v13 = vmax.f32 %v1464_v26, %v1352_v46  ;;  %v1467_v38 = vmax.f32 %v1466_v28, %v3046_v17 }
 0x16c   :  { %2061 = vst [vmem:[%s2994_s3 + $0x78] sm:$0xff] %v2035_v61   ;;  %v1516_v4 = vadd.f32 %v2831_v10, %v1471_v27  ;;  %v1474_v20 = vmax.f32 %v1473_v29, %v2285_v24 }
 0x16d   :  { %2060 = vst [vmem:[%s2994_s3 + $0x70] sm:$0xff] %v2030_v2   ;;  %v1514_v54 = vadd.f32 %v2831_v10, %v1465_v13  ;;  %v1468_v63 = vmax.f32 %v1467_v38, %v1355_v51 }
 0x16e   :  { %v1517_v40 = vadd.f32 %v2831_v10, %v1474_v20  ;;  %v1552_v3 = vmax.f32 %v1516_v4, 0.0 }
 0x16f   :  { %v1515_v19 = vadd.f32 %v2831_v10, %v1468_v63  ;;  %v1550_v21 = vmax.f32 %v1514_v54, 0.0 }
 0x170   :  { %v1553_v56 = vmax.f32 %v1517_v40, 0.0 }
 0x171   :  { %v1551_v39 = vmax.f32 %v1515_v19, 0.0 }
 0x172   :  { %v2045_v42 = vpack.c.bf16 %v1553_v56, %v1552_v3 }
 0x173   :  { %v2040_v41 = vpack.c.bf16 %v1551_v39, %v1550_v21 }
 0x174   :  { %2063 = vst [vmem:[%s2994_s3 + $0x88] sm:$0xff] %v2045_v42  }
 0x175   :  { %2062 = vst [vmem:[%s2994_s3 + $0x80] sm:$0xff] %v2040_v41  }

// kernel: forward.3
= control target key start
LH: loop header
LB: loop body
LE: loop exit
PB: predicated region body
PF: predicated region fallthrough
CT: control target
= control target key end

     0   :  { %v4847_v0 = vmov 0   ;;  %vm858_vm0 = vcmask 998400   ;;  %vm1051_vm1 = vcmask 1044480   ;;  %vm4849_vm2 = vmmov 0   ;;  %s6443_s1 = inlined_call_operand.vmem [shape: bf16[250,128], index: 1, kind: input, shape index: {}]   ;;  %s6444_s0 = inlined_call_operand.vmem [shape: bf16[4,16,16,250], index: 0, kind: input, shape index: {}]   ;;  %s6445_s3 = inlined_call_operand.vmem [shape: bf16[16,128,128], index: 3, kind: input, shape index: {}]   ;;  %s6446_s2 = inlined_call_operand.vmem [shape: f32[1,128], index: 2, kind: input, shape index: {}]   ;;  %s6447_s5 = inlined_call_operand.vmem [shape: bf16[128,128], index: 5, kind: input, shape index: {}]   ;;  %s6448_s4 = inlined_call_operand.vmem [shape: f32[1,128], index: 4, kind: input, shape index: {}]   ;;  %s6449_s6 = inlined_call_operand.vmem [shape: f32[1,128], index: 6, kind: input, shape index: {}]   ;;  %s6450_s7 = inlined_call_operand.vmem [shape: f32[16,128], index: 7, kind: output, shape index: {}]  }
   0x1   :  { %1055 = vmatprep.subr.bf16.mxu0 %v4847_v0  ;;  %v4495_v1 = vld [vmem:[%s6443_s1] sm:$0xff]   ;;  %v4496_v2 = vld [vmem:[%s6443_s1 + $0x8] sm:$0xff]   ;;  %v4497_v3 = vld [vmem:[%s6443_s1 + $0x10] sm:$0xff]  }
   0x2   :  { %1056 = vmatpush1.bf16.msra.mxu0 %v4495_v1  ;;  %v4498_v4 = vld [vmem:[%s6443_s1 + $0x18] sm:$0xff]   ;;  %v4499_v5 = vld [vmem:[%s6443_s1 + $0x20] sm:$0xff]   ;;  %v4500_v7 = vld [vmem:[%s6443_s1 + $0x28] sm:$0xff]  }
   0x3   :  { %1057 = vmatprep.subr.bf16.mxu0 %v4847_v0  ;;  %v4513_v6 = vld [vmem:[%s6444_s0 + $0x4] ss:$8 sps:$4 sm:$0xff]   ;;  %v4501_v8 = vld [vmem:[%s6443_s1 + $0x30] sm:$0xff]   ;;  %v4502_v9 = vld [vmem:[%s6443_s1 + $0x38] sm:$0xff]  }
   0x4   :  { %3796 = vmatprep.mubr.msk.bf16.mxu0 %vm858_vm0, %v4513_v6  ;;  %v4503_v10 = vld [vmem:[%s6443_s1 + $0x40] sm:$0xff]   ;;  %v4504_v11 = vld [vmem:[%s6443_s1 + $0x48] sm:$0xff]   ;;  %v4505_v12 = vld [vmem:[%s6443_s1 + $0x50] sm:$0xff]  }
   0x5   :  { %v4506_v13 = vld [vmem:[%s6443_s1 + $0x58] sm:$0xff]   ;;  %v4507_v14 = vld [vmem:[%s6443_s1 + $0x60] sm:$0xff]   ;;  %v4508_v15 = vld [vmem:[%s6443_s1 + $0x68] sm:$0xff]  }
   0x6   :  { %1058 = vmatpush1.bf16.msra.mxu0 %v4496_v2  ;;  %v4509_v16 = vld [vmem:[%s6443_s1 + $0x70] sm:$0xff]   ;;  %v4510_v17 = vld [vmem:[%s6443_s1 + $0x78] sm:$0x1f]   ;;  %v4511_v19 = vld [vmem:[%s6444_s0] ss:$8 sps:$4 sm:$0xff]  }
   0x7   :  { %1059 = vmatprep.subr.bf16.mxu0 %v4847_v0  ;;  %v1053_v18 = vsel %vm1051_vm1, %v4510_v17, 0  ;;  %v4514_v20 = vld [vmem:[%s6444_s0 + $0x14] ss:$8 sps:$4 sm:$0xff]   ;;  %v4516_v21 = vld [vmem:[%s6444_s0 + $0x10] ss:$8 sps:$4 sm:$0xff]  }
   0x8   :  { %v4517_v22 = vld [vmem:[%s6444_s0 + $0x24] ss:$8 sps:$4 sm:$0xff]   ;;  %v4519_v23 = vld [vmem:[%s6444_s0 + $0x20] ss:$8 sps:$4 sm:$0xff]   ;;  %v4520_v24 = vld [vmem:[%s6444_s0 + $0x34] ss:$8 sps:$4 sm:$0xff]  }
   0x9   :  { %v4522_v25 = vld [vmem:[%s6444_s0 + $0x30] ss:$8 sps:$4 sm:$0xff]   ;;  %v4523_v26 = vld [vmem:[%s6444_s0 + $0x44] ss:$8 sps:$4 sm:$0xff]   ;;  %v4525_v27 = vld [vmem:[%s6444_s0 + $0x40] ss:$8 sps:$4 sm:$0xff]  }
   0xa   :  { %1060 = vmatpush1.bf16.msra.mxu0 %v4497_v3  ;;  %v4526_v28 = vld [vmem:[%s6444_s0 + $0x54] ss:$8 sps:$4 sm:$0xff]   ;;  %v4528_v29 = vld [vmem:[%s6444_s0 + $0x50] ss:$8 sps:$4 sm:$0xff]   ;;  %v4529_v30 = vld [vmem:[%s6444_s0 + $0x64] ss:$8 sps:$4 sm:$0xff]  }
   0xb   :  { %1061 = vmatprep.subr.bf16.mxu0 %v4847_v0  ;;  %v4531_v31 = vld [vmem:[%s6444_s0 + $0x60] ss:$8 sps:$4 sm:$0xff]   ;;  %v4532_v32 = vld [vmem:[%s6444_s0 + $0x74] ss:$8 sps:$4 sm:$0xff]   ;;  %v4534_v33 = vld [vmem:[%s6444_s0 + $0x70] ss:$8 sps:$4 sm:$0xff]  }
   0xc   :  { %v4535_v34 = vld [vmem:[%s6444_s0 + $0x84] ss:$8 sps:$4 sm:$0xff]   ;;  %v4537_v35 = vld [vmem:[%s6444_s0 + $0x80] ss:$8 sps:$4 sm:$0xff]   ;;  %v4538_v36 = vld [vmem:[%s6444_s0 + $0x94] ss:$8 sps:$4 sm:$0xff]  }
   0xd   :  { %v4540_v37 = vld [vmem:[%s6444_s0 + $0x90] ss:$8 sps:$4 sm:$0xff]   ;;  %v4541_v38 = vld [vmem:[%s6444_s0 + $0xa4] ss:$8 sps:$4 sm:$0xff]   ;;  %v4543_v39 = vld [vmem:[%s6444_s0 + $0xa0] ss:$8 sps:$4 sm:$0xff]  }
   0xe   :  { %1062 = vmatpush1.bf16.msra.mxu0 %v4498_v4  ;;  %v4544_v40 = vld [vmem:[%s6444_s0 + $0xb4] ss:$8 sps:$4 sm:$0xff]   ;;  %v4546_v41 = vld [vmem:[%s6444_s0 + $0xb0] ss:$8 sps:$4 sm:$0xff]   ;;  %v4547_v42 = vld [vmem:[%s6444_s0 + $0xc4] ss:$8 sps:$4 sm:$0xff]  }
   0xf   :  { %1063 = vmatprep.subr.bf16.mxu0 %v4847_v0  ;;  %v4549_v43 = vld [vmem:[%s6444_s0 + $0xc0] ss:$8 sps:$4 sm:$0xff]   ;;  %v4550_v44 = vld [vmem:[%s6444_s0 + $0xd4] ss:$8 sps:$4 sm:$0xff]   ;;  %v4552_v45 = vld [vmem:[%s6444_s0 + $0xd0] ss:$8 sps:$4 sm:$0xff]  }
  0x10   :  { %v4553_v46 = vld [vmem:[%s6444_s0 + $0xe4] ss:$8 sps:$4 sm:$0xff]   ;;  %v4555_v47 = vld [vmem:[%s6444_s0 + $0xe0] ss:$8 sps:$4 sm:$0xff]   ;;  %v4556_v48 = vld [vmem:[%s6444_s0 + $0xf4] ss:$8 sps:$4 sm:$0xff]  }
  0x11   :  { %v4558_v49 = vld [vmem:[%s6444_s0 + $0xf0] ss:$8 sps:$4 sm:$0xff]   ;;  %v4559_v50 = vld [vmem:[%s6444_s0 + $0x104] ss:$8 sps:$4 sm:$0xff]   ;;  %v4561_v51 = vld [vmem:[%s6444_s0 + $0x100] ss:$8 sps:$4 sm:$0xff]  }
  0x12   :  { %1064 = vmatpush1.bf16.msra.mxu0 %v4499_v5  ;;  %v4562_v52 = vld [vmem:[%s6444_s0 + $0x114] ss:$8 sps:$4 sm:$0xff]   ;;  %v4564_v53 = vld [vmem:[%s6444_s0 + $0x110] ss:$8 sps:$4 sm:$0xff]   ;;  %v4565_v54 = vld [vmem:[%s6444_s0 + $0x124] ss:$8 sps:$4 sm:$0xff]  }
  0x13   :  { %1065 = vmatprep.subr.bf16.mxu0 %v4847_v0  ;;  %v4567_v55 = vld [vmem:[%s6444_s0 + $0x120] ss:$8 sps:$4 sm:$0xff]   ;;  %v4568_v56 = vld [vmem:[%s6444_s0 + $0x134] ss:$8 sps:$4 sm:$0xff]   ;;  %v4570_v57 = vld [vmem:[%s6444_s0 + $0x130] ss:$8 sps:$4 sm:$0xff]  }
  0x14   :  { %v4571_v58 = vld [vmem:[%s6444_s0 + $0x144] ss:$8 sps:$4 sm:$0xff]   ;;  %v4573_v59 = vld [vmem:[%s6444_s0 + $0x140] ss:$8 sps:$4 sm:$0xff]   ;;  %v4574_v60 = vld [vmem:[%s6444_s0 + $0x154] ss:$8 sps:$4 sm:$0xff]  }
  0x15   :  { %v4576_v61 = vld [vmem:[%s6444_s0 + $0x150] ss:$8 sps:$4 sm:$0xff]   ;;  %v4577_v62 = vld [vmem:[%s6444_s0 + $0x164] ss:$8 sps:$4 sm:$0xff]   ;;  %v4579_v63 = vld [vmem:[%s6444_s0 + $0x160] ss:$8 sps:$4 sm:$0xff]  }
  0x16   :  { %1066 = vmatpush1.bf16.msra.mxu0 %v4500_v7  ;;  %v4582_v1 = vld [vmem:[%s6444_s0 + $0x170] ss:$8 sps:$4 sm:$0xff]   ;;  %v4583_v2 = vld [vmem:[%s6444_s0 + $0x184] ss:$8 sps:$4 sm:$0xff]   ;;  %v4585_v3 = vld [vmem:[%s6444_s0 + $0x180] ss:$8 sps:$4 sm:$0xff]  }
  0x17   :  { %1067 = vmatprep.subr.bf16.mxu0 %v4847_v0  ;;  %v4586_v4 = vld [vmem:[%s6444_s0 + $0x194] ss:$8 sps:$4 sm:$0xff]   ;;  %v4588_v5 = vld [vmem:[%s6444_s0 + $0x190] ss:$8 sps:$4 sm:$0xff]   ;;  %v4589_v6 = vld [vmem:[%s6444_s0 + $0x1a4] ss:$8 sps:$4 sm:$0xff]  }
  0x18   :  { %v4591_v7 = vld [vmem:[%s6444_s0 + $0x1a0] ss:$8 sps:$4 sm:$0xff]  }
  0x19   :  { %v4597_v17 = vld [vmem:[%s6444_s0 + $0x1c0] ss:$8 sps:$4 sm:$0xff]  }
  0x1a   :  { %1068 = vmatpush1.bf16.msra.mxu0 %v4501_v8  ;;  %v4592_v8 = vld [vmem:[%s6444_s0 + $0x1b4] ss:$8 sps:$4 sm:$0xff]  }
  0x1b   :  { %1069 = vmatprep.subr.bf16.mxu0 %v4847_v0 }
  0x1e   :  { %1070 = vmatpush1.bf16.msra.mxu0 %v4502_v9 }
  0x1f   :  { %1071 = vmatprep.subr.bf16.mxu0 %v4847_v0 }
  0x22   :  { %1072 = vmatpush1.bf16.msra.mxu0 %v4503_v10 }
  0x23   :  { %1073 = vmatprep.subr.bf16.mxu0 %v4847_v0 }
  0x26   :  { %1074 = vmatpush1.bf16.msra.mxu0 %v4504_v11  ;;  %v4594_v11 = vld [vmem:[%s6444_s0 + $0x1b0] ss:$8 sps:$4 sm:$0xff]  }
  0x27   :  { %1075 = vmatprep.subr.bf16.mxu0 %v4847_v0 }
  0x2a   :  { %1076 = vmatpush1.bf16.msra.mxu0 %v4505_v12 }
  0x2b   :  { %1077 = vmatprep.subr.bf16.mxu0 %v4847_v0 }
  0x2e   :  { %1078 = vmatpush1.bf16.msra.mxu0 %v4506_v13  ;;  %v4595_v13 = vld [vmem:[%s6444_s0 + $0x1c4] ss:$8 sps:$4 sm:$0xff]  }
  0x2f   :  { %1079 = vmatprep.subr.bf16.mxu0 %v4847_v0 }
  0x32   :  { %1080 = vmatpush1.bf16.msra.mxu0 %v4507_v14 }
  0x33   :  { %1081 = vmatprep.subr.bf16.mxu0 %v4847_v0 }
  0x36   :  { %1082 = vmatpush1.bf16.msra.mxu0 %v4508_v15 }
  0x37   :  { %1083 = vmatprep.subr.bf16.mxu0 %v4847_v0 }
  0x3a   :  { %1084 = vmatpush1.bf16.msra.mxu0 %v4509_v16 }
  0x3b   :  { %1085 = vmatprep.subr.bf16.mxu0 %v4847_v0  ;;  %v4580_v0 = vld [vmem:[%s6444_s0 + $0x174] ss:$8 sps:$4 sm:$0xff]  }
  0x3e   :  { %1086 = vmatpush1.bf16.msra.mxu0 %v1053_v18 }
  0x41   :  { %1088 = vmatmul.mubr.bf16.vlgmr.msra.gmra.mrb[0].mxu0 %v4511_v19  ;;  %v4598_v19 = vld [vmem:[%s6444_s0 + $0x1d4] ss:$8 sps:$4 sm:$0xff]  }
  0x42   :  { %3797 = vmatprep.mubr.msk.bf16.mxu0 %vm858_vm0, %v4514_v20 }
  0x49   :  { %1096 = vmatmul.mubr.bf16.gmra.mrb[4].mxu0 %v4516_v21 }
  0x4a   :  { %3798 = vmatprep.mubr.msk.bf16.mxu0 %vm858_vm0, %v4517_v22 }
  0x51   :  { %1104 = vmatmul.mubr.bf16.gmra.mrb[8].mxu0 %v4519_v23  ;;  %v4600_v23 = vld [vmem:[%s6444_s0 + $0x1d0] ss:$8 sps:$4 sm:$0xff]  }
  0x52   :  { %3799 = vmatprep.mubr.msk.bf16.mxu0 %vm858_vm0, %v4520_v24 }
  0x59   :  { %1112 = vmatmul.mubr.bf16.gmra.mrb[12].mxu0 %v4522_v25  ;;  %v4601_v25 = vld [vmem:[%s6444_s0 + $0x1e4] ss:$8 sps:$4 sm:$0xff]  }
  0x5a   :  { %3800 = vmatprep.mubr.msk.bf16.mxu0 %vm858_vm0, %v4523_v26 }
  0x61   :  { %1120 = vmatmul.mubr.bf16.gmra.mrb[16].mxu0 %v4525_v27 }
  0x62   :  { %3801 = vmatprep.mubr.msk.bf16.mxu0 %vm858_vm0, %v4526_v28 }
  0x69   :  { %1128 = vmatmul.mubr.bf16.gmra.mrb[20].mxu0 %v4528_v29  ;;  %v4603_v29 = vld [vmem:[%s6444_s0 + $0x1e0] ss:$8 sps:$4 sm:$0xff]  }
  0x6a   :  { %3802 = vmatprep.mubr.msk.bf16.mxu0 %vm858_vm0, %v4529_v30 }
  0x71   :  { %1136 = vmatmul.mubr.bf16.gmra.mrb[24].mxu0 %v4531_v31  ;;  %v4604_v31 = vld [vmem:[%s6444_s0 + $0x1f4] ss:$8 sps:$4 sm:$0xff]  }
  0x72   :  { %3803 = vmatprep.mubr.msk.bf16.mxu0 %vm858_vm0, %v4532_v32 }
  0x79   :  { %1144 = vmatmul.mubr.bf16.gmra.mrb[28].mxu0 %v4534_v33 }
  0x7a   :  { %3804 = vmatprep.mubr.msk.bf16.mxu0 %vm858_vm0, %v4535_v34 }
  0x81   :  { %1152 = vmatmul.mubr.bf16.gmra.mrb[32].mxu0 %v4537_v35  ;;  %v4606_v35 = vld [vmem:[%s6444_s0 + $0x1f0] ss:$8 sps:$4 sm:$0xff]  }
  0x82   :  { %3805 = vmatprep.mubr.msk.bf16.mxu0 %vm858_vm0, %v4538_v36 }
  0x89   :  { %1160 = vmatmul.mubr.bf16.gmra.mrb[36].mxu0 %v4540_v37  ;;  %v4607_v37 = vld [vmem:[%s6444_s0 + $0x204] ss:$8 sps:$4 sm:$0xff]  }
  0x8a   :  { %3806 = vmatprep.mubr.msk.bf16.mxu0 %vm858_vm0, %v4541_v38 }
  0x91   :  { %1168 = vmatmul.mubr.bf16.gmra.mrb[40].mxu0 %v4543_v39 }
  0x92   :  { %3807 = vmatprep.mubr.msk.bf16.mxu0 %vm858_vm0, %v4544_v40 }
  0x99   :  { %1176 = vmatmul.mubr.bf16.gmra.mrb[44].mxu0 %v4546_v41  ;;  %v4609_v41 = vld [vmem:[%s6444_s0 + $0x200] ss:$8 sps:$4 sm:$0xff]  }
  0x9a   :  { %3808 = vmatprep.mubr.msk.bf16.mxu0 %vm858_vm0, %v4547_v42 }
  0xa1   :  { %1184 = vmatmul.mubr.bf16.gmra.mrb[48].mxu0 %v4549_v43  ;;  %v4610_v43 = vld [vmem:[%s6444_s0 + $0x214] ss:$8 sps:$4 sm:$0xff]  }
  0xa2   :  { %3809 = vmatprep.mubr.msk.bf16.mxu0 %vm858_vm0, %v4550_v44 }
  0xa9   :  { %1192 = vmatmul.mubr.bf16.gmra.mrb[52].mxu0 %v4552_v45 }
  0xaa   :  { %3810 = vmatprep.mubr.msk.bf16.mxu0 %vm858_vm0, %v4553_v46 }
  0xb1   :  { %1200 = vmatmul.mubr.bf16.gmra.mrb[56].mxu0 %v4555_v47  ;;  %v4612_v47 = vld [vmem:[%s6444_s0 + $0x210] ss:$8 sps:$4 sm:$0xff]  }
  0xb2   :  { %3811 = vmatprep.mubr.msk.bf16.mxu0 %vm858_vm0, %v4556_v48 }
  0xb9   :  { %1208 = vmatmul.mubr.bf16.gmra.mrb[60].mxu0 %v4558_v49  ;;  %v4613_v49 = vld [vmem:[%s6444_s0 + $0x224] ss:$8 sps:$4 sm:$0xff]  }
  0xba   :  { %3812 = vmatprep.mubr.msk.bf16.mxu0 %vm858_vm0, %v4559_v50 }
  0xc1   :  { %1216 = vmatmul.mubr.bf16.gmra.mrb[64].mxu0 %v4561_v51 }
  0xc2   :  { %3813 = vmatprep.mubr.msk.bf16.mxu0 %vm858_vm0, %v4562_v52 }
  0xc9   :  { %1224 = vmatmul.mubr.bf16.gmra.mrb[68].mxu0 %v4564_v53  ;;  %v4615_v53 = vld [vmem:[%s6444_s0 + $0x220] ss:$8 sps:$4 sm:$0xff]  }
  0xca   :  { %3814 = vmatprep.mubr.msk.bf16.mxu0 %vm858_vm0, %v4565_v54 }
  0xd1   :  { %1232 = vmatmul.mubr.bf16.gmra.mrb[72].mxu0 %v4567_v55  ;;  %v4616_v55 = vld [vmem:[%s6444_s0 + $0x234] ss:$8 sps:$4 sm:$0xff]  }
  0xd2   :  { %3815 = vmatprep.mubr.msk.bf16.mxu0 %vm858_vm0, %v4568_v56 }
  0xd9   :  { %1240 = vmatmul.mubr.bf16.gmra.mrb[76].mxu0 %v4570_v57 }
  0xda   :  { %3816 = vmatprep.mubr.msk.bf16.mxu0 %vm858_vm0, %v4571_v58 }
  0xe1   :  { %1248 = vmatmul.mubr.bf16.gmra.mrb[80].mxu0 %v4573_v59  ;;  %v4618_v59 = vld [vmem:[%s6444_s0 + $0x230] ss:$8 sps:$4 sm:$0xff]  }
  0xe2   :  { %3817 = vmatprep.mubr.msk.bf16.mxu0 %vm858_vm0, %v4574_v60 }
  0xe9   :  { %1256 = vmatmul.mubr.bf16.gmra.mrb[84].mxu0 %v4576_v61  ;;  %v4619_v61 = vld [vmem:[%s6444_s0 + $0x244] ss:$8 sps:$4 sm:$0xff]  }
  0xea   :  { %3818 = vmatprep.mubr.msk.bf16.mxu0 %vm858_vm0, %v4577_v62 }
  0xf1   :  { %1264 = vmatmul.mubr.bf16.gmra.mrb[88].mxu0 %v4579_v63 }
  0xf2   :  { %3819 = vmatprep.mubr.msk.bf16.mxu0 %vm858_vm0, %v4580_v0 }
  0xf9   :  { %1272 = vmatmul.mubr.bf16.gmra.mrb[92].mxu0 %v4582_v1  ;;  %v4621_v1 = vld [vmem:[%s6444_s0 + $0x240] ss:$8 sps:$4 sm:$0xff]  }
  0xfa   :  { %3820 = vmatprep.mubr.msk.bf16.mxu0 %vm858_vm0, %v4583_v2 }
 0x101   :  { %1280 = vmatmul.mubr.bf16.gmra.mrb[96].mxu0 %v4585_v3  ;;  %v4622_v3 = vld [vmem:[%s6444_s0 + $0x254] ss:$8 sps:$4 sm:$0xff]  }
 0x102   :  { %3821 = vmatprep.mubr.msk.bf16.mxu0 %vm858_vm0, %v4586_v4 }
 0x109   :  { %1288 = vmatmul.mubr.bf16.gmra.mrb[100].mxu0 %v4588_v5 }
 0x10a   :  { %3822 = vmatprep.mubr.msk.bf16.mxu0 %vm858_vm0, %v4589_v6 }
 0x111   :  { %1296 = vmatmul.mubr.bf16.gmra.mrb[104].mxu0 %v4591_v7  ;;  %v4624_v7 = vld [vmem:[%s6444_s0 + $0x250] ss:$8 sps:$4 sm:$0xff]  }
 0x112   :  { %3823 = vmatprep.mubr.msk.bf16.mxu0 %vm858_vm0, %v4592_v8 }
 0x114   :  { %v5131_v9 = vpop.f32.mrb[0].mxu0 }
 0x115   :  { %v1091_v10 = vpop.f32.mrb[1].mxu0 }
 0x116   :  { %v5136_v12 = vpop.f32.mrb[2].mxu0  ;;  %v4625_v10 = vld [vmem:[%s6444_s0 + $0x264] ss:$8 sps:$4 sm:$0xff]  }
 0x117   :  { %v1094_v14 = vpop.f32.mrb[3].mxu0 }
 0x119   :  { %1304 = vmatmul.mubr.bf16.gmra.mrb[108].mxu0 %v4594_v11 }
 0x11a   :  { %3824 = vmatprep.mubr.msk.bf16.mxu0 %vm858_vm0, %v4595_v13 }
 0x11c   :  { %v5142_v15 = vpop.f32.mrb[4].mxu0 }
 0x11d   :  { %v1099_v16 = vpop.f32.mrb[5].mxu0 }
 0x11e   :  { %v5147_v18 = vpop.f32.mrb[6].mxu0  ;;  %v4627_v16 = vld [vmem:[%s6444_s0 + $0x260] ss:$8 sps:$4 sm:$0xff]  }
 0x11f   :  { %v1102_v20 = vpop.f32.mrb[7].mxu0 }
 0x121   :  { %1312 = vmatmul.mubr.bf16.gmra.mrb[112].mxu0 %v4597_v17 }
 0x122   :  { %3825 = vmatprep.mubr.msk.bf16.mxu0 %vm858_vm0, %v4598_v19  ;;  %v4628_v19 = vld [vmem:[%s6444_s0 + $0x274] ss:$8 sps:$4 sm:$0xff]  }
 0x124   :  { %v5153_v21 = vpop.f32.mrb[8].mxu0 }
 0x125   :  { %v1107_v22 = vpop.f32.mrb[9].mxu0 }
 0x126   :  { %v5158_v24 = vpop.f32.mrb[10].mxu0 }
 0x127   :  { %v1110_v26 = vpop.f32.mrb[11].mxu0 }
 0x129   :  { %1320 = vmatmul.mubr.bf16.gmra.mrb[116].mxu0 %v4600_v23 }
 0x12a   :  { %3826 = vmatprep.mubr.msk.bf16.mxu0 %vm858_vm0, %v4601_v25  ;;  %v4630_v25 = vld [vmem:[%s6444_s0 + $0x270] ss:$8 sps:$4 sm:$0xff]  }
 0x12c   :  { %v5164_v27 = vpop.f32.mrb[12].mxu0 }
 0x12d   :  { %v1115_v28 = vpop.f32.mrb[13].mxu0 }
 0x12e   :  { %v5169_v30 = vpop.f32.mrb[14].mxu0  ;;  %v4631_v28 = vld [vmem:[%s6444_s0 + $0x284] ss:$8 sps:$4 sm:$0xff]  }
 0x12f   :  { %v1118_v32 = vpop.f32.mrb[15].mxu0 }
 0x131   :  { %1328 = vmatmul.mubr.bf16.gmra.mrb[120].mxu0 %v4603_v29 }
 0x132   :  { %3827 = vmatprep.mubr.msk.bf16.mxu0 %vm858_vm0, %v4604_v31 }
 0x134   :  { %v5175_v33 = vpop.f32.mrb[16].mxu0 }
 0x135   :  { %v1123_v34 = vpop.f32.mrb[17].mxu0 }
 0x136   :  { %v5180_v36 = vpop.f32.mrb[18].mxu0  ;;  %v4633_v34 = vld [vmem:[%s6444_s0 + $0x280] ss:$8 sps:$4 sm:$0xff]  }
 0x137   :  { %v1126_v38 = vpop.f32.mrb[19].mxu0 }
 0x139   :  { %1336 = vmatmul.mubr.bf16.gmra.mrb[124].mxu0 %v4606_v35 }
 0x13a   :  { %3828 = vmatprep.mubr.msk.bf16.mxu0 %vm858_vm0, %v4607_v37  ;;  %v4634_v37 = vld [vmem:[%s6444_s0 + $0x294] ss:$8 sps:$4 sm:$0xff]  }
 0x13c   :  { %v5186_v39 = vpop.f32.mrb[20].mxu0 }
 0x13d   :  { %v1131_v40 = vpop.f32.mrb[21].mxu0 }
 0x13e   :  { %v5191_v42 = vpop.f32.mrb[22].mxu0 }
 0x13f   :  { %v1134_v44 = vpop.f32.mrb[23].mxu0 }
 0x141   :  { %1344 = vmatmul.mubr.bf16.gmra.mrb[128].mxu0 %v4609_v41 }
 0x142   :  { %3829 = vmatprep.mubr.msk.bf16.mxu0 %vm858_vm0, %v4610_v43  ;;  %v4636_v43 = vld [vmem:[%s6444_s0 + $0x290] ss:$8 sps:$4 sm:$0xff]  }
 0x144   :  { %v5197_v45 = vpop.f32.mrb[24].mxu0 }
 0x145   :  { %v1139_v46 = vpop.f32.mrb[25].mxu0 }
 0x146   :  { %v5202_v48 = vpop.f32.mrb[26].mxu0  ;;  %v4637_v46 = vld [vmem:[%s6444_s0 + $0x2a4] ss:$8 sps:$4 sm:$0xff]  }
 0x147   :  { %v1142_v50 = vpop.f32.mrb[27].mxu0 }
 0x149   :  { %1352 = vmatmul.mubr.bf16.gmra.mrb[132].mxu0 %v4612_v47 }
 0x14a   :  { %3830 = vmatprep.mubr.msk.bf16.mxu0 %vm858_vm0, %v4613_v49 }
 0x14c   :  { %v5208_v51 = vpop.f32.mrb[28].mxu0 }
 0x14d   :  { %v1147_v52 = vpop.f32.mrb[29].mxu0 }
 0x14e   :  { %v5213_v54 = vpop.f32.mrb[30].mxu0  ;;  %v4639_v52 = vld [vmem:[%s6444_s0 + $0x2a0] ss:$8 sps:$4 sm:$0xff]  }
 0x14f   :  { %v1150_v56 = vpop.f32.mrb[31].mxu0 }
 0x151   :  { %1360 = vmatmul.mubr.bf16.gmra.mrb[136].mxu0 %v4615_v53 }
 0x152   :  { %3831 = vmatprep.mubr.msk.bf16.mxu0 %vm858_vm0, %v4616_v55  ;;  %v4640_v55 = vld [vmem:[%s6444_s0 + $0x2b4] ss:$8 sps:$4 sm:$0xff]  }
 0x154   :  { %v5219_v57 = vpop.f32.mrb[32].mxu0 }
 0x155   :  { %v1155_v58 = vpop.f32.mrb[33].mxu0 }
 0x156   :  { %v5224_v60 = vpop.f32.mrb[34].mxu0 }
 0x157   :  { %v1158_v62 = vpop.f32.mrb[35].mxu0 }
 0x158   :  { %v4642_v62 = vld [vmem:[%s6444_s0 + $0x2b0] ss:$8 sps:$4 sm:$0xff]  }
 0x159   :  { %1368 = vmatmul.mubr.bf16.gmra.mrb[140].mxu0 %v4618_v59  ;;  %v4678_v59 = vld [vmem:[%s6444_s0 + $0x370] ss:$8 sps:$4 sm:$0xff]  }
 0x15a   :  { %3832 = vmatprep.mubr.msk.bf16.mxu0 %vm858_vm0, %v4619_v61 }
 0x15c   :  { %v5230_v63 = vpop.f32.mrb[36].mxu0 }
 0x15d   :  { %v1163_v0 = vpop.f32.mrb[37].mxu0 }
 0x15e   :  { %v5235_v2 = vpop.f32.mrb[38].mxu0 }
 0x15f   :  { %v1166_v4 = vpop.f32.mrb[39].mxu0 }
 0x161   :  { %1376 = vmatmul.mubr.bf16.gmra.mrb[144].mxu0 %v4621_v1  ;;  %v4643_v1 = vld [vmem:[%s6444_s0 + $0x2c4] ss:$8 sps:$4 sm:$0xff]  }
 0x162   :  { %3833 = vmatprep.mubr.msk.bf16.mxu0 %vm858_vm0, %v4622_v3 }
 0x164   :  { %v5241_v5 = vpop.f32.mrb[40].mxu0 }
 0x165   :  { %v1171_v6 = vpop.f32.mrb[41].mxu0 }
 0x166   :  { %v5246_v8 = vpop.f32.mrb[42].mxu0 }
 0x167   :  { %v1174_v11 = vpop.f32.mrb[43].mxu0 }
 0x168   :  { %v4645_v11 = vld [vmem:[%s6444_s0 + $0x2c0] ss:$8 sps:$4 sm:$0xff]  }
 0x169   :  { %1384 = vmatmul.mubr.bf16.gmra.mrb[148].mxu0 %v4624_v7  ;;  %v4675_v7 = vld [vmem:[%s6444_s0 + $0x360] ss:$8 sps:$4 sm:$0xff]  }
 0x16a   :  { %3834 = vmatprep.mubr.msk.bf16.mxu0 %vm858_vm0, %v4625_v10 }
 0x16c   :  { %v5252_v13 = vpop.f32.mrb[44].mxu0 }
 0x16d   :  { %v1179_v14 = vpop.f32.mrb[45].mxu0 }
 0x16e   :  { %v5257_v17 = vpop.f32.mrb[46].mxu0 }
 0x16f   :  { %v1182_v20 = vpop.f32.mrb[47].mxu0 }
 0x171   :  { %1392 = vmatmul.mubr.bf16.gmra.mrb[152].mxu0 %v4627_v16  ;;  %v4646_v16 = vld [vmem:[%s6444_s0 + $0x2d4] ss:$8 sps:$4 sm:$0xff]  }
 0x172   :  { %3835 = vmatprep.mubr.msk.bf16.mxu0 %vm858_vm0, %v4628_v19 }
 0x174   :  { %v5263_v22 = vpop.f32.mrb[48].mxu0 }
 0x175   :  { %6462 = vst [vmem:[#allocation2_spill] sm:$0xff] %v5263_v22  ;;  %v1187_v23 = vpop.f32.mrb[49].mxu0 }
 0x176   :  { %v5268_v26 = vpop.f32.mrb[50].mxu0 }
 0x177   :  { %v1190_v29 = vpop.f32.mrb[51].mxu0 }
 0x178   :  { %v4648_v29 = vld [vmem:[%s6444_s0 + $0x2d0] ss:$8 sps:$4 sm:$0xff]  }
 0x179   :  { %1400 = vmatmul.mubr.bf16.gmra.mrb[156].mxu0 %v4630_v25  ;;  %v4672_v25 = vld [vmem:[%s6444_s0 + $0x350] ss:$8 sps:$4 sm:$0xff]  }
 0x17a   :  { %3836 = vmatprep.mubr.msk.bf16.mxu0 %vm858_vm0, %v4631_v28 }
 0x17c   :  { %v5274_v31 = vpop.f32.mrb[52].mxu0 }
 0x17d   :  { %v1195_v32 = vpop.f32.mrb[53].mxu0 }
 0x17e   :  { %v5279_v35 = vpop.f32.mrb[54].mxu0 }
 0x17f   :  { %6463 = vst [vmem:[#allocation3_spill] sm:$0xff] %v5279_v35  ;;  %v1198_v38 = vpop.f32.mrb[55].mxu0 }
 0x181   :  { %1408 = vmatmul.mubr.bf16.gmra.mrb[160].mxu0 %v4633_v34  ;;  %v4649_v34 = vld [vmem:[%s6444_s0 + $0x2e4] ss:$8 sps:$4 sm:$0xff]  }
 0x182   :  { %3837 = vmatprep.mubr.msk.bf16.mxu0 %vm858_vm0, %v4634_v37 }
 0x184   :  { %v5285_v40 = vpop.f32.mrb[56].mxu0 }
 0x185   :  { %v1203_v41 = vpop.f32.mrb[57].mxu0 }
 0x186   :  { %v5290_v44 = vpop.f32.mrb[58].mxu0 }
 0x187   :  { %6464 = vst [vmem:[#allocation4_spill] sm:$0xff] %v5290_v44  ;;  %v1206_v47 = vpop.f32.mrb[59].mxu0 }
 0x188   :  { %v4651_v47 = vld [vmem:[%s6444_s0 + $0x2e0] ss:$8 sps:$4 sm:$0xff]  }
 0x189   :  { %1416 = vmatmul.mubr.bf16.gmra.mrb[164].mxu0 %v4636_v43  ;;  %v4669_v43 = vld [vmem:[%s6444_s0 + $0x340] ss:$8 sps:$4 sm:$0xff]  }
 0x18a   :  { %3838 = vmatprep.mubr.msk.bf16.mxu0 %vm858_vm0, %v4637_v46 }
 0x18c   :  { %v5296_v49 = vpop.f32.mrb[60].mxu0 }
 0x18d   :  { %v1211_v50 = vpop.f32.mrb[61].mxu0 }
 0x18e   :  { %v5301_v53 = vpop.f32.mrb[62].mxu0 }
 0x18f   :  { %6465 = vst [vmem:[#allocation5_spill] sm:$0xff] %v5301_v53  ;;  %v1214_v56 = vpop.f32.mrb[63].mxu0 }
 0x191   :  { %1424 = vmatmul.mubr.bf16.gmra.mrb[168].mxu0 %v4639_v52  ;;  %v4652_v52 = vld [vmem:[%s6444_s0 + $0x2f4] ss:$8 sps:$4 sm:$0xff]  }
 0x192   :  { %3839 = vmatprep.mubr.msk.bf16.mxu0 %vm858_vm0, %v4640_v55 }
 0x194   :  { %v5307_v58 = vpop.f32.mrb[64].mxu0 }
 0x195   :  { %v1219_v61 = vpop.f32.mrb[65].mxu0 }
 0x196   :  { %v5314_v0 = vpop.f32.mrb[66].mxu0 }
 0x197   :  { %v1222_v4 = vpop.f32.mrb[67].mxu0 }
 0x198   :  { %v4654_v4 = vld [vmem:[%s6444_s0 + $0x2f0] ss:$8 sps:$4 sm:$0xff]  }
 0x199   :  { %1432 = vmatmul.mubr.bf16.gmra.mrb[172].mxu0 %v4642_v62  ;;  %v4666_v62 = vld [vmem:[%s6444_s0 + $0x330] ss:$8 sps:$4 sm:$0xff]  }
 0x19a   :  { %3840 = vmatprep.mubr.msk.bf16.mxu0 %vm858_vm0, %v4643_v1 }
 0x19c   :  { %v5322_v6 = vpop.f32.mrb[68].mxu0 }
 0x19d   :  { %v1227_v10 = vpop.f32.mrb[69].mxu0 }
 0x19e   :  { %v5329_v14 = vpop.f32.mrb[70].mxu0 }
 0x19f   :  { %v1230_v20 = vpop.f32.mrb[71].mxu0 }
 0x1a1   :  { %1440 = vmatmul.mubr.bf16.gmra.mrb[176].mxu0 %v4645_v11  ;;  %v4655_v11 = vld [vmem:[%s6444_s0 + $0x304] ss:$8 sps:$4 sm:$0xff]  }
 0x1a2   :  { %3841 = vmatprep.mubr.msk.bf16.mxu0 %vm858_vm0, %v4646_v16 }
 0x1a4   :  { %v5337_v23 = vpop.f32.mrb[72].mxu0 }
 0x1a5   :  { %v1235_v28 = vpop.f32.mrb[73].mxu0 }
 0x1a6   :  { %v5344_v32 = vpop.f32.mrb[74].mxu0 }
 0x1a7   :  { %v1238_v38 = vpop.f32.mrb[75].mxu0 }
 0x1a8   :  { %v4657_v38 = vld [vmem:[%s6444_s0 + $0x300] ss:$8 sps:$4 sm:$0xff]  }
 0x1a9   :  { %1448 = vmatmul.mubr.bf16.gmra.mrb[180].mxu0 %v4648_v29  ;;  %v4663_v29 = vld [vmem:[%s6444_s0 + $0x320] ss:$8 sps:$4 sm:$0xff]  }
 0x1aa   :  { %3842 = vmatprep.mubr.msk.bf16.mxu0 %vm858_vm0, %v4649_v34 }
 0x1ac   :  { %v5352_v41 = vpop.f32.mrb[76].mxu0 }
 0x1ad   :  { %v1243_v46 = vpop.f32.mrb[77].mxu0 }
 0x1ae   :  { %v5359_v50 = vpop.f32.mrb[78].mxu0 }
 0x1af   :  { %v1246_v56 = vpop.f32.mrb[79].mxu0 }
 0x1b1   :  { %1456 = vmatmul.mubr.bf16.gmra.mrb[184].mxu0 %v4651_v47  ;;  %v4658_v47 = vld [vmem:[%s6444_s0 + $0x314] ss:$8 sps:$4 sm:$0xff]  }
 0x1b2   :  { %3843 = vmatprep.mubr.msk.bf16.mxu0 %vm858_vm0, %v4652_v52  ;;  %v4661_v52 = vld [vmem:[%s6444_s0 + $0x324] ss:$8 sps:$4 sm:$0xff]  }
 0x1b4   :  { %v5367_v61 = vpop.f32.mrb[80].mxu0 }
 0x1b5   :  { %v1251_v1 = vpop.f32.mrb[81].mxu0 }
 0x1b6   :  { %v5374_v10 = vpop.f32.mrb[82].mxu0 }
 0x1b7   :  { %v1254_v20 = vpop.f32.mrb[83].mxu0 }
 0x1b8   :  { %v4660_v20 = vld [vmem:[%s6444_s0 + $0x310] ss:$8 sps:$4 sm:$0xff]  }
 0x1b9   :  { %1464 = vmatmul.mubr.bf16.gmra.mrb[188].mxu0 %v4654_v4 }
 0x1ba   :  { %3844 = vmatprep.mubr.msk.bf16.mxu0 %vm858_vm0, %v4655_v11 }
 0x1bc   :  { %v5382_v28 = vpop.f32.mrb[84].mxu0 }
 0x1bd   :  { %v1259_v34 = vpop.f32.mrb[85].mxu0 }
 0x1be   :  { %v5389_v46 = vpop.f32.mrb[86].mxu0 }
 0x1bf   :  { %v1262_v56 = vpop.f32.mrb[87].mxu0 }
 0x1c1   :  { %1472 = vmatmul.mubr.bf16.gmra.mrb[192].mxu0 %v4657_v38  ;;  %v4664_v38 = vld [vmem:[%s6444_s0 + $0x334] ss:$8 sps:$4 sm:$0xff]  }
 0x1c2   :  { %3845 = vmatprep.mubr.msk.bf16.mxu0 %vm858_vm0, %v4658_v47 }
 0x1c4   :  { %v5397_v1 = vpop.f32.mrb[88].mxu0 }
 0x1c5   :  { %v1267_v11 = vpop.f32.mrb[89].mxu0 }
 0x1c6   :  { %v5404_v34 = vpop.f32.mrb[90].mxu0 }
 0x1c7   :  { %v1270_v47 = vpop.f32.mrb[91].mxu0 }
 0x1c9   :  { %1480 = vmatmul.mubr.bf16.gmra.mrb[196].mxu0 %v4660_v20  ;;  %v4667_v20 = vld [vmem:[%s6444_s0 + $0x344] ss:$8 sps:$4 sm:$0xff]  }
 0x1ca   :  { %3846 = vmatprep.mubr.msk.bf16.mxu0 %vm858_vm0, %v4661_v52 }
 0x1cc   :  { %v5412_v56 = vpop.f32.mrb[92].mxu0 }
 0x1cd   :  { %v1275_v4 = vpop.f32.mrb[93].mxu0 }
 0x1ce   :  { %v5419_v16 = vpop.f32.mrb[94].mxu0 }
 0x1cf   :  { %v1278_v52 = vpop.f32.mrb[95].mxu0 }
 0x1d1   :  { %1488 = vmatmul.mubr.bf16.gmra.mrb[200].mxu0 %v4663_v29  ;;  %v4670_v29 = vld [vmem:[%s6444_s0 + $0x354] ss:$8 sps:$4 sm:$0xff]  }
 0x1d2   :  { %3847 = vmatprep.mubr.msk.bf16.mxu0 %vm858_vm0, %v4664_v38 }
 0x1d4   :  { %v5427_v47 = vpop.f32.mrb[96].mxu0 }
 0x1d5   :  { %v1283_v11 = vpop.f32.mrb[97].mxu0 }
 0x1d6   :  { %v5434_v55 = vpop.f32.mrb[98].mxu0 }
 0x1d7   :  { %v1286_v38 = vpop.f32.mrb[99].mxu0 }
 0x1d9   :  { %1496 = vmatmul.mubr.bf16.gmra.mrb[204].mxu0 %v4666_v62  ;;  %v4673_v62 = vld [vmem:[%s6444_s0 + $0x364] ss:$8 sps:$4 sm:$0xff]  }
 0x1da   :  { %3848 = vmatprep.mubr.msk.bf16.mxu0 %vm858_vm0, %v4667_v20 }
 0x1dc   :  { %v5442_v52 = vpop.f32.mrb[100].mxu0 }
 0x1dd   :  { %v1291_v4 = vpop.f32.mrb[101].mxu0 }
 0x1de   :  { %v5449_v37 = vpop.f32.mrb[102].mxu0 }
 0x1df   :  { %v1294_v20 = vpop.f32.mrb[103].mxu0 }
 0x1e1   :  { %1504 = vmatmul.mubr.bf16.gmra.mrb[208].mxu0 %v4669_v43  ;;  %v4676_v43 = vld [vmem:[%s6444_s0 + $0x374] ss:$8 sps:$4 sm:$0xff]  }
 0x1e2   :  { %3849 = vmatprep.mubr.msk.bf16.mxu0 %vm858_vm0, %v4670_v29 }
 0x1e4   :  { %v5457_v38 = vpop.f32.mrb[104].mxu0 }
 0x1e5   :  { %v1299_v11 = vpop.f32.mrb[105].mxu0 }
 0x1e6   :  { %v5464_v19 = vpop.f32.mrb[106].mxu0 }
 0x1e7   :  { %v1302_v29 = vpop.f32.mrb[107].mxu0 }
 0x1e9   :  { %1512 = vmatmul.mubr.bf16.gmra.mrb[212].mxu0 %v4672_v25  ;;  %v4679_v25 = vld [vmem:[%s6444_s0 + $0x384] ss:$8 sps:$4 sm:$0xff]  }
 0x1ea   :  { %3850 = vmatprep.mubr.msk.bf16.mxu0 %vm858_vm0, %v4673_v62 }
 0x1ec   :  { %v5472_v20 = vpop.f32.mrb[108].mxu0 }
 0x1ed   :  { %6466 = vst [vmem:[#allocation6_spill] sm:$0xff] %v5472_v20  ;;  %v1307_v4 = vpop.f32.mrb[109].mxu0 }
 0x1ee   :  { %v5479_v3 = vpop.f32.mrb[110].mxu0  ;;  %v4682_v4 = vld [vmem:[%s6444_s0 + $0x394] ss:$8 sps:$4 sm:$0xff]  }
 0x1ef   :  { %6467 = vst [vmem:[#allocation7_spill] sm:$0xff] %v5479_v3  ;;  %v1310_v62 = vpop.f32.mrb[111].mxu0 }
 0x1f1   :  { %1520 = vmatmul.mubr.bf16.gmra.mrb[216].mxu0 %v4675_v7 }
 0x1f2   :  { %3851 = vmatprep.mubr.msk.bf16.mxu0 %vm858_vm0, %v4676_v43 }
 0x1f4   :  { %v5487_v29 = vpop.f32.mrb[112].mxu0 }
 0x1f5   :  { %6468 = vst [vmem:[#allocation8_spill] sm:$0xff] %v5487_v29  ;;  %v1315_v11 = vpop.f32.mrb[113].mxu0 }
 0x1f6   :  { %v5494_v20 = vpop.f32.mrb[114].mxu0  ;;  %v4681_v11 = vld [vmem:[%s6444_s0 + $0x380] ss:$8 sps:$4 sm:$0xff]  }
 0x1f7   :  { %6469 = vst [vmem:[#allocation9_spill] sm:$0xff] %v5494_v20  ;;  %v1318_v43 = vpop.f32.mrb[115].mxu0  ;;  %v4704_v20 = vld [vmem:[%s6445_s3 + $0x8] sm:$0xff]  }
 0x1f8   :  { %v4848_v43 = vmov 0.0  }
 0x1f9   :  { %1528 = vmatmul.mubr.bf16.gmra.mrb[220].mxu0 %v4678_v59  ;;  %4152 = vmatprep.subr.bf16.mxu1 %v4848_v43  ;;  %v4703_v59 = vld [vmem:[%s6445_s3] sm:$0xff]  }
 0x1fa   :  { %3852 = vmatprep.mubr.msk.bf16.mxu0 %vm858_vm0, %v4679_v25  ;;  %4153 = vmatpush3.bf16.msra.mxu1 %v4703_v59 }
 0x1fb   :  { %4154 = vmatprep.subr.bf16.mxu1 %v4848_v43  ;;  %4168 = vmatprep.mubr.msk.bf16.mxu1 %vm4849_vm2, %v4848_v43 }
 0x1fc   :  { %v5502_v62 = vpop.f32.mrb[116].mxu0 }
 0x1fd   :  { %v1323_v22 = vpop.f32.mrb[117].mxu0 }
 0x1fe   :  { %v5512_v3 = vpop.f32.mrb[118].mxu0  ;;  %v4684_v22 = vld [vmem:[%s6444_s0 + $0x390] ss:$8 sps:$4 sm:$0xff]   ;;  %4155 = vmatpush3.bf16.msra.mxu1 %v4704_v20 }
 0x1ff   :  { %6470 = vst [vmem:[#allocation10_spill] sm:$0xff] %v5512_v3  ;;  %v1326_v7 = vpop.f32.mrb[119].mxu0  ;;  %4156 = vmatprep.subr.bf16.mxu1 %v4848_v43  ;;  %v4706_v20 = vld [vmem:[%s6445_s3 + $0x18] sm:$0xff]  }
 0x200   :  { %v4685_v7 = vld [vmem:[%s6444_s0 + $0x3a4] ss:$8 sps:$4 sm:$0xff]  }
 0x201   :  { %1536 = vmatmul.mubr.bf16.gmra.mrb[224].mxu0 %v4681_v11 }
 0x202   :  { %3853 = vmatprep.mubr.msk.bf16.mxu0 %vm858_vm0, %v4682_v4  ;;  %v4705_v4 = vld [vmem:[%s6445_s3 + $0x10] sm:$0xff]  }
 0x203   :  { %4157 = vmatpush3.bf16.msra.mxu1 %v4705_v4 }
 0x204   :  { %v5528_v29 = vpop.f32.mrb[120].mxu0  ;;  %4158 = vmatprep.subr.bf16.mxu1 %v4848_v43 }
 0x205   :  { %v1331_v59 = vpop.f32.mrb[121].mxu0 }
 0x206   :  { %v5539_v11 = vpop.f32.mrb[122].mxu0  ;;  %v4687_v59 = vld [vmem:[%s6444_s0 + $0x3a0] ss:$8 sps:$4 sm:$0xff]  }
 0x207   :  { %6471 = vst [vmem:[#allocation11_spill] sm:$0xff] %v5539_v11  ;;  %v1334_v35 = vpop.f32.mrb[123].mxu0  ;;  %4159 = vmatpush3.bf16.msra.mxu1 %v4706_v20  ;;  %v4708_v20 = vld [vmem:[%s6445_s3 + $0x28] sm:$0xff]   ;;  %v6473_v11 = vmax.f32 %v5131_v9, %v5307_v58  ;;  %v4710_v58 = vld [vmem:[%s6445_s3 + $0x38] sm:$0xff]  }
 0x208   :  { %v4688_v35 = vld [vmem:[%s6444_s0 + $0x3b4] ss:$8 sps:$4 sm:$0xff]   ;;  %4160 = vmatprep.subr.bf16.mxu1 %v4848_v43 }
 0x209   :  { %1544 = vmatmul.mubr.bf16.gmra.mrb[228].mxu0 %v4684_v22  ;;  %v4707_v22 = vld [vmem:[%s6445_s3 + $0x20] sm:$0xff]  }
 0x20a   :  { %3854 = vmatprep.mubr.msk.bf16.mxu0 %vm858_vm0, %v4685_v7 }
 0x20b   :  { %4161 = vmatpush3.bf16.msra.mxu1 %v4707_v22 }
 0x20c   :  { %v5551_v25 = vpop.f32.mrb[124].mxu0  ;;  %4162 = vmatprep.subr.bf16.mxu1 %v4848_v43 }
 0x20d   :  { %v1339_v4 = vpop.f32.mrb[125].mxu0 }
 0x20e   :  { %v5562_v7 = vpop.f32.mrb[126].mxu0  ;;  %v4690_v4 = vld [vmem:[%s6444_s0 + $0x3b0] ss:$8 sps:$4 sm:$0xff]  }
 0x20f   :  { %6472 = vst [vmem:[#allocation12_spill] sm:$0xff] %v5562_v7  ;;  %v1342_v44 = vpop.f32.mrb[127].mxu0  ;;  %4163 = vmatpush3.bf16.msra.mxu1 %v4708_v20  ;;  %v6474_v20 = vmax.f32 %v5136_v12, %v5314_v0  ;;  %v6475_v12 = vmax.f32 %v5142_v15, %v5322_v6  ;;  %v4696_v6 = vld [vmem:[%s6444_s0 + $0x3d0] ss:$8 sps:$4 sm:$0xff]  }
 0x210   :  { %4164 = vmatprep.subr.bf16.mxu1 %v4848_v43 }
 0x211   :  { %1552 = vmatmul.mubr.bf16.gmra.mrb[232].mxu0 %v4687_v59  ;;  %v4691_v59 = vld [vmem:[%s6444_s0 + $0x3c4] ss:$8 sps:$4 sm:$0xff]  }
 0x212   :  { %3855 = vmatprep.mubr.msk.bf16.mxu0 %vm858_vm0, %v4688_v35  ;;  %v4709_v35 = vld [vmem:[%s6445_s3 + $0x30] sm:$0xff]  }
 0x213   :  { %4165 = vmatpush3.bf16.msra.mxu1 %v4709_v35 }
 0x214   :  { %v1345_v3 = vpop.f32.mrb[128].mxu0  ;;  %4166 = vmatprep.subr.bf16.mxu1 %v4848_v43 }
 0x215   :  { %v5577_v44 = vmax.f32 %v6473_v11, %v1345_v3  ;;  %v1347_v7 = vpop.f32.mrb[129].mxu0  ;;  %v4693_v3 = vld [vmem:[%s6444_s0 + $0x3c0] ss:$8 sps:$4 sm:$0xff]  }
 0x216   :  { %v1348_v22 = vpop.f32.mrb[130].mxu0 }
 0x217   :  { %v5589_v53 = vmax.f32 %v6474_v20, %v1348_v22  ;;  %v1350_v9 = vpop.f32.mrb[131].mxu0  ;;  %4167 = vmatpush3.bf16.msra.mxu1 %v4710_v58  ;;  %v6477_v58 = vmax.f32 %v5153_v21, %v5337_v23  ;;  %v4700_v21 = vld [vmem:[%s6444_s0 + $0x3f4] ss:$8 sps:$4 sm:$0xff]   ;;  %v6479_v23 = vmax.f32 %v5164_v27, %v5352_v41  ;;  %v6481_v27 = vmax.f32 %v5175_v33, %v5367_v61 }
 0x218   :  { %4172 = vmatprep.subr.bf16.mxu1 %v4848_v43  ;;  %v4697_v9 = vld [vmem:[%s6444_s0 + $0x3e4] ss:$8 sps:$4 sm:$0xff]   ;;  %v6484_v33 = vmax.f32 %v5191_v42, %v5389_v46  ;;  %v6487_v42 = vmax.f32 %v5208_v51, %v5412_v56  ;;  %v6490_v51 = vmax.f32 %v5224_v60, %v5434_v55  ;;  %v6493_v60 = vmax.f32 %v5241_v5, %v5457_v38 }
 0x219   :  { %1560 = vmatmul.mubr.bf16.gmra.mrb[236].mxu0 %v4690_v4  ;;  %v4694_v4 = vld [vmem:[%s6444_s0 + $0x3d4] ss:$8 sps:$4 sm:$0xff]   ;;  %v6497_v5 = vld [vmem:[#allocation7_spill] sm:$0xff] }
 0x21a   :  { %3856 = vmatprep.mubr.msk.bf16.mxu0 %vm858_vm0, %v4691_v59  ;;  %v6476_v59 = vmax.f32 %v5147_v18, %v5329_v14  ;;  %v6498_v38 = vmax.f32 %v5257_v17, %v6497_v5  ;;  %v6504_v17 = vmax.f32 %v5274_v31, %v5502_v62  ;;  %v6510_v31 = vld [vmem:[#allocation11_spill] sm:$0xff]  ;;  %v6512_v5 = vmax.f32 %v5296_v49, %v5551_v25 }
 0x21c   :  { %v1353_v11 = vpop.f32.mrb[132].mxu0 }
 0x21d   :  { %v5602_v0 = vmax.f32 %v6475_v12, %v1353_v11  ;;  %v1355_v7 = vpop.f32.mrb[133].mxu0 }
 0x21e   :  { %v1356_v35 = vpop.f32.mrb[134].mxu0 }
 0x21f   :  { %v5613_v22 = vmax.f32 %v6476_v59, %v1356_v35  ;;  %v1358_v15 = vpop.f32.mrb[135].mxu0 }
 0x220   :  { %v6480_v15 = vmax.f32 %v5169_v30, %v5359_v50  ;;  %v6482_v30 = vmax.f32 %v5180_v36, %v5374_v10  ;;  %v6485_v36 = vmax.f32 %v5197_v45, %v5397_v1  ;;  %v6488_v45 = vmax.f32 %v5213_v54, %v5419_v16 }
 0x221   :  { %1568 = vmatmul.mubr.bf16.gmra.mrb[240].mxu0 %v4693_v3  ;;  %v6478_v3 = vmax.f32 %v5158_v24, %v5344_v32  ;;  %v6491_v54 = vmax.f32 %v5230_v63, %v5442_v52  ;;  %v6494_v63 = vmax.f32 %v5246_v8, %v5464_v19  ;;  %v6500_v8 = vld [vmem:[#allocation8_spill] sm:$0xff] }
 0x222   :  { %3857 = vmatprep.mubr.msk.bf16.mxu0 %vm858_vm0, %v4694_v4  ;;  %v4699_v4 = vld [vmem:[%s6444_s0 + $0x3e0] ss:$8 sps:$4 sm:$0xff]  }
 0x224   :  { %v1361_v20 = vpop.f32.mrb[136].mxu0 }
 0x225   :  { %v5625_v11 = vmax.f32 %v6477_v58, %v1361_v20  ;;  %v1363_v18 = vpop.f32.mrb[137].mxu0 }
 0x226   :  { %v1364_v14 = vpop.f32.mrb[138].mxu0 }
 0x227   :  { %v5630_v12 = vmax.f32 %v6478_v3, %v1364_v14  ;;  %v1366_v7 = vpop.f32.mrb[139].mxu0 }
 0x229   :  { %1576 = vmatmul.mubr.bf16.gmra.mrb[244].mxu0 %v4696_v6 }
 0x22a   :  { %3858 = vmatprep.mubr.msk.bf16.mxu0 %vm858_vm0, %v4697_v9  ;;  %v4702_v9 = vld [vmem:[%s6444_s0 + $0x3f0] ss:$8 sps:$4 sm:$0xff]  }
 0x22c   :  { %v1369_v35 = vpop.f32.mrb[140].mxu0 }
 0x22d   :  { %v5642_v59 = vmax.f32 %v6479_v23, %v1369_v35  ;;  %v1371_v24 = vpop.f32.mrb[141].mxu0 }
 0x22e   :  { %v1372_v32 = vpop.f32.mrb[142].mxu0 }
 0x22f   :  { %v5647_v6 = vmax.f32 %v6480_v15, %v1372_v32  ;;  %v1374_v20 = vpop.f32.mrb[143].mxu0 }
 0x231   :  { %1584 = vmatmul.mubr.bf16.gmra.mrb[248].mxu0 %v4699_v4  ;;  %v6483_v4 = vmax.f32 %v5186_v39, %v5382_v28  ;;  %v6486_v39 = vmax.f32 %v5202_v48, %v5404_v34  ;;  %v6489_v48 = vmax.f32 %v5219_v57, %v5427_v47  ;;  %v6492_v57 = vmax.f32 %v5235_v2, %v5449_v37  ;;  %v6495_v2 = vld [vmem:[#allocation6_spill] sm:$0xff] }
 0x232   :  { %3859 = vmatprep.mubr.msk.bf16.mxu0 %vm858_vm0, %v4700_v21  ;;  %v6496_v37 = vmax.f32 %v5252_v13, %v6495_v2  ;;  %v6502_v13 = vld [vmem:[#allocation9_spill] sm:$0xff]  ;;  %v6509_v2 = vld [vmem:[#allocation4_spill] sm:$0xff] }
 0x233   :  { %v6511_v62 = vmax.f32 %v6509_v2, %v6510_v31 }
 0x234   :  { %v1377_v58 = vpop.f32.mrb[144].mxu0 }
 0x235   :  { %v5656_v41 = vmax.f32 %v6481_v27, %v1377_v58  ;;  %v1379_v18 = vpop.f32.mrb[145].mxu0 }
 0x236   :  { %v1380_v14 = vpop.f32.mrb[146].mxu0 }
 0x237   :  { %v5661_v50 = vmax.f32 %v6482_v30, %v1380_v14  ;;  %v1382_v3 = vpop.f32.mrb[147].mxu0 }
 0x239   :  { %1592 = vmatmul.mubr.bf16.gmra.mrb[252].mxu0 %v4702_v9 }
 0x23c   :  { %v1385_v7 = vpop.f32.mrb[148].mxu0 }
 0x23d   :  { %v5666_v35 = vmax.f32 %v6483_v4, %v1385_v7  ;;  %v1387_v21 = vpop.f32.mrb[149].mxu0 }
 0x23e   :  { %v1388_v23 = vpop.f32.mrb[150].mxu0 }
 0x23f   :  { %v5671_v61 = vmax.f32 %v6484_v33, %v1388_v23  ;;  %v1390_v24 = vpop.f32.mrb[151].mxu0 }
 0x244   :  { %v1393_v32 = vpop.f32.mrb[152].mxu0 }
 0x245   :  { %v5676_v10 = vmax.f32 %v6485_v36, %v1393_v32  ;;  %v1395_v15 = vpop.f32.mrb[153].mxu0 }
 0x246   :  { %v1396_v20 = vpop.f32.mrb[154].mxu0 }
 0x247   :  { %v5681_v28 = vmax.f32 %v6486_v39, %v1396_v20  ;;  %v1398_v9 = vpop.f32.mrb[155].mxu0 }
 0x24c   :  { %v1401_v58 = vpop.f32.mrb[156].mxu0 }
 0x24d   :  { %v5686_v46 = vmax.f32 %v6487_v42, %v1401_v58  ;;  %v1403_v27 = vpop.f32.mrb[157].mxu0 }
 0x24e   :  { %v1404_v18 = vpop.f32.mrb[158].mxu0 }
 0x24f   :  { %v5691_v1 = vmax.f32 %v6488_v45, %v1404_v18  ;;  %v1406_v14 = vpop.f32.mrb[159].mxu0 }
 0x250   :  { %v6499_v14 = vld [vmem:[#allocation2_spill] sm:$0xff] }
 0x251   :  { %v6501_v19 = vmax.f32 %v6499_v14, %v6500_v8  ;;  %v6513_v14 = vld [vmem:[#allocation5_spill] sm:$0xff] }
 0x254   :  { %v1409_v30 = vpop.f32.mrb[160].mxu0 }
 0x255   :  { %v5696_v34 = vmax.f32 %v6489_v48, %v1409_v30  ;;  %v1411_v3 = vpop.f32.mrb[161].mxu0 }
 0x256   :  { %v1412_v7 = vpop.f32.mrb[162].mxu0 }
 0x257   :  { %v5701_v56 = vmax.f32 %v6490_v51, %v1412_v7  ;;  %v1414_v4 = vpop.f32.mrb[163].mxu0  ;;  %v6503_v7 = vmax.f32 %v5268_v26, %v6502_v13  ;;  %v6508_v26 = vmax.f32 %v5285_v40, %v5528_v29  ;;  %v6514_v40 = vld [vmem:[#allocation12_spill] sm:$0xff] }
 0x258   :  { %v6515_v29 = vmax.f32 %v6513_v14, %v6514_v40 }
 0x25c   :  { %v1417_v21 = vpop.f32.mrb[164].mxu0 }
 0x25d   :  { %v5706_v16 = vmax.f32 %v6491_v54, %v1417_v21  ;;  %v1419_v23 = vpop.f32.mrb[165].mxu0 }
 0x25e   :  { %v1420_v33 = vpop.f32.mrb[166].mxu0 }
 0x25f   :  { %v5711_v47 = vmax.f32 %v6492_v57, %v1420_v33  ;;  %v1422_v24 = vpop.f32.mrb[167].mxu0  ;;  %v6505_v57 = vld [vmem:[#allocation3_spill] sm:$0xff] }
 0x260   :  { %v6506_v24 = vld [vmem:[#allocation10_spill] sm:$0xff] }
 0x264   :  { %v1425_v32 = vpop.f32.mrb[168].mxu0 }
 0x265   :  { %v5716_v55 = vmax.f32 %v6493_v60, %v1425_v32  ;;  %v1427_v36 = vpop.f32.mrb[169].mxu0  ;;  %v6507_v32 = vmax.f32 %v6505_v57, %v6506_v24  ;;  %v4711_v24 = vld [vmem:[%s6445_s3 + $0x40] sm:$0xff]  }
 0x266   :  { %v1428_v15 = vpop.f32.mrb[170].mxu0 }
 0x267   :  { %v5721_v52 = vmax.f32 %v6494_v63, %v1428_v15  ;;  %v1430_v20 = vpop.f32.mrb[171].mxu0 }
 0x26c   :  { %v1433_v39 = vpop.f32.mrb[172].mxu0 }
 0x26d   :  { %v5726_v9 = vmax.f32 %v6496_v37, %v1433_v39  ;;  %v1435_v58 = vpop.f32.mrb[173].mxu0 }
 0x26e   :  { %v1436_v42 = vpop.f32.mrb[174].mxu0 }
 0x26f   :  { %v5731_v27 = vmax.f32 %v6498_v38, %v1436_v42  ;;  %v1438_v18 = vpop.f32.mrb[175].mxu0 }
 0x274   :  { %v1441_v45 = vpop.f32.mrb[176].mxu0 }
 0x275   :  { %v5736_v30 = vmax.f32 %v6501_v19, %v1441_v45  ;;  %v1443_v48 = vpop.f32.mrb[177].mxu0 }
 0x276   :  { %v1444_v3 = vpop.f32.mrb[178].mxu0 }
 0x277   :  { %v5741_v51 = vmax.f32 %v6503_v7, %v1444_v3  ;;  %v1446_v4 = vpop.f32.mrb[179].mxu0  ;;  %v5776_v3 = vld [vmem:[%s6446_s2] ss:$0 sm:$0xff] }
 0x27c   :  { %v1449_v21 = vpop.f32.mrb[180].mxu0 }
 0x27d   :  { %v5746_v54 = vmax.f32 %v6504_v17, %v1449_v21  ;;  %v1451_v23 = vpop.f32.mrb[181].mxu0 }
 0x27e   :  { %v1452_v33 = vpop.f32.mrb[182].mxu0 }
 0x27f   :  { %v5751_v60 = vmax.f32 %v6507_v32, %v1452_v33  ;;  %v1454_v36 = vpop.f32.mrb[183].mxu0 }
 0x284   :  { %v1457_v15 = vpop.f32.mrb[184].mxu0 }
 0x285   :  { %v5756_v63 = vmax.f32 %v6508_v26, %v1457_v15  ;;  %v1459_v20 = vpop.f32.mrb[185].mxu0 }
 0x286   :  { %v1460_v39 = vpop.f32.mrb[186].mxu0 }
 0x287   :  { %v5761_v37 = vmax.f32 %v6511_v62, %v1460_v39  ;;  %v1462_v58 = vpop.f32.mrb[187].mxu0  ;;  %v4712_v39 = vld [vmem:[%s6445_s3 + $0x48] sm:$0xff]  }
 0x28c   :  { %v1465_v42 = vpop.f32.mrb[188].mxu0 }
 0x28d   :  { %v5766_v38 = vmax.f32 %v6512_v5, %v1465_v42  ;;  %v1467_v18 = vpop.f32.mrb[189].mxu0 }
 0x28e   :  { %v1468_v45 = vpop.f32.mrb[190].mxu0 }
 0x28f   :  { %v5771_v8 = vmax.f32 %v6515_v29, %v1468_v45  ;;  %v1470_v19 = vpop.f32.mrb[191].mxu0  ;;  %v4714_v29 = vld [vmem:[%s6445_s3 + $0x58] sm:$0xff]  }
 0x294   :  { %v1473_v48 = vpop.f32.mrb[192].mxu0 }
 0x295   :  { %v1602_v13 = vmax.f32 %v5577_v44, %v1473_v48  ;;  %v1475_v7 = vpop.f32.mrb[193].mxu0 }
 0x296   :  { %v1476_v49 = vpop.f32.mrb[194].mxu0  ;;  %v4715_v7 = vld [vmem:[%s6445_s3 + $0x60] sm:$0xff]  }
 0x297   :  { %v1703_v25 = vadd.f32 %v5776_v3, %v1602_v13  ;;  %v1605_v4 = vmax.f32 %v5589_v53, %v1476_v49  ;;  %v1478_v21 = vpop.f32.mrb[195].mxu0 }
 0x299   :  { %v1704_v17 = vadd.f32 %v5776_v3, %v1605_v4  ;;  %v1735_v23 = vmax.f32 %v1703_v25, 0.0 }
 0x29b   :  { %v1736_v33 = vmax.f32 %v1704_v17, 0.0 }
 0x29c   :  { %v1481_v57 = vpop.f32.mrb[196].mxu0 }
 0x29d   :  { %v1608_v32 = vmax.f32 %v5602_v0, %v1481_v57  ;;  %v1483_v36 = vpop.f32.mrb[197].mxu0  ;;  %v1767_v44 = vpack.c.bf16 %v1736_v33, %v1735_v23  ;;  %v4716_v33 = vld [vmem:[%s6445_s3 + $0x68] sm:$0xff]  }
 0x29e   :  { %v1484_v15 = vpop.f32.mrb[198].mxu0  ;;  %v4717_v36 = vld [vmem:[%s6445_s3 + $0x70] sm:$0xff]  }
 0x29f   :  { %v1705_v26 = vadd.f32 %v5776_v3, %v1608_v32  ;;  %v1611_v20 = vmax.f32 %v5613_v22, %v1484_v15  ;;  %4169 = vmatmul.mubr.bf16.vlgmr.msra.gmra.mrb[0].mxu1 %v1767_v44  ;;  %v1486_v53 = vpop.f32.mrb[199].mxu0  ;;  %v4713_v22 = vld [vmem:[%s6445_s3 + $0x50] sm:$0xff]  }
 0x2a0   :  { %4173 = vmatpush3.bf16.msra.mxu1 %v4711_v24  ;;  %4188 = vmatprep.mubr.msk.bf16.mxu1 %vm4849_vm2, %v4848_v43 }
 0x2a1   :  { %v1706_v2 = vadd.f32 %v5776_v3, %v1611_v20  ;;  %4174 = vmatprep.subr.bf16.mxu1 %v4848_v43  ;;  %v1737_v0 = vmax.f32 %v1705_v26, 0.0 }
 0x2a3   :  { %v1738_v31 = vmax.f32 %v1706_v2, 0.0  ;;  %v4718_v2 = vld [vmem:[%s6445_s3 + $0x78] sm:$0xff]  }
 0x2a4   :  { %4175 = vmatpush3.bf16.msra.mxu1 %v4712_v39  ;;  %v1489_v62 = vpop.f32.mrb[200].mxu0 }
 0x2a5   :  { %v1768_v58 = vpack.c.bf16 %v1738_v31, %v1737_v0  ;;  %v1614_v42 = vmax.f32 %v5625_v11, %v1489_v62  ;;  %v1491_v5 = vpop.f32.mrb[201].mxu0  ;;  %4176 = vmatprep.subr.bf16.mxu1 %v4848_v43 }
 0x2a6   :  { %v1492_v18 = vpop.f32.mrb[202].mxu0 }
 0x2a7   :  { %v1707_v45 = vadd.f32 %v5776_v3, %v1614_v42  ;;  %v1617_v14 = vmax.f32 %v5630_v12, %v1492_v18  ;;  %v1494_v40 = vpop.f32.mrb[203].mxu0 }
 0x2a8   :  { %4177 = vmatpush3.bf16.msra.mxu1 %v4713_v22  ;;  %v4719_v22 = vld [vmem:[%s6445_s3 + $0x80] sm:$0xff]  }
 0x2a9   :  { %v1708_v19 = vadd.f32 %v5776_v3, %v1617_v14  ;;  %4178 = vmatprep.subr.bf16.mxu1 %v4848_v43  ;;  %v1739_v48 = vmax.f32 %v1707_v45, 0.0 }
 0x2ab   :  { %v1740_v11 = vmax.f32 %v1708_v19, 0.0 }
 0x2ac   :  { %4179 = vmatpush3.bf16.msra.mxu1 %v4714_v29  ;;  %v1497_v13 = vpop.f32.mrb[204].mxu0  ;;  %v4720_v29 = vld [vmem:[%s6445_s3 + $0x88] sm:$0xff]  }
 0x2ad   :  { %v5810_v49 = vpack.c.bf16 %v1740_v11, %v1739_v48  ;;  %v1620_v12 = vmax.f32 %v5642_v59, %v1497_v13  ;;  %v1499_v25 = vpop.f32.mrb[205].mxu0  ;;  %4180 = vmatprep.subr.bf16.mxu1 %v4848_v43 }
 0x2ae   :  { %v1500_v4 = vpop.f32.mrb[206].mxu0 }
 0x2af   :  { %v1709_v21 = vadd.f32 %v5776_v3, %v1620_v12  ;;  %v1623_v17 = vmax.f32 %v5647_v6, %v1500_v4  ;;  %v1502_v23 = vpop.f32.mrb[207].mxu0 }
 0x2b0   :  { %4181 = vmatpush3.bf16.msra.mxu1 %v4715_v7 }
 0x2b1   :  { %v1710_v57 = vadd.f32 %v5776_v3, %v1623_v17  ;;  %4182 = vmatprep.subr.bf16.mxu1 %v4848_v43  ;;  %v1741_v24 = vmax.f32 %v1709_v21, 0.0  ;;  %v4722_v17 = vld [vmem:[%s6445_s3 + $0x98] sm:$0xff]  }
 0x2b3   :  { %v1742_v59 = vmax.f32 %v1710_v57, 0.0 }
 0x2b4   :  { %4183 = vmatpush3.bf16.msra.mxu1 %v4716_v33  ;;  %v1505_v32 = vpop.f32.mrb[208].mxu0 }
 0x2b5   :  { %v5824_v44 = vpack.c.bf16 %v1742_v59, %v1741_v24  ;;  %v1626_v6 = vmax.f32 %v5656_v41, %v1505_v32  ;;  %v1507_v15 = vpop.f32.mrb[209].mxu0  ;;  %4184 = vmatprep.subr.bf16.mxu1 %v4848_v43  ;;  %v4723_v24 = vld [vmem:[%s6445_s3 + $0xa0] sm:$0xff]  }
 0x2b6   :  { %v1508_v26 = vpop.f32.mrb[210].mxu0 }
 0x2b7   :  { %v1711_v20 = vadd.f32 %v5776_v3, %v1626_v6  ;;  %v1629_v53 = vmax.f32 %v5661_v50, %v1508_v26  ;;  %v1510_v39 = vpop.f32.mrb[211].mxu0 }
 0x2b8   :  { %4185 = vmatpush3.bf16.msra.mxu1 %v4717_v36 }
 0x2b9   :  { %v1712_v0 = vadd.f32 %v5776_v3, %v1629_v53  ;;  %4186 = vmatprep.subr.bf16.mxu1 %v4848_v43  ;;  %v1743_v31 = vmax.f32 %v1711_v20, 0.0  ;;  %v4724_v20 = vld [vmem:[%s6445_s3 + $0xa8] sm:$0xff]  }
 0x2bb   :  { %v1744_v41 = vmax.f32 %v1712_v0, 0.0  ;;  %v4725_v0 = vld [vmem:[%s6445_s3 + $0xb0] sm:$0xff]  }
 0x2bc   :  { %4187 = vmatpush3.bf16.msra.mxu1 %v4718_v2  ;;  %v1513_v62 = vpop.f32.mrb[212].mxu0 }
 0x2bd   :  { %v5838_v42 = vpack.c.bf16 %v1744_v41, %v1743_v31  ;;  %v1632_v50 = vmax.f32 %v5666_v35, %v1513_v62  ;;  %v1515_v5 = vpop.f32.mrb[213].mxu0  ;;  %4192 = vmatprep.subr.bf16.mxu1 %v4848_v43 }
 0x2be   :  { %v1516_v18 = vpop.f32.mrb[214].mxu0 }
 0x2bf   :  { %v1713_v45 = vadd.f32 %v5776_v3, %v1632_v50  ;;  %v1635_v14 = vmax.f32 %v5671_v61, %v1516_v18  ;;  %4189 = vmatmul.mubr.bf16.vlgmr.msra.gmra.mrb[4].mxu1 %v1768_v58  ;;  %v1518_v40 = vpop.f32.mrb[215].mxu0  ;;  %v4721_v61 = vld [vmem:[%s6445_s3 + $0x90] sm:$0xff]   ;;  %v4726_v18 = vld [vmem:[%s6445_s3 + $0xb8] sm:$0xff]  }
 0x2c0   :  { %4193 = vmatpush3.bf16.msra.mxu1 %v4719_v22  ;;  %4208 = vmatprep.mubr.msk.bf16.mxu1 %vm4849_vm2, %v4848_v43 }
 0x2c1   :  { %v1714_v35 = vadd.f32 %v5776_v3, %v1635_v14  ;;  %4194 = vmatprep.subr.bf16.mxu1 %v4848_v43  ;;  %v1745_v19 = vmax.f32 %v1713_v45, 0.0 }
 0x2c3   :  { %v1746_v48 = vmax.f32 %v1714_v35, 0.0 }
 0x2c4   :  { %4195 = vmatpush3.bf16.msra.mxu1 %v4720_v29  ;;  %v1521_v11 = vpop.f32.mrb[216].mxu0  ;;  %v4727_v29 = vld [vmem:[%s6445_s3 + $0xc0] sm:$0xff]  }
 0x2c5   :  { %v5854_v58 = vpack.c.bf16 %v1746_v48, %v1745_v19  ;;  %v1638_v13 = vmax.f32 %v5676_v10, %v1521_v11  ;;  %v1523_v7 = vpop.f32.mrb[217].mxu0  ;;  %4196 = vmatprep.subr.bf16.mxu1 %v4848_v43 }
 0x2c6   :  { %v1524_v12 = vpop.f32.mrb[218].mxu0  ;;  %v4728_v7 = vld [vmem:[%s6445_s3 + $0xc8] sm:$0xff]  }
 0x2c7   :  { %v1715_v25 = vadd.f32 %v5776_v3, %v1638_v13  ;;  %v1641_v4 = vmax.f32 %v5681_v28, %v1524_v12  ;;  %v1526_v21 = vpop.f32.mrb[219].mxu0 }
 0x2c8   :  { %4197 = vmatpush3.bf16.msra.mxu1 %v4721_v61 }
 0x2c9   :  { %v1716_v23 = vadd.f32 %v5776_v3, %v1641_v4  ;;  %4198 = vmatprep.subr.bf16.mxu1 %v4848_v43  ;;  %v1747_v33 = vmax.f32 %v1715_v25, 0.0 }
 0x2cb   :  { %v1748_v10 = vmax.f32 %v1716_v23, 0.0 }
 0x2cc   :  { %4199 = vmatpush3.bf16.msra.mxu1 %v4722_v17  ;;  %v1529_v57 = vpop.f32.mrb[220].mxu0 }
 0x2cd   :  { %v5868_v59 = vpack.c.bf16 %v1748_v10, %v1747_v33  ;;  %v1644_v28 = vmax.f32 %v5686_v46, %v1529_v57  ;;  %v1531_v32 = vpop.f32.mrb[221].mxu0  ;;  %4200 = vmatprep.subr.bf16.mxu1 %v4848_v43 }
 0x2ce   :  { %v1532_v36 = vpop.f32.mrb[222].mxu0 }
 0x2cf   :  { %v1717_v6 = vadd.f32 %v5776_v3, %v1644_v28  ;;  %v1647_v15 = vmax.f32 %v5691_v1, %v1532_v36  ;;  %v1534_v26 = vpop.f32.mrb[223].mxu0 }
 0x2d0   :  { %4201 = vmatpush3.bf16.msra.mxu1 %v4723_v24  ;;  %v4730_v24 = vld [vmem:[%s6445_s3 + $0xd8] sm:$0xff]  }
 0x2d1   :  { %v1718_v53 = vadd.f32 %v5776_v3, %v1647_v15  ;;  %4202 = vmatprep.subr.bf16.mxu1 %v4848_v43  ;;  %v1749_v39 = vmax.f32 %v1717_v6, 0.0  ;;  %v4731_v6 = vld [vmem:[%s6445_s3 + $0xe0] sm:$0xff]  }
 0x2d3   :  { %v1750_v46 = vmax.f32 %v1718_v53, 0.0 }
 0x2d4   :  { %4203 = vmatpush3.bf16.msra.mxu1 %v4724_v20  ;;  %v1537_v2 = vpop.f32.mrb[224].mxu0 }
 0x2d5   :  { %v5882_v31 = vpack.c.bf16 %v1750_v46, %v1749_v39  ;;  %v1650_v1 = vmax.f32 %v5696_v34, %v1537_v2  ;;  %v1539_v41 = vpop.f32.mrb[225].mxu0  ;;  %4204 = vmatprep.subr.bf16.mxu1 %v4848_v43  ;;  %v4732_v2 = vld [vmem:[%s6445_s3 + $0xe8] sm:$0xff]  }
 0x2d6   :  { %v1540_v62 = vpop.f32.mrb[226].mxu0 }
 0x2d7   :  { %v1719_v22 = vadd.f32 %v5776_v3, %v1650_v1  ;;  %v1653_v50 = vmax.f32 %v5701_v56, %v1540_v62  ;;  %v1542_v5 = vpop.f32.mrb[227].mxu0  ;;  %v4733_v62 = vld [vmem:[%s6445_s3 + $0xf0] sm:$0xff]  }
 0x2d8   :  { %4205 = vmatpush3.bf16.msra.mxu1 %v4725_v0 }
 0x2d9   :  { %v1720_v45 = vadd.f32 %v5776_v3, %v1653_v50  ;;  %4206 = vmatprep.subr.bf16.mxu1 %v4848_v43  ;;  %v1751_v14 = vmax.f32 %v1719_v22, 0.0 }
 0x2db   :  { %v1752_v34 = vmax.f32 %v1720_v45, 0.0 }
 0x2dc   :  { %4207 = vmatpush3.bf16.msra.mxu1 %v4726_v18  ;;  %v1545_v40 = vpop.f32.mrb[228].mxu0 }
 0x2dd   :  { %v5896_v35 = vpack.c.bf16 %v1752_v34, %v1751_v14  ;;  %v1656_v56 = vmax.f32 %v5706_v16, %v1545_v40  ;;  %v1547_v19 = vpop.f32.mrb[229].mxu0  ;;  %4212 = vmatprep.subr.bf16.mxu1 %v4848_v43  ;;  %v4734_v34 = vld [vmem:[%s6445_s3 + $0xf8] sm:$0xff]  }
 0x2de   :  { %v1548_v48 = vpop.f32.mrb[230].mxu0  ;;  %v4735_v19 = vld [vmem:[%s6445_s3 + $0x100] sm:$0xff]  }
 0x2df   :  { %v1721_v11 = vadd.f32 %v5776_v3, %v1656_v56  ;;  %v1659_v61 = vmax.f32 %v5711_v47, %v1548_v48  ;;  %4209 = vmatmul.mubr.bf16.vlgmr.msra.gmra.mrb[8].mxu1 %v5810_v49  ;;  %v1550_v13 = vpop.f32.mrb[231].mxu0  ;;  %v4729_v47 = vld [vmem:[%s6445_s3 + $0xd0] sm:$0xff]  }
 0x2e0   :  { %4213 = vmatpush3.bf16.msra.mxu1 %v4727_v29  ;;  %4228 = vmatprep.mubr.msk.bf16.mxu1 %vm4849_vm2, %v4848_v43 }
 0x2e1   :  { %v1722_v16 = vadd.f32 %v5776_v3, %v1659_v61  ;;  %4214 = vmatprep.subr.bf16.mxu1 %v4848_v43  ;;  %v1753_v12 = vmax.f32 %v1721_v11, 0.0 }
 0x2e3   :  { %v1754_v25 = vmax.f32 %v1722_v16, 0.0 }
 0x2e4   :  { %4215 = vmatpush3.bf16.msra.mxu1 %v4728_v7  ;;  %v1553_v4 = vpop.f32.mrb[232].mxu0 }
 0x2e5   :  { %v5913_v49 = vpack.c.bf16 %v1754_v25, %v1753_v12  ;;  %v1662_v21 = vmax.f32 %v5716_v55, %v1553_v4  ;;  %v1555_v17 = vpop.f32.mrb[233].mxu0  ;;  %4216 = vmatprep.subr.bf16.mxu1 %v4848_v43  ;;  %v4736_v12 = vld [vmem:[%s6445_s3 + $0x108] sm:$0xff]  }
 0x2e6   :  { %v1556_v23 = vpop.f32.mrb[234].mxu0 }
 0x2e7   :  { %v1723_v33 = vadd.f32 %v5776_v3, %v1662_v21  ;;  %v1665_v10 = vmax.f32 %v5721_v52, %v1556_v23  ;;  %v1558_v57 = vpop.f32.mrb[235].mxu0 }
 0x2e8   :  { %4217 = vmatpush3.bf16.msra.mxu1 %v4729_v47 }
 0x2e9   :  { %v1724_v28 = vadd.f32 %v5776_v3, %v1665_v10  ;;  %4218 = vmatprep.subr.bf16.mxu1 %v4848_v43  ;;  %v1755_v32 = vmax.f32 %v1723_v33, 0.0 }
 0x2eb   :  { %v1756_v55 = vmax.f32 %v1724_v28, 0.0 }
 0x2ec   :  { %4219 = vmatpush3.bf16.msra.mxu1 %v4730_v24  ;;  %v1561_v36 = vpop.f32.mrb[236].mxu0  ;;  %v4738_v24 = vld [vmem:[%s6445_s3 + $0x118] sm:$0xff]  }
 0x2ed   :  { %v5927_v15 = vpack.c.bf16 %v1756_v55, %v1755_v32  ;;  %v1668_v52 = vmax.f32 %v5726_v9, %v1561_v36  ;;  %v1563_v26 = vpop.f32.mrb[237].mxu0  ;;  %4220 = vmatprep.subr.bf16.mxu1 %v4848_v43  ;;  %v4739_v36 = vld [vmem:[%s6445_s3 + $0x120] sm:$0xff]  }
 0x2ee   :  { %v1564_v20 = vpop.f32.mrb[238].mxu0 }
 0x2ef   :  { %v1725_v53 = vadd.f32 %v5776_v3, %v1668_v52  ;;  %v1671_v39 = vmax.f32 %v5731_v27, %v1564_v20  ;;  %v1566_v46 = vpop.f32.mrb[239].mxu0 }
 0x2f0   :  { %4221 = vmatpush3.bf16.msra.mxu1 %v4731_v6  ;;  %v4740_v46 = vld [vmem:[%s6445_s3 + $0x128] sm:$0xff]  }
 0x2f1   :  { %v1726_v0 = vadd.f32 %v5776_v3, %v1671_v39  ;;  %4222 = vmatprep.subr.bf16.mxu1 %v4848_v43  ;;  %v1757_v1 = vmax.f32 %v1725_v53, 0.0 }
 0x2f3   :  { %v1758_v9 = vmax.f32 %v1726_v0, 0.0 }
 0x2f4   :  { %4223 = vmatpush3.bf16.msra.mxu1 %v4732_v2  ;;  %v1569_v41 = vpop.f32.mrb[240].mxu0 }
 0x2f5   :  { %v5941_v22 = vpack.c.bf16 %v1758_v9, %v1757_v1  ;;  %v1674_v27 = vmax.f32 %v5736_v30, %v1569_v41  ;;  %v1571_v50 = vpop.f32.mrb[241].mxu0  ;;  %4224 = vmatprep.subr.bf16.mxu1 %v4848_v43  ;;  %v4741_v1 = vld [vmem:[%s6445_s3 + $0x130] sm:$0xff]   ;;  %v4744_v41 = vld [vmem:[%s6445_s3 + $0x148] sm:$0xff]  }
 0x2f6   :  { %v1572_v5 = vpop.f32.mrb[242].mxu0  ;;  %v4748_v50 = vld [vmem:[%s6445_s3 + $0x168] sm:$0xff]  }
 0x2f7   :  { %v1727_v18 = vadd.f32 %v5776_v3, %v1674_v27  ;;  %v1677_v45 = vmax.f32 %v5741_v51, %v1572_v5  ;;  %v1574_v14 = vpop.f32.mrb[243].mxu0  ;;  %v4747_v27 = vld [vmem:[%s6445_s3 + $0x160] sm:$0xff]   ;;  %v4749_v5 = vld [vmem:[%s6445_s3 + $0x170] sm:$0xff]  }
 0x2f8   :  { %4225 = vmatpush3.bf16.msra.mxu1 %v4733_v62  ;;  %v4745_v62 = vld [vmem:[%s6445_s3 + $0x150] sm:$0xff]   ;;  %v4752_v14 = vld [vmem:[%s6445_s3 + $0x188] sm:$0xff]  }
 0x2f9   :  { %v1728_v40 = vadd.f32 %v5776_v3, %v1677_v45  ;;  %4226 = vmatprep.subr.bf16.mxu1 %v4848_v43  ;;  %v1759_v29 = vmax.f32 %v1727_v18, 0.0  ;;  %v4750_v18 = vld [vmem:[%s6445_s3 + $0x178] sm:$0xff]   ;;  %v4751_v45 = vld [vmem:[%s6445_s3 + $0x180] sm:$0xff]  }
 0x2fb   :  { %v1760_v30 = vmax.f32 %v1728_v40, 0.0  ;;  %v4755_v40 = vld [vmem:[%s6445_s3 + $0x1a0] sm:$0xff]  }
 0x2fc   :  { %4227 = vmatpush3.bf16.msra.mxu1 %v4734_v34  ;;  %v1577_v56 = vpop.f32.mrb[244].mxu0  ;;  %v4753_v34 = vld [vmem:[%s6445_s3 + $0x190] sm:$0xff]  }
 0x2fd   :  { %v5955_v48 = vpack.c.bf16 %v1760_v30, %v1759_v29  ;;  %v1680_v51 = vmax.f32 %v5746_v54, %v1577_v56  ;;  %v1579_v11 = vpop.f32.mrb[245].mxu0  ;;  %4232 = vmatprep.subr.bf16.mxu1 %v4848_v43  ;;  %v4756_v29 = vld [vmem:[%s6445_s3 + $0x1a8] sm:$0xff]   ;;  %v4757_v30 = vld [vmem:[%s6445_s3 + $0x1b0] sm:$0xff]   ;;  %v4758_v56 = vld [vmem:[%s6445_s3 + $0x1b8] sm:$0xff]  }
 0x2fe   :  { %v1580_v61 = vpop.f32.mrb[246].mxu0  ;;  %v4761_v11 = vld [vmem:[%s6445_s3 + $0x1d0] sm:$0xff]  }
 0x2ff   :  { %v1729_v13 = vadd.f32 %v5776_v3, %v1680_v51  ;;  %v1683_v7 = vmax.f32 %v5751_v60, %v1580_v61  ;;  %4229 = vmatmul.mubr.bf16.vlgmr.msra.gmra.mrb[12].mxu1 %v5824_v44  ;;  %v1582_v16 = vpop.f32.mrb[247].mxu0  ;;  %v4737_v60 = vld [vmem:[%s6445_s3 + $0x110] sm:$0xff]   ;;  %v4760_v51 = vld [vmem:[%s6445_s3 + $0x1c8] sm:$0xff]   ;;  %v4763_v61 = vld [vmem:[%s6445_s3 + $0x1e0] sm:$0xff]  }
 0x300   :  { %4233 = vmatpush3.bf16.msra.mxu1 %v4735_v19  ;;  %4248 = vmatprep.mubr.msk.bf16.mxu1 %vm4849_vm2, %v4848_v43  ;;  %v4759_v19 = vld [vmem:[%s6445_s3 + $0x1c0] sm:$0xff]  }
 0x301   :  { %v1730_v54 = vadd.f32 %v5776_v3, %v1683_v7  ;;  %4234 = vmatprep.subr.bf16.mxu1 %v4848_v43  ;;  %v1761_v25 = vmax.f32 %v1729_v13, 0.0  ;;  %v4764_v13 = vld [vmem:[%s6445_s3 + $0x1e8] sm:$0xff]  }
 0x303   :  { %v1762_v4 = vmax.f32 %v1730_v54, 0.0  ;;  %v4765_v54 = vld [vmem:[%s6445_s3 + $0x1f0] sm:$0xff]  }
 0x304   :  { %4235 = vmatpush3.bf16.msra.mxu1 %v4736_v12  ;;  %v1585_v47 = vpop.f32.mrb[248].mxu0 }
 0x305   :  { %v5972_v44 = vpack.c.bf16 %v1762_v4, %v1761_v25  ;;  %v1686_v21 = vmax.f32 %v5756_v63, %v1585_v47  ;;  %v1587_v17 = vpop.f32.mrb[249].mxu0  ;;  %4236 = vmatprep.subr.bf16.mxu1 %v4848_v43  ;;  %v4766_v4 = vld [vmem:[%s6445_s3 + $0x1f8] sm:$0xff]   ;;  %v4767_v47 = vld [vmem:[%s6445_s3 + $0x200] sm:$0xff]  }
 0x306   :  { %v1588_v23 = vpop.f32.mrb[250].mxu0  ;;  %v4771_v17 = vld [vmem:[%s6445_s3 + $0x220] sm:$0xff]  }
 0x307   :  { %v1731_v33 = vadd.f32 %v5776_v3, %v1686_v21  ;;  %v1689_v10 = vmax.f32 %v5761_v37, %v1588_v23  ;;  %v1590_v57 = vpop.f32.mrb[251].mxu0  ;;  %v4769_v21 = vld [vmem:[%s6445_s3 + $0x210] sm:$0xff]   ;;  %v4772_v23 = vld [vmem:[%s6445_s3 + $0x228] sm:$0xff]  }
 0x308   :  { %4237 = vmatpush3.bf16.msra.mxu1 %v4737_v60  ;;  %v4768_v60 = vld [vmem:[%s6445_s3 + $0x208] sm:$0xff]  }
 0x309   :  { %v1732_v28 = vadd.f32 %v5776_v3, %v1689_v10  ;;  %4238 = vmatprep.subr.bf16.mxu1 %v4848_v43  ;;  %v1763_v32 = vmax.f32 %v1731_v33, 0.0 }
 0x30b   :  { %v1764_v63 = vmax.f32 %v1732_v28, 0.0  ;;  %v4773_v28 = vld [vmem:[%s6445_s3 + $0x230] sm:$0xff]  }
 0x30c   :  { %4239 = vmatpush3.bf16.msra.mxu1 %v4738_v24  ;;  %v1593_v55 = vpop.f32.mrb[252].mxu0 }
 0x30d   :  { %v5986_v6 = vpack.c.bf16 %v1764_v63, %v1763_v32  ;;  %v1692_v37 = vmax.f32 %v5766_v38, %v1593_v55  ;;  %v1595_v52 = vpop.f32.mrb[253].mxu0  ;;  %4240 = vmatprep.subr.bf16.mxu1 %v4848_v43  ;;  %v4774_v55 = vld [vmem:[%s6445_s3 + $0x238] sm:$0xff]  }
 0x30e   :  { %v1596_v26 = vpop.f32.mrb[254].mxu0  ;;  %v4777_v52 = vld [vmem:[%s6445_s3 + $0x250] sm:$0xff]  }
 0x30f   :  { %v1733_v20 = vadd.f32 %v5776_v3, %v1692_v37  ;;  %v1695_v53 = vmax.f32 %v5771_v8, %v1596_v26  ;;  %v1598_v39 = vpop.f32.mrb[255].mxu0  ;;  %v4742_v8 = vld [vmem:[%s6445_s3 + $0x138] sm:$0xff]   ;;  %v4776_v37 = vld [vmem:[%s6445_s3 + $0x248] sm:$0xff]   ;;  %v4779_v26 = vld [vmem:[%s6445_s3 + $0x260] sm:$0xff]  }
 0x310   :  { %4241 = vmatpush3.bf16.msra.mxu1 %v4739_v36  ;;  %v4775_v36 = vld [vmem:[%s6445_s3 + $0x240] sm:$0xff]  }
 0x311   :  { %v1734_v2 = vadd.f32 %v5776_v3, %v1695_v53  ;;  %4242 = vmatprep.subr.bf16.mxu1 %v4848_v43  ;;  %v1765_v0 = vmax.f32 %v1733_v20, 0.0  ;;  %v4743_v3 = vld [vmem:[%s6445_s3 + $0x140] sm:$0xff]   ;;  %v4780_v20 = vld [vmem:[%s6445_s3 + $0x268] sm:$0xff]  }
 0x313   :  { %v1766_v38 = vmax.f32 %v1734_v2, 0.0 }
 0x314   :  { %4243 = vmatpush3.bf16.msra.mxu1 %v4740_v46 }
 0x315   :  { %v6000_v9 = vpack.c.bf16 %v1766_v38, %v1765_v0  ;;  %4244 = vmatprep.subr.bf16.mxu1 %v4848_v43  ;;  %v4781_v0 = vld [vmem:[%s6445_s3 + $0x270] sm:$0xff]  }
 0x318   :  { %4245 = vmatpush3.bf16.msra.mxu1 %v4741_v1 }
 0x319   :  { %4246 = vmatprep.subr.bf16.mxu1 %v4848_v43 }
 0x31c   :  { %4247 = vmatpush3.bf16.msra.mxu1 %v4742_v8  ;;  %v4782_v8 = vld [vmem:[%s6445_s3 + $0x278] sm:$0xff]  }
 0x31d   :  { %4252 = vmatprep.subr.bf16.mxu1 %v4848_v43 }
 0x31f   :  { %4249 = vmatmul.mubr.bf16.vlgmr.msra.gmra.mrb[16].mxu1 %v5838_v42  ;;  %v4746_v42 = vld [vmem:[%s6445_s3 + $0x158] sm:$0xff]  }
 0x320   :  { %4253 = vmatpush3.bf16.msra.mxu1 %v4743_v3  ;;  %4268 = vmatprep.mubr.msk.bf16.mxu1 %vm4849_vm2, %v4848_v43  ;;  %v4783_v3 = vld [vmem:[%s6445_s3 + $0x280] sm:$0xff]  }
 0x321   :  { %4254 = vmatprep.subr.bf16.mxu1 %v4848_v43 }
 0x324   :  { %4255 = vmatpush3.bf16.msra.mxu1 %v4744_v41  ;;  %v4784_v41 = vld [vmem:[%s6445_s3 + $0x288] sm:$0xff]  }
 0x325   :  { %4256 = vmatprep.subr.bf16.mxu1 %v4848_v43 }
 0x328   :  { %4257 = vmatpush3.bf16.msra.mxu1 %v4745_v62  ;;  %v4785_v62 = vld [vmem:[%s6445_s3 + $0x290] sm:$0xff]  }
 0x329   :  { %4258 = vmatprep.subr.bf16.mxu1 %v4848_v43 }
 0x32c   :  { %4259 = vmatpush3.bf16.msra.mxu1 %v4746_v42  ;;  %v4787_v42 = vld [vmem:[%s6445_s3 + $0x2a0] sm:$0xff]  }
 0x32d   :  { %4260 = vmatprep.subr.bf16.mxu1 %v4848_v43 }
 0x330   :  { %4261 = vmatpush3.bf16.msra.mxu1 %v4747_v27  ;;  %v4788_v27 = vld [vmem:[%s6445_s3 + $0x2a8] sm:$0xff]  }
 0x331   :  { %4262 = vmatprep.subr.bf16.mxu1 %v4848_v43 }
 0x334   :  { %4263 = vmatpush3.bf16.msra.mxu1 %v4748_v50 }
 0x335   :  { %4264 = vmatprep.subr.bf16.mxu1 %v4848_v43 }
 0x338   :  { %4265 = vmatpush3.bf16.msra.mxu1 %v4749_v5 }
 0x339   :  { %4266 = vmatprep.subr.bf16.mxu1 %v4848_v43 }
 0x33c   :  { %4267 = vmatpush3.bf16.msra.mxu1 %v4750_v18 }
 0x33d   :  { %4272 = vmatprep.subr.bf16.mxu1 %v4848_v43 }
 0x33f   :  { %4269 = vmatmul.mubr.bf16.vlgmr.msra.gmra.mrb[20].mxu1 %v5854_v58  ;;  %v4754_v58 = vld [vmem:[%s6445_s3 + $0x198] sm:$0xff]  }
 0x340   :  { %4273 = vmatpush3.bf16.msra.mxu1 %v4751_v45  ;;  %4288 = vmatprep.mubr.msk.bf16.mxu1 %vm4849_vm2, %v4848_v43 }
 0x341   :  { %4274 = vmatprep.subr.bf16.mxu1 %v4848_v43 }
 0x344   :  { %4275 = vmatpush3.bf16.msra.mxu1 %v4752_v14  ;;  %v4789_v14 = vld [vmem:[%s6445_s3 + $0x2b0] sm:$0xff]  }
 0x345   :  { %4276 = vmatprep.subr.bf16.mxu1 %v4848_v43 }
 0x348   :  { %4277 = vmatpush3.bf16.msra.mxu1 %v4753_v34 }
 0x349   :  { %4278 = vmatprep.subr.bf16.mxu1 %v4848_v43 }
 0x34c   :  { %4279 = vmatpush3.bf16.msra.mxu1 %v4754_v58 }
 0x34d   :  { %4280 = vmatprep.subr.bf16.mxu1 %v4848_v43 }
 0x350   :  { %4281 = vmatpush3.bf16.msra.mxu1 %v4755_v40  ;;  %v4790_v40 = vld [vmem:[%s6445_s3 + $0x2b8] sm:$0xff]  }
 0x351   :  { %4282 = vmatprep.subr.bf16.mxu1 %v4848_v43 }
 0x354   :  { %4283 = vmatpush3.bf16.msra.mxu1 %v4756_v29  ;;  %v4791_v29 = vld [vmem:[%s6445_s3 + $0x2c0] sm:$0xff]  }
 0x355   :  { %4284 = vmatprep.subr.bf16.mxu1 %v4848_v43 }
 0x358   :  { %4285 = vmatpush3.bf16.msra.mxu1 %v4757_v30  ;;  %v4792_v30 = vld [vmem:[%s6445_s3 + $0x2c8] sm:$0xff]  }
 0x359   :  { %4286 = vmatprep.subr.bf16.mxu1 %v4848_v43 }
 0x35c   :  { %4287 = vmatpush3.bf16.msra.mxu1 %v4758_v56  ;;  %v4793_v56 = vld [vmem:[%s6445_s3 + $0x2d0] sm:$0xff]  }
 0x35d   :  { %4292 = vmatprep.subr.bf16.mxu1 %v4848_v43 }
 0x35f   :  { %4289 = vmatmul.mubr.bf16.vlgmr.msra.gmra.mrb[24].mxu1 %v5868_v59  ;;  %v4762_v59 = vld [vmem:[%s6445_s3 + $0x1d8] sm:$0xff]  }
 0x360   :  { %4293 = vmatpush3.bf16.msra.mxu1 %v4759_v19  ;;  %4308 = vmatprep.mubr.msk.bf16.mxu1 %vm4849_vm2, %v4848_v43  ;;  %v4795_v19 = vld [vmem:[%s6445_s3 + $0x2e0] sm:$0xff]  }
 0x361   :  { %4294 = vmatprep.subr.bf16.mxu1 %v4848_v43 }
 0x364   :  { %4295 = vmatpush3.bf16.msra.mxu1 %v4760_v51  ;;  %v4796_v51 = vld [vmem:[%s6445_s3 + $0x2e8] sm:$0xff]  }
 0x365   :  { %4296 = vmatprep.subr.bf16.mxu1 %v4848_v43 }
 0x368   :  { %4297 = vmatpush3.bf16.msra.mxu1 %v4761_v11 }
 0x369   :  { %4298 = vmatprep.subr.bf16.mxu1 %v4848_v43 }
 0x36c   :  { %4299 = vmatpush3.bf16.msra.mxu1 %v4762_v59 }
 0x36d   :  { %4300 = vmatprep.subr.bf16.mxu1 %v4848_v43 }
 0x370   :  { %4301 = vmatpush3.bf16.msra.mxu1 %v4763_v61 }
 0x371   :  { %4302 = vmatprep.subr.bf16.mxu1 %v4848_v43 }
 0x372   :  { %v2121_v7 = vpop.f32.mrb[0].mxu1 }
 0x373   :  { %v4170_v16 = vpop.f32.mrb[1].mxu1 }
 0x374   :  { %4303 = vmatpush3.bf16.msra.mxu1 %v4764_v13  ;;  %v2124_v12 = vpop.f32.mrb[2].mxu1 }
 0x375   :  { %v4171_v25 = vpop.f32.mrb[3].mxu1  ;;  %4304 = vmatprep.subr.bf16.mxu1 %v4848_v43 }
 0x376   :  { %v4799_v25 = vld [vmem:[%s6445_s3 + $0x300] sm:$0xff]  }
 0x378   :  { %4305 = vmatpush3.bf16.msra.mxu1 %v4765_v54  ;;  %v4798_v54 = vld [vmem:[%s6445_s3 + $0x2f8] sm:$0xff]  }
 0x379   :  { %4306 = vmatprep.subr.bf16.mxu1 %v4848_v43 }
 0x37c   :  { %4307 = vmatpush3.bf16.msra.mxu1 %v4766_v4  ;;  %v4800_v4 = vld [vmem:[%s6445_s3 + $0x308] sm:$0xff]  }
 0x37d   :  { %4312 = vmatprep.subr.bf16.mxu1 %v4848_v43 }
 0x37f   :  { %4309 = vmatmul.mubr.bf16.vlgmr.msra.gmra.mrb[28].mxu1 %v5882_v31  ;;  %v4770_v31 = vld [vmem:[%s6445_s3 + $0x218] sm:$0xff]  }
 0x380   :  { %4313 = vmatpush3.bf16.msra.mxu1 %v4767_v47  ;;  %4328 = vmatprep.mubr.msk.bf16.mxu1 %vm4849_vm2, %v4848_v43  ;;  %v4801_v47 = vld [vmem:[%s6445_s3 + $0x310] sm:$0xff]  }
 0x381   :  { %4314 = vmatprep.subr.bf16.mxu1 %v4848_v43 }
 0x384   :  { %4315 = vmatpush3.bf16.msra.mxu1 %v4768_v60  ;;  %v4803_v60 = vld [vmem:[%s6445_s3 + $0x320] sm:$0xff]  }
 0x385   :  { %4316 = vmatprep.subr.bf16.mxu1 %v4848_v43 }
 0x388   :  { %4317 = vmatpush3.bf16.msra.mxu1 %v4769_v21  ;;  %v4804_v21 = vld [vmem:[%s6445_s3 + $0x328] sm:$0xff]  }
 0x389   :  { %4318 = vmatprep.subr.bf16.mxu1 %v4848_v43 }
 0x38c   :  { %4319 = vmatpush3.bf16.msra.mxu1 %v4770_v31 }
 0x38d   :  { %4320 = vmatprep.subr.bf16.mxu1 %v4848_v43 }
 0x390   :  { %4321 = vmatpush3.bf16.msra.mxu1 %v4771_v17 }
 0x391   :  { %4322 = vmatprep.subr.bf16.mxu1 %v4848_v43 }
 0x392   :  { %v2210_v33 = vpop.f32.mrb[4].mxu1 }
 0x393   :  { %v3463_v10 = vadd.f32 %v2210_v33, %v2121_v7  ;;  %v4190_v57 = vpop.f32.mrb[5].mxu1  ;;  %v4797_v7 = vld [vmem:[%s6445_s3 + $0x2f0] sm:$0xff]  }
 0x394   :  { %v2213_v24 = vpop.f32.mrb[6].mxu1  ;;  %4323 = vmatpush3.bf16.msra.mxu1 %v4772_v23 }
 0x395   :  { %v3478_v32 = vadd.f32 %v2213_v24, %v2124_v12  ;;  %v4191_v63 = vpop.f32.mrb[7].mxu1  ;;  %4324 = vmatprep.subr.bf16.mxu1 %v4848_v43 }
 0x396   :  { %v4808_v63 = vld [vmem:[%s6445_s3 + $0x348] sm:$0xff]  }
 0x398   :  { %4325 = vmatpush3.bf16.msra.mxu1 %v4773_v28  ;;  %v4806_v28 = vld [vmem:[%s6445_s3 + $0x338] sm:$0xff]  }
 0x399   :  { %4326 = vmatprep.subr.bf16.mxu1 %v4848_v43 }
 0x39c   :  { %4327 = vmatpush3.bf16.msra.mxu1 %v4774_v55  ;;  %v4809_v55 = vld [vmem:[%s6445_s3 + $0x350] sm:$0xff]  }
 0x39d   :  { %4332 = vmatprep.subr.bf16.mxu1 %v4848_v43 }
 0x39f   :  { %4329 = vmatmul.mubr.bf16.vlgmr.msra.gmra.mrb[32].mxu1 %v5896_v35  ;;  %v4778_v35 = vld [vmem:[%s6445_s3 + $0x258] sm:$0xff]  }
 0x3a0   :  { %4333 = vmatpush3.bf16.msra.mxu1 %v4775_v36  ;;  %4348 = vmatprep.mubr.msk.bf16.mxu1 %vm4849_vm2, %v4848_v43  ;;  %v4811_v36 = vld [vmem:[%s6445_s3 + $0x360] sm:$0xff]  }
 0x3a1   :  { %4334 = vmatprep.subr.bf16.mxu1 %v4848_v43 }
 0x3a4   :  { %4335 = vmatpush3.bf16.msra.mxu1 %v4776_v37  ;;  %v4812_v37 = vld [vmem:[%s6445_s3 + $0x368] sm:$0xff]  }
 0x3a5   :  { %4336 = vmatprep.subr.bf16.mxu1 %v4848_v43 }
 0x3a8   :  { %4337 = vmatpush3.bf16.msra.mxu1 %v4777_v52 }
 0x3a9   :  { %4338 = vmatprep.subr.bf16.mxu1 %v4848_v43 }
 0x3ac   :  { %4339 = vmatpush3.bf16.msra.mxu1 %v4778_v35 }
 0x3ad   :  { %4340 = vmatprep.subr.bf16.mxu1 %v4848_v43 }
 0x3b0   :  { %4341 = vmatpush3.bf16.msra.mxu1 %v4779_v26 }
 0x3b1   :  { %4342 = vmatprep.subr.bf16.mxu1 %v4848_v43 }
 0x3b2   :  { %v2299_v53 = vpop.f32.mrb[8].mxu1 }
 0x3b3   :  { %v3464_v39 = vadd.f32 %v3463_v10, %v2299_v53  ;;  %v4210_v46 = vpop.f32.mrb[9].mxu1  ;;  %v4805_v10 = vld [vmem:[%s6445_s3 + $0x330] sm:$0xff]  }
 0x3b4   :  { %v2302_v2 = vpop.f32.mrb[10].mxu1  ;;  %4343 = vmatpush3.bf16.msra.mxu1 %v4780_v20  ;;  %v4813_v53 = vld [vmem:[%s6445_s3 + $0x370] sm:$0xff]  }
 0x3b5   :  { %v3479_v38 = vadd.f32 %v3478_v32, %v2302_v2  ;;  %v4211_v1 = vpop.f32.mrb[11].mxu1  ;;  %4344 = vmatprep.subr.bf16.mxu1 %v4848_v43  ;;  %v4807_v32 = vld [vmem:[%s6445_s3 + $0x340] sm:$0xff]   ;;  %v4814_v2 = vld [vmem:[%s6445_s3 + $0x378] sm:$0xff]  }
 0x3b6   :  { %v4817_v1 = vld [vmem:[%s6445_s3 + $0x390] sm:$0xff]  }
 0x3b8   :  { %4345 = vmatpush3.bf16.msra.mxu1 %v4781_v0  ;;  %v4815_v0 = vld [vmem:[%s6445_s3 + $0x380] sm:$0xff]  }
 0x3b9   :  { %4346 = vmatprep.subr.bf16.mxu1 %v4848_v43 }
 0x3bc   :  { %4347 = vmatpush3.bf16.msra.mxu1 %v4782_v8  ;;  %v4819_v8 = vld [vmem:[%s6445_s3 + $0x3a0] sm:$0xff]  }
 0x3bd   :  { %4352 = vmatprep.subr.bf16.mxu1 %v4848_v43 }
 0x3bf   :  { %4349 = vmatmul.mubr.bf16.vlgmr.msra.gmra.mrb[36].mxu1 %v5913_v49  ;;  %v4786_v49 = vld [vmem:[%s6445_s3 + $0x298] sm:$0xff]  }
 0x3c0   :  { %4353 = vmatpush3.bf16.msra.mxu1 %v4783_v3  ;;  %4368 = vmatprep.mubr.msk.bf16.mxu1 %vm4849_vm2, %v4848_v43  ;;  %v4820_v3 = vld [vmem:[%s6445_s3 + $0x3a8] sm:$0xff]  }
 0x3c1   :  { %4354 = vmatprep.subr.bf16.mxu1 %v4848_v43 }
 0x3c4   :  { %4355 = vmatpush3.bf16.msra.mxu1 %v4784_v41 }
 0x3c5   :  { %4356 = vmatprep.subr.bf16.mxu1 %v4848_v43 }
 0x3c8   :  { %4357 = vmatpush3.bf16.msra.mxu1 %v4785_v62 }
 0x3c9   :  { %4358 = vmatprep.subr.bf16.mxu1 %v4848_v43 }
 0x3cc   :  { %4359 = vmatpush3.bf16.msra.mxu1 %v4786_v49 }
 0x3cd   :  { %4360 = vmatprep.subr.bf16.mxu1 %v4848_v43 }
 0x3d0   :  { %4361 = vmatpush3.bf16.msra.mxu1 %v4787_v42 }
 0x3d1   :  { %4362 = vmatprep.subr.bf16.mxu1 %v4848_v43 }
 0x3d2   :  { %v2388_v50 = vpop.f32.mrb[12].mxu1 }
 0x3d3   :  { %v3465_v5 = vadd.f32 %v3464_v39, %v2388_v50  ;;  %v4230_v18 = vpop.f32.mrb[13].mxu1 }
 0x3d4   :  { %v2391_v45 = vpop.f32.mrb[14].mxu1  ;;  %4363 = vmatpush3.bf16.msra.mxu1 %v4788_v27  ;;  %v4821_v27 = vld [vmem:[%s6445_s3 + $0x3b0] sm:$0xff]   ;;  %v4822_v18 = vld [vmem:[%s6445_s3 + $0x3b8] sm:$0xff]  }
 0x3d5   :  { %v3480_v34 = vadd.f32 %v3479_v38, %v2391_v45  ;;  %v4231_v58 = vpop.f32.mrb[15].mxu1  ;;  %4364 = vmatprep.subr.bf16.mxu1 %v4848_v43  ;;  %v4816_v38 = vld [vmem:[%s6445_s3 + $0x388] sm:$0xff]   ;;  %v4823_v45 = vld [vmem:[%s6445_s3 + $0x3c0] sm:$0xff]  }
 0x3d6   :  { %v4827_v58 = vld [vmem:[%s6445_s3 + $0x3e0] sm:$0xff]  }
 0x3d8   :  { %4365 = vmatpush3.bf16.msra.mxu1 %v4789_v14  ;;  %v4824_v14 = vld [vmem:[%s6445_s3 + $0x3c8] sm:$0xff]  }
 0x3d9   :  { %4366 = vmatprep.subr.bf16.mxu1 %v4848_v43 }
 0x3dc   :  { %4367 = vmatpush3.bf16.msra.mxu1 %v4790_v40  ;;  %v4828_v40 = vld [vmem:[%s6445_s3 + $0x3e8] sm:$0xff]  }
 0x3dd   :  { %4372 = vmatprep.subr.bf16.mxu1 %v4848_v43 }
 0x3df   :  { %4369 = vmatmul.mubr.bf16.vlgmr.msra.gmra.mrb[40].mxu1 %v5927_v15  ;;  %v4794_v15 = vld [vmem:[%s6445_s3 + $0x2d8] sm:$0xff]  }
 0x3e0   :  { %4373 = vmatpush3.bf16.msra.mxu1 %v4791_v29  ;;  %4388 = vmatprep.mubr.msk.bf16.mxu1 %vm4849_vm2, %v4848_v43 }
 0x3e1   :  { %4374 = vmatprep.subr.bf16.mxu1 %v4848_v43 }
 0x3e4   :  { %4375 = vmatpush3.bf16.msra.mxu1 %v4792_v30 }
 0x3e5   :  { %4376 = vmatprep.subr.bf16.mxu1 %v4848_v43 }
 0x3e8   :  { %4377 = vmatpush3.bf16.msra.mxu1 %v4793_v56 }
 0x3e9   :  { %4378 = vmatprep.subr.bf16.mxu1 %v4848_v43 }
 0x3ec   :  { %4379 = vmatpush3.bf16.msra.mxu1 %v4794_v15 }
 0x3ed   :  { %4380 = vmatprep.subr.bf16.mxu1 %v4848_v43 }
 0x3f0   :  { %4381 = vmatpush3.bf16.msra.mxu1 %v4795_v19  ;;  %v4829_v19 = vld [vmem:[%s6445_s3 + $0x3f0] sm:$0xff]  }
 0x3f1   :  { %4382 = vmatprep.subr.bf16.mxu1 %v4848_v43 }
 0x3f2   :  { %v2477_v11 = vpop.f32.mrb[16].mxu1 }
 0x3f3   :  { %v3466_v59 = vadd.f32 %v3465_v5, %v2477_v11  ;;  %v4250_v61 = vpop.f32.mrb[17].mxu1 }
 0x3f4   :  { %v2480_v13 = vpop.f32.mrb[18].mxu1  ;;  %4383 = vmatpush3.bf16.msra.mxu1 %v4796_v51 }
 0x3f5   :  { %v3481_v16 = vadd.f32 %v3480_v34, %v2480_v13  ;;  %v4251_v12 = vpop.f32.mrb[19].mxu1  ;;  %4384 = vmatprep.subr.bf16.mxu1 %v4848_v43  ;;  %v4825_v34 = vld [vmem:[%s6445_s3 + $0x3d0] sm:$0xff]  }
 0x3f8   :  { %4385 = vmatpush3.bf16.msra.mxu1 %v4797_v7 }
 0x3f9   :  { %4386 = vmatprep.subr.bf16.mxu1 %v4848_v43 }
 0x3fc   :  { %4387 = vmatpush3.bf16.msra.mxu1 %v4798_v54 }
 0x3fd   :  { %4392 = vmatprep.subr.bf16.mxu1 %v4848_v43 }
 0x3ff   :  { %4389 = vmatmul.mubr.bf16.vlgmr.msra.gmra.mrb[44].mxu1 %v5941_v22  ;;  %v4802_v22 = vld [vmem:[%s6445_s3 + $0x318] sm:$0xff]  }
 0x400   :  { %4393 = vmatpush3.bf16.msra.mxu1 %v4799_v25  ;;  %4408 = vmatprep.mubr.msk.bf16.mxu1 %vm4849_vm2, %v4848_v43 }
 0x401   :  { %4394 = vmatprep.subr.bf16.mxu1 %v4848_v43 }
 0x404   :  { %4395 = vmatpush3.bf16.msra.mxu1 %v4800_v4 }
 0x405   :  { %4396 = vmatprep.subr.bf16.mxu1 %v4848_v43 }
 0x408   :  { %4397 = vmatpush3.bf16.msra.mxu1 %v4801_v47 }
 0x409   :  { %4398 = vmatprep.subr.bf16.mxu1 %v4848_v43 }
 0x40c   :  { %4399 = vmatpush3.bf16.msra.mxu1 %v4802_v22 }
 0x40d   :  { %4400 = vmatprep.subr.bf16.mxu1 %v4848_v43 }
 0x410   :  { %4401 = vmatpush3.bf16.msra.mxu1 %v4803_v60 }
 0x411   :  { %4402 = vmatprep.subr.bf16.mxu1 %v4848_v43 }
 0x412   :  { %v2566_v31 = vpop.f32.mrb[20].mxu1 }
 0x413   :  { %v3467_v17 = vadd.f32 %v3466_v59, %v2566_v31  ;;  %v4270_v23 = vpop.f32.mrb[21].mxu1  ;;  %v4830_v59 = vld [vmem:[%s6445_s3 + $0x3f8] sm:$0xff]   ;;  %v4831_v31 = vld [vmem:[%s6447_s5] sm:$0xff]  }
 0x414   :  { %v2569_v33 = vpop.f32.mrb[22].mxu1  ;;  %4403 = vmatpush3.bf16.msra.mxu1 %v4804_v21  ;;  %v4834_v23 = vld [vmem:[%s6447_s5 + $0x18] sm:$0xff]  }
 0x415   :  { %v3482_v57 = vadd.f32 %v3481_v16, %v2569_v33  ;;  %v4271_v24 = vpop.f32.mrb[23].mxu1  ;;  %4404 = vmatprep.subr.bf16.mxu1 %v4848_v43  ;;  %v4835_v33 = vld [vmem:[%s6447_s5 + $0x20] sm:$0xff]  }
 0x418   :  { %4405 = vmatpush3.bf16.msra.mxu1 %v4805_v10  ;;  %v4836_v10 = vld [vmem:[%s6447_s5 + $0x28] sm:$0xff]  }
 0x419   :  { %4406 = vmatprep.subr.bf16.mxu1 %v4848_v43 }
 0x41c   :  { %4407 = vmatpush3.bf16.msra.mxu1 %v4806_v28 }
 0x41d   :  { %4412 = vmatprep.subr.bf16.mxu1 %v4848_v43 }
 0x41f   :  { %4409 = vmatmul.mubr.bf16.vlgmr.msra.gmra.mrb[48].mxu1 %v5955_v48  ;;  %v4810_v48 = vld [vmem:[%s6445_s3 + $0x358] sm:$0xff]  }
 0x420   :  { %4413 = vmatpush3.bf16.msra.mxu1 %v4807_v32  ;;  %4428 = vmatprep.mubr.msk.bf16.mxu1 %vm4849_vm2, %v4848_v43 }
 0x421   :  { %4414 = vmatprep.subr.bf16.mxu1 %v4848_v43 }
 0x424   :  { %4415 = vmatpush3.bf16.msra.mxu1 %v4808_v63  ;;  %v4837_v63 = vld [vmem:[%s6447_s5 + $0x30] sm:$0xff]  }
 0x425   :  { %4416 = vmatprep.subr.bf16.mxu1 %v4848_v43 }
 0x428   :  { %4417 = vmatpush3.bf16.msra.mxu1 %v4809_v55 }
 0x429   :  { %4418 = vmatprep.subr.bf16.mxu1 %v4848_v43 }
 0x42c   :  { %4419 = vmatpush3.bf16.msra.mxu1 %v4810_v48 }
 0x42d   :  { %4420 = vmatprep.subr.bf16.mxu1 %v4848_v43 }
 0x430   :  { %4421 = vmatpush3.bf16.msra.mxu1 %v4811_v36  ;;  %v4838_v36 = vld [vmem:[%s6447_s5 + $0x38] sm:$0xff]  }
 0x431   :  { %4422 = vmatprep.subr.bf16.mxu1 %v4848_v43 }
 0x432   :  { %v2655_v52 = vpop.f32.mrb[24].mxu1 }
 0x433   :  { %v3468_v35 = vadd.f32 %v3467_v17, %v2655_v52  ;;  %v4290_v26 = vpop.f32.mrb[25].mxu1  ;;  %v4833_v17 = vld [vmem:[%s6447_s5 + $0x10] sm:$0xff]  }
 0x434   :  { %v2658_v20 = vpop.f32.mrb[26].mxu1  ;;  %4423 = vmatpush3.bf16.msra.mxu1 %v4812_v37 }
 0x435   :  { %v3483_v39 = vadd.f32 %v3482_v57, %v2658_v20  ;;  %v4291_v46 = vpop.f32.mrb[27].mxu1  ;;  %4424 = vmatprep.subr.bf16.mxu1 %v4848_v43 }
 0x438   :  { %4425 = vmatpush3.bf16.msra.mxu1 %v4813_v53 }
 0x439   :  { %4426 = vmatprep.subr.bf16.mxu1 %v4848_v43 }
 0x43c   :  { %4427 = vmatpush3.bf16.msra.mxu1 %v4814_v2 }
 0x43d   :  { %4432 = vmatprep.subr.bf16.mxu1 %v4848_v43 }
 0x43f   :  { %4429 = vmatmul.mubr.bf16.vlgmr.msra.gmra.mrb[52].mxu1 %v5972_v44  ;;  %v4818_v44 = vld [vmem:[%s6445_s3 + $0x398] sm:$0xff]  }
 0x440   :  { %4433 = vmatpush3.bf16.msra.mxu1 %v4815_v0  ;;  %4448 = vmatprep.mubr.msk.bf16.mxu1 %vm4849_vm2, %v4848_v43 }
 0x441   :  { %4434 = vmatprep.subr.bf16.mxu1 %v4848_v43 }
 0x444   :  { %4435 = vmatpush3.bf16.msra.mxu1 %v4816_v38 }
 0x445   :  { %4436 = vmatprep.subr.bf16.mxu1 %v4848_v43 }
 0x448   :  { %4437 = vmatpush3.bf16.msra.mxu1 %v4817_v1 }
 0x449   :  { %4438 = vmatprep.subr.bf16.mxu1 %v4848_v43 }
 0x44c   :  { %4439 = vmatpush3.bf16.msra.mxu1 %v4818_v44 }
 0x44d   :  { %4440 = vmatprep.subr.bf16.mxu1 %v4848_v43 }
 0x450   :  { %4441 = vmatpush3.bf16.msra.mxu1 %v4819_v8 }
 0x451   :  { %4442 = vmatprep.subr.bf16.mxu1 %v4848_v43 }
 0x452   :  { %v2744_v41 = vpop.f32.mrb[28].mxu1 }
 0x453   :  { %v3469_v62 = vadd.f32 %v3468_v35, %v2744_v41  ;;  %v4310_v49 = vpop.f32.mrb[29].mxu1 }
 0x454   :  { %v2747_v42 = vpop.f32.mrb[30].mxu1  ;;  %4443 = vmatpush3.bf16.msra.mxu1 %v4820_v3 }
 0x455   :  { %v3484_v50 = vadd.f32 %v3483_v39, %v2747_v42  ;;  %v4311_v5 = vpop.f32.mrb[31].mxu1  ;;  %4444 = vmatprep.subr.bf16.mxu1 %v4848_v43  ;;  %v3989_v42 = vld [vmem:[%s6448_s4] ss:$0 sm:$0xff] }
 0x458   :  { %4445 = vmatpush3.bf16.msra.mxu1 %v4821_v27 }
 0x459   :  { %4446 = vmatprep.subr.bf16.mxu1 %v4848_v43 }
 0x45c   :  { %4447 = vmatpush3.bf16.msra.mxu1 %v4822_v18 }
 0x45d   :  { %4452 = vmatprep.subr.bf16.mxu1 %v4848_v43 }
 0x45f   :  { %4449 = vmatmul.mubr.bf16.vlgmr.msra.gmra.mrb[56].mxu1 %v5986_v6  ;;  %v4826_v6 = vld [vmem:[%s6445_s3 + $0x3d8] sm:$0xff]  }
 0x460   :  { %4453 = vmatpush3.bf16.msra.mxu1 %v4823_v45  ;;  %4468 = vmatprep.mubr.msk.bf16.mxu1 %vm4849_vm2, %v4848_v43 }
 0x461   :  { %4454 = vmatprep.subr.bf16.mxu1 %v4848_v43 }
 0x464   :  { %4455 = vmatpush3.bf16.msra.mxu1 %v4824_v14 }
 0x465   :  { %4456 = vmatprep.subr.bf16.mxu1 %v4848_v43 }
 0x468   :  { %4457 = vmatpush3.bf16.msra.mxu1 %v4825_v34 }
 0x469   :  { %4458 = vmatprep.subr.bf16.mxu1 %v4848_v43 }
 0x46c   :  { %4459 = vmatpush3.bf16.msra.mxu1 %v4826_v6 }
 0x46d   :  { %4460 = vmatprep.subr.bf16.mxu1 %v4848_v43 }
 0x470   :  { %4461 = vmatpush3.bf16.msra.mxu1 %v4827_v58 }
 0x471   :  { %4462 = vmatprep.subr.bf16.mxu1 %v4848_v43 }
 0x472   :  { %v2833_v29 = vpop.f32.mrb[32].mxu1 }
 0x473   :  { %v3470_v30 = vadd.f32 %v3469_v62, %v2833_v29  ;;  %v4330_v56 = vpop.f32.mrb[33].mxu1  ;;  %v3617_v29 = vlaneseq }
 0x474   :  { %v2836_v15 = vpop.f32.mrb[34].mxu1  ;;  %4463 = vmatpush3.bf16.msra.mxu1 %v4828_v40  ;;  %v3990_v56 = vld [vmem:[%s6449_s6] ss:$0 sm:$0xff] }
 0x475   :  { %v3485_v51 = vadd.f32 %v3484_v50, %v2836_v15  ;;  %v4331_v11 = vpop.f32.mrb[35].mxu1  ;;  %4464 = vmatprep.subr.bf16.mxu1 %v4848_v43 }
 0x478   :  { %4465 = vmatpush3.bf16.msra.mxu1 %v4829_v19 }
 0x479   :  { %4466 = vmatprep.subr.bf16.mxu1 %v4848_v43 }
 0x47c   :  { %4467 = vmatpush3.bf16.msra.mxu1 %v4830_v59 }
 0x47d   :  { %4472 = vmatprep.subr.bf16.mxu1 %v4848_v43 }
 0x47f   :  { %4469 = vmatmul.mubr.bf16.vlgmr.msra.gmra.mrb[60].mxu1 %v6000_v9  ;;  %v4832_v9 = vld [vmem:[%s6447_s5 + $0x8] sm:$0xff]  }
 0x480   :  { %4488 = vmatprep.mubr.msk.bf16.mxu1 %vm4849_vm2, %v4848_v43  ;;  %4473 = vmatpush3.bf16.msra.mxu1 %v4831_v31 }
 0x481   :  { %4474 = vmatprep.subr.bf16.mxu1 %v4848_v43 }
 0x484   :  { %4475 = vmatpush3.bf16.msra.mxu1 %v4832_v9 }
 0x485   :  { %4476 = vmatprep.subr.bf16.mxu1 %v4848_v43 }
 0x488   :  { %4477 = vmatpush3.bf16.msra.mxu1 %v4833_v17 }
 0x489   :  { %4478 = vmatprep.subr.bf16.mxu1 %v4848_v43 }
 0x48c   :  { %4479 = vmatpush3.bf16.msra.mxu1 %v4834_v23 }
 0x48d   :  { %4480 = vmatprep.subr.bf16.mxu1 %v4848_v43 }
 0x490   :  { %4481 = vmatpush3.bf16.msra.mxu1 %v4835_v33 }
 0x491   :  { %4482 = vmatprep.subr.bf16.mxu1 %v4848_v43 }
 0x492   :  { %v2922_v61 = vpop.f32.mrb[36].mxu1 }
 0x493   :  { %v3471_v13 = vadd.f32 %v3470_v30, %v2922_v61  ;;  %v4350_v7 = vpop.f32.mrb[37].mxu1  ;;  %v3618_v30 = vand.u32 127, %v3617_v29 }
 0x494   :  { %v2925_v16 = vpop.f32.mrb[38].mxu1  ;;  %4483 = vmatpush3.bf16.msra.mxu1 %v4836_v10 }
 0x495   :  { %v3486_v12 = vadd.f32 %v3485_v51, %v2925_v16  ;;  %v4351_v54 = vpop.f32.mrb[39].mxu1  ;;  %4484 = vmatprep.subr.bf16.mxu1 %v4848_v43  ;;  %vm3619_vm3 = vcmp.lt.s32.totalorder %v3618_v30, 10 }
 0x498   :  { %4485 = vmatpush3.bf16.msra.mxu1 %v4837_v63 }
 0x499   :  { %4486 = vmatprep.subr.bf16.mxu1 %v4848_v43 }
 0x49c   :  { %4487 = vmatpush3.bf16.msra.mxu1 %v4838_v36 }
 0x4b2   :  { %v3011_v25 = vpop.f32.mrb[40].mxu1 }
 0x4b3   :  { %v3472_v4 = vadd.f32 %v3471_v13, %v3011_v25  ;;  %v4370_v47 = vpop.f32.mrb[41].mxu1 }
 0x4b4   :  { %v3014_v22 = vpop.f32.mrb[42].mxu1 }
 0x4b5   :  { %v3487_v60 = vadd.f32 %v3486_v12, %v3014_v22  ;;  %v4371_v21 = vpop.f32.mrb[43].mxu1 }
 0x4d2   :  { %v3100_v57 = vpop.f32.mrb[44].mxu1 }
 0x4d3   :  { %v3473_v24 = vadd.f32 %v3472_v4, %v3100_v57  ;;  %v4390_v28 = vpop.f32.mrb[45].mxu1 }
 0x4d4   :  { %v3103_v32 = vpop.f32.mrb[46].mxu1 }
 0x4d5   :  { %v3488_v55 = vadd.f32 %v3487_v60, %v3103_v32  ;;  %v4391_v48 = vpop.f32.mrb[47].mxu1 }
 0x4f2   :  { %v3189_v37 = vpop.f32.mrb[48].mxu1 }
 0x4f3   :  { %v3474_v52 = vadd.f32 %v3473_v24, %v3189_v37  ;;  %v4410_v35 = vpop.f32.mrb[49].mxu1 }
 0x4f4   :  { %v3192_v26 = vpop.f32.mrb[50].mxu1 }
 0x4f5   :  { %v3489_v20 = vadd.f32 %v3488_v55, %v3192_v26  ;;  %v4411_v53 = vpop.f32.mrb[51].mxu1 }
 0x512   :  { %v3278_v39 = vpop.f32.mrb[52].mxu1 }
 0x513   :  { %v3475_v46 = vadd.f32 %v3474_v52, %v3278_v39  ;;  %v4430_v2 = vpop.f32.mrb[53].mxu1 }
 0x514   :  { %v3281_v0 = vpop.f32.mrb[54].mxu1 }
 0x515   :  { %v3490_v38 = vadd.f32 %v3489_v20, %v3281_v0  ;;  %v4431_v1 = vpop.f32.mrb[55].mxu1 }
 0x532   :  { %v3367_v44 = vpop.f32.mrb[56].mxu1 }
 0x533   :  { %v3476_v8 = vadd.f32 %v3475_v46, %v3367_v44  ;;  %v4450_v43 = vpop.f32.mrb[57].mxu1 }
 0x534   :  { %v3370_v3 = vpop.f32.mrb[58].mxu1 }
 0x535   :  { %v3491_v41 = vadd.f32 %v3490_v38, %v3370_v3  ;;  %v4451_v62 = vpop.f32.mrb[59].mxu1 }
 0x552   :  { %v3456_v49 = vpop.f32.mrb[60].mxu1 }
 0x553   :  { %v3477_v27 = vadd.f32 %v3476_v8, %v3456_v49  ;;  %v4470_v50 = vpop.f32.mrb[61].mxu1 }
 0x554   :  { %v3459_v5 = vpop.f32.mrb[62].mxu1 }
 0x555   :  { %v3500_v18 = vadd.f32 %v3989_v42, %v3477_v27  ;;  %v3492_v45 = vadd.f32 %v3491_v41, %v3459_v5  ;;  %v4471_v14 = vpop.f32.mrb[63].mxu1 }
 0x557   :  { %v3501_v34 = vadd.f32 %v3989_v42, %v3492_v45  ;;  %v3502_v6 = vmax.f32 %v3500_v18, 0.0 }
 0x559   :  { %v3503_v58 = vmax.f32 %v3501_v34, 0.0 }
 0x55b   :  { %v3504_v40 = vpack.c.bf16 %v3503_v58, %v3502_v6 }
 0x55d   :  { %4489 = vmatmul.mubr.bf16.vlgmr.msra.gmra.mrb[64].mxu1 %v3504_v40 }
 0x630   :  { %v3610_v15 = vpop.f32.mrb[64].mxu1 }
 0x631   :  { %v3611_v19 = vadd.f32 %v3990_v56, %v3610_v15  ;;  %v4490_v51 = vpop.f32.mrb[65].mxu1 }
 0x632   :  { %v3613_v11 = vpop.f32.mrb[66].mxu1 }
 0x633   :  { %v3614_v59 = vadd.f32 %v3990_v56, %v3613_v11  ;;  %v4491_v61 = vpop.f32.mrb[67].mxu1  ;;  %v3620_v13 = vsel %vm3619_vm3, %v3611_v19, -1e+30 }
 0x634   :  { %3622 = vmax.xlane.f32.xlu0 %v3620_v13 }
 0x635   :  { %v3621_v7 = vsel %vm3619_vm3, %v3614_v59, -1e+30 }
 0x638   :  { %3624 = vmax.xlane.f32.xlu0 %v3621_v7 }
 0x6c1   :  { %v3623_v16 = vpop.xlane.xlu0 %3622 }
 0x6c2   :  { %v3626_v12 = vsub.f32 %v3620_v13, %v3623_v16  ;;  %v3640_v17 = vsub.f32 %v3611_v19, %v3623_v16 }
 0x6c4   :  { %v3628_v54 = vmul.f32 1.442695, %v3626_v12 }
 0x6c5   :  { %v3625_v25 = vpop.xlane.xlu0 %3624 }
 0x6c6   :  { %v3627_v4 = vsub.f32 %v3621_v7, %v3625_v25  ;;  %4839 = vpow2.f32 %v3628_v54  ;;  %v3641_v57 = vsub.f32 %v3614_v59, %v3625_v25 }
 0x6c8   :  { %v3630_v47 = vmul.f32 1.442695, %v3627_v4 }
 0x6ca   :  { %4841 = vpow2.f32 %v3630_v47 }
 0x6d0   :  { %v4840_v22 = vpop.eup %4839 }
 0x6d1   :  { %3632 = vadd.xlane.f32.xlu1 %v4840_v22 }
 0x6d4   :  { %v4842_v60 = vpop.eup %4841 }
 0x6d5   :  { %3634 = vadd.xlane.f32.xlu1 %v4842_v60 }
 0x75e   :  { %v3633_v21 = vpop.xlane.xlu1 %3632 }
 0x75f   :  { %4843 = vlog2.f32 %v3633_v21 }
 0x762   :  { %v3635_v31 = vpop.xlane.xlu1 %3634 }
 0x763   :  { %4845 = vlog2.f32 %v3635_v31 }
 0x769   :  { %v4844_v9 = vpop.eup %4843 }
 0x76a   :  { %v3637_v23 = vmul.f32 0.6931472, %v4844_v9 }
 0x76c   :  { %v3642_v33 = vsub.f32 %v3640_v17, %v3637_v23 }
 0x76d   :  { %v4846_v10 = vpop.eup %4845 }
 0x76e   :  { %v3644_v24 = vsel %vm3619_vm3, %v3642_v33, 0.0  ;;  %v3639_v28 = vmul.f32 0.6931472, %v4846_v10 }
 0x76f   :  { %3646 = vst [vmem:[%s6450_s7] sm:$0xff] %v3644_v24 }
 0x770   :  { %v3643_v32 = vsub.f32 %v3641_v57, %v3639_v28 }
 0x772   :  { %v3645_v63 = vsel %vm3619_vm3, %v3643_v32, 0.0 }
 0x773   :  { %3647 = vst [vmem:[%s6450_s7 + $0x8] sm:$0xff] %v3645_v63 }

</bundles_post_ra>
